<compile_context>
chip_gen: v7x
topology: tpu7x:2x2x1
jax: 0.10.0
libtpu: 0.0.40
codegen_flags: <defaults>
</compile_context>

<pallas_src>
import jax
import jax.numpy as jnp
from jax.experimental import pallas as pl
from jax.experimental.pallas import tpu as pltpu

CHANNELS = 1
IMG_SIZE = 32
IMG_SHAPE = (CHANNELS, IMG_SIZE, IMG_SIZE)
LATENT_DIM = 100
LATENT_PAD = 128            # latent dim zero-padded to a full 128-lane tile
OUT_DIM = CHANNELS * IMG_SIZE * IMG_SIZE  # 1024
BN_EPS = 1e-5
LEAK = 0.2


def _leaky_relu(x):
    return jnp.where(x >= 0, x, LEAK * x)


def _bn_lrelu(h, gamma, beta):
    """Training-mode BatchNorm1d (biased variance) folded into a per-feature
    scale/shift, followed by LeakyReLU.  h is f32 (B, N); gamma/beta (1, N)."""
    mean = jnp.mean(h, axis=0, keepdims=True)
    var = jnp.mean(jnp.square(h - mean), axis=0, keepdims=True)
    scale = gamma * jax.lax.rsqrt(var + BN_EPS)
    shift = beta - mean * scale
    return _leaky_relu(h * scale + shift)


def generator_kernel(
    x_ref,
    w1_ref, b1_ref,
    w2_ref, g1_ref, be1_ref,
    w3_ref, g2_ref, be2_ref,
    g3_ref, be3_ref,
    b5_ref,
    w4_hbm, w5_hbm,
    out_ref,
    w4_vmem, w5_vmem, dma_sem,
):
    # Kick off the big late-layer weight DMAs immediately so they overlap with
    # the layer 1-3 compute (the small auto-DMA'd inputs are already in VMEM).
    cp4 = pltpu.make_async_copy(w4_hbm, w4_vmem, dma_sem.at[0])
    cp5 = pltpu.make_async_copy(w5_hbm, w5_vmem, dma_sem.at[1])
    cp4.start()
    cp5.start()

    # linear1 + LeakyReLU  (bias kept: no BN follows)
    x = x_ref[...].astype(jnp.bfloat16)
    h = jnp.dot(x, w1_ref[...], preferred_element_type=jnp.float32) + b1_ref[...]
    h = _leaky_relu(h)

    # linear2 (bias dropped: cancels in training-mode BN) + BN1 + LeakyReLU
    h = jnp.dot(h.astype(jnp.bfloat16), w2_ref[...],
                preferred_element_type=jnp.float32)
    h = _bn_lrelu(h, g1_ref[...], be1_ref[...])

    # linear3 + BN2 + LeakyReLU
    h = jnp.dot(h.astype(jnp.bfloat16), w3_ref[...],
                preferred_element_type=jnp.float32)
    h = _bn_lrelu(h, g2_ref[...], be2_ref[...])

    # linear4 + BN3 + LeakyReLU  (weight arrives via manual DMA)
    cp4.wait()
    h = jnp.dot(h.astype(jnp.bfloat16), w4_vmem[...],
                preferred_element_type=jnp.float32)
    h = _bn_lrelu(h, g3_ref[...], be3_ref[...])

    # linear5 + tanh
    cp5.wait()
    h = jnp.dot(h.astype(jnp.bfloat16), w5_vmem[...],
                preferred_element_type=jnp.float32) + b5_ref[...]
    out_ref[...] = jnp.tanh(h)


def init_params(key):
    """Deterministic parameter init mimicking PyTorch nn.Linear defaults
    (uniform(-1/sqrt(fan_in), 1/sqrt(fan_in))) and BN defaults (gamma=1,
    beta=0).  Weights are stored transposed ((in, out)) and cast to bfloat16;
    w1 is zero-padded on the input dim 100 -> 128."""
    dims = [(LATENT_DIM, 128), (128, 256), (256, 512), (512, 1024), (1024, OUT_DIM)]
    params = {}
    for i, (fan_in, fan_out) in enumerate(dims, start=1):
        key, kw, kb = jax.random.split(key, 3)
        bound = 1.0 / jnp.sqrt(jnp.float32(fan_in))
        w = jax.random.uniform(kw, (fan_in, fan_out), jnp.float32, -bound, bound)
        b = jax.random.uniform(kb, (1, fan_out), jnp.float32, -bound, bound)
        if i == 1:
            # zero-pad K: 100 -> 128 (exact; padded x columns are also zero)
            w = jnp.pad(w, ((0, LATENT_PAD - LATENT_DIM), (0, 0)))
        params[f"w{i}"] = w.astype(jnp.bfloat16)
        params[f"b{i}"] = b  # b2/b3/b4 are generated but unused (cancel in BN)
    for i, n in enumerate([256, 512, 1024], start=1):
        params[f"gamma{i}"] = jnp.ones((1, n), jnp.float32)
        params[f"beta{i}"] = jnp.zeros((1, n), jnp.float32)
    return params


def generator_forward(x, params):
    B = x.shape[0]
    x_pad = jnp.pad(x, ((0, 0), (0, LATENT_PAD - LATENT_DIM)))

    def full_spec(shape):
        return pl.BlockSpec(shape, lambda: tuple(0 for _ in shape))

    vmem_args = (
        x_pad,
        params["w1"], params["b1"],
        params["w2"], params["gamma1"], params["beta1"],
        params["w3"], params["gamma2"], params["beta2"],
        params["gamma3"], params["beta3"],
        params["b5"],
    )
    hbm_args = (params["w4"], params["w5"])

    in_specs = [full_spec(a.shape) for a in vmem_args] + [
        pl.BlockSpec(memory_space=pl.ANY),   # w4: manual DMA inside kernel
        pl.BlockSpec(memory_space=pl.ANY),   # w5: manual DMA inside kernel
    ]

    out = pl.pallas_call(
        generator_kernel,
        out_shape=jax.ShapeDtypeStruct((B, OUT_DIM), jnp.float32),
        in_specs=in_specs,
        out_specs=full_spec((B, OUT_DIM)),
        scratch_shapes=[
            pltpu.VMEM((512, OUT_DIM), jnp.bfloat16),   # w4 landing buffer
            pltpu.VMEM((1024, OUT_DIM), jnp.bfloat16),  # w5 landing buffer
            pltpu.SemaphoreType.DMA((2,)),
        ],
        compiler_params=pltpu.CompilerParams(vmem_limit_bytes=24 << 20),
    )(*vmem_args, *hbm_args)

    # view(B, 1, 32, 32) — NCHW, matching the PyTorch module
    return out.reshape(B, *IMG_SHAPE)


def generator_ref(x, params):
    """Pure-JAX reference mirroring the kernel's math (bf16 matmul operands,
    f32 accumulation, bias-free pre-BN linears)."""
    x_pad = jnp.pad(x, ((0, 0), (0, LATENT_PAD - LATENT_DIM)))
    h = jnp.dot(x_pad.astype(jnp.bfloat16), params["w1"],
                preferred_element_type=jnp.float32) + params["b1"]
    h = _leaky_relu(h)
    for i in range(2, 5):
        h = jnp.dot(h.astype(jnp.bfloat16), params[f"w{i}"],
                    preferred_element_type=jnp.float32)
        h = _bn_lrelu(h, params[f"gamma{i-1}"], params[f"beta{i-1}"])
    h = jnp.dot(h.astype(jnp.bfloat16), params["w5"],
                preferred_element_type=jnp.float32) + params["b5"]
    return jnp.tanh(h).reshape(x.shape[0], *IMG_SHAPE)


if __name__ == "__main__":
    key = jax.random.PRNGKey(0)
    kx, kp = jax.random.split(key)

    B = 8  # small batch (multiple of 8 keeps the sublane axis clean)
    x = jax.random.normal(kx, (B, LATENT_DIM), jnp.float32)
    params = init_params(kp)

    out = generator_forward(x, params)
    out = jax.block_until_ready(out)

    ref = generator_ref(x, params)
    assert out.shape == (B, CHANNELS, IMG_SIZE, IMG_SIZE), out.shape
    err = float(jnp.max(jnp.abs(out - ref)))
    assert jnp.allclose(out, ref, atol=1e-3, rtol=1e-3), err

    print("KERNEL_OK")
</pallas_src>

<mosaic_0001>
module attributes {stable_mosaic.version = 11 : i64} {
  func.func @generator_kernel(%arg0: memref<8x128xf32, #tpu.memory_space<vmem>>, %arg1: memref<128x128xbf16, #tpu.memory_space<vmem>>, %arg2: memref<1x128xf32, #tpu.memory_space<vmem>>, %arg3: memref<128x256xbf16, #tpu.memory_space<vmem>>, %arg4: memref<1x256xf32, #tpu.memory_space<vmem>>, %arg5: memref<1x256xf32, #tpu.memory_space<vmem>>, %arg6: memref<256x512xbf16, #tpu.memory_space<vmem>>, %arg7: memref<1x512xf32, #tpu.memory_space<vmem>>, %arg8: memref<1x512xf32, #tpu.memory_space<vmem>>, %arg9: memref<1x1024xf32, #tpu.memory_space<vmem>>, %arg10: memref<1x1024xf32, #tpu.memory_space<vmem>>, %arg11: memref<1x1024xf32, #tpu.memory_space<vmem>>, %arg12: memref<512x1024xbf16, #tpu.memory_space<any>>, %arg13: memref<1024x1024xbf16, #tpu.memory_space<any>>, %arg14: memref<8x1024xf32, #tpu.memory_space<vmem>>, %arg15: memref<512x1024xbf16, #tpu.memory_space<vmem>>, %arg16: memref<1024x1024xbf16, #tpu.memory_space<vmem>>, %arg17: memref<2x!tpu.dma_semaphore, #tpu.memory_space<semaphore_mem>>) attributes {dimension_semantics = [], scalar_prefetch = 0 : i64, scratch_operands = 3 : i64, tpu.core_type = #tpu.core_type<tc>} {
    %c0_i32 = arith.constant 0 : i32
    %0 = tpu.memref_slice %arg17[%c0_i32] : memref<2x!tpu.dma_semaphore, #tpu.memory_space<semaphore_mem>> -> memref<1x!tpu.dma_semaphore, #tpu.memory_space<semaphore_mem>>
    %1 = tpu.memref_squeeze %0 : memref<1x!tpu.dma_semaphore, #tpu.memory_space<semaphore_mem>> -> memref<!tpu.dma_semaphore, #tpu.memory_space<semaphore_mem>>
    tpu.enqueue_dma source(%arg12 : memref<512x1024xbf16, #tpu.memory_space<any>>) target(%arg15 : memref<512x1024xbf16, #tpu.memory_space<vmem>>) target_semaphore(%1 : memref<!tpu.dma_semaphore, #tpu.memory_space<semaphore_mem>>)
    %c1_i32 = arith.constant 1 : i32
    %2 = tpu.memref_slice %arg17[%c1_i32] : memref<2x!tpu.dma_semaphore, #tpu.memory_space<semaphore_mem>> -> memref<1x!tpu.dma_semaphore, #tpu.memory_space<semaphore_mem>>
    %3 = tpu.memref_squeeze %2 : memref<1x!tpu.dma_semaphore, #tpu.memory_space<semaphore_mem>> -> memref<!tpu.dma_semaphore, #tpu.memory_space<semaphore_mem>>
    tpu.enqueue_dma source(%arg13 : memref<1024x1024xbf16, #tpu.memory_space<any>>) target(%arg16 : memref<1024x1024xbf16, #tpu.memory_space<vmem>>) target_semaphore(%3 : memref<!tpu.dma_semaphore, #tpu.memory_space<semaphore_mem>>)
    %c0 = arith.constant 0 : index
    %c0_0 = arith.constant 0 : index
    %4 = vector.load %arg0[%c0, %c0_0] : memref<8x128xf32, #tpu.memory_space<vmem>>, vector<8x128xf32>
    %5 = arith.truncf %4 : vector<8x128xf32> to vector<8x128xbf16>
    %c0_1 = arith.constant 0 : index
    %c0_2 = arith.constant 0 : index
    %6 = vector.load %arg1[%c0_1, %c0_2] : memref<128x128xbf16, #tpu.memory_space<vmem>>, vector<128x128xbf16>
    %cst = arith.constant dense<0.000000e+00> : vector<8x128xf32>
    %7 = tpu.matmul %5, %6, %cst {dimension_numbers = #tpu.dot_dimension_numbers<[1], [0], [0], [1], [0, 0, 1, 1], [], []>} : vector<8x128xbf16>, vector<128x128xbf16>, vector<8x128xf32> -> vector<8x128xf32>
    %c0_3 = arith.constant 0 : index
    %c0_4 = arith.constant 0 : index
    %8 = vector.load %arg2[%c0_3, %c0_4] : memref<1x128xf32, #tpu.memory_space<vmem>>, vector<1x128xf32>
    %9 = vector.broadcast %8 : vector<1x128xf32> to vector<8x128xf32>
    %10 = arith.addf %7, %9 : vector<8x128xf32>
    %cst_5 = arith.constant 0.000000e+00 : f32
    %11 = vector.broadcast %cst_5 : f32 to vector<8x128xf32>
    %12 = arith.cmpf oge, %10, %11 : vector<8x128xf32>
    %cst_6 = arith.constant 2.000000e-01 : f32
    %13 = vector.broadcast %cst_6 : f32 to vector<8x128xf32>
    %14 = arith.mulf %13, %10 : vector<8x128xf32>
    %15 = arith.select %12, %10, %14 : vector<8x128xi1>, vector<8x128xf32>
    %16 = arith.truncf %15 : vector<8x128xf32> to vector<8x128xbf16>
    %c0_7 = arith.constant 0 : index
    %c0_8 = arith.constant 0 : index
    %17 = vector.load %arg3[%c0_7, %c0_8] : memref<128x256xbf16, #tpu.memory_space<vmem>>, vector<128x256xbf16>
    %cst_9 = arith.constant dense<0.000000e+00> : vector<8x256xf32>
    %18 = tpu.matmul %16, %17, %cst_9 {dimension_numbers = #tpu.dot_dimension_numbers<[1], [0], [0], [1], [0, 0, 1, 1], [], []>} : vector<8x128xbf16>, vector<128x256xbf16>, vector<8x256xf32> -> vector<8x256xf32>
    %c0_10 = arith.constant 0 : index
    %c0_11 = arith.constant 0 : index
    %19 = vector.load %arg4[%c0_10, %c0_11] : memref<1x256xf32, #tpu.memory_space<vmem>>, vector<1x256xf32>
    %c0_12 = arith.constant 0 : index
    %c0_13 = arith.constant 0 : index
    %20 = vector.load %arg5[%c0_12, %c0_13] : memref<1x256xf32, #tpu.memory_space<vmem>>, vector<1x256xf32>
    %cst_14 = arith.constant dense<0.000000e+00> : vector<256xf32>
    %21 = vector.multi_reduction <add>, %18, %cst_14 [0] : vector<8x256xf32> to vector<256xf32>
    %22 = vector.shape_cast %21 : vector<256xf32> to vector<1x256xf32>
    %cst_15 = arith.constant 8.000000e+00 : f32
    %23 = vector.broadcast %cst_15 : f32 to vector<1x256xf32>
    %24 = arith.divf %22, %23 : vector<1x256xf32>
    %25 = vector.broadcast %24 : vector<1x256xf32> to vector<8x256xf32>
    %26 = arith.subf %18, %25 : vector<8x256xf32>
    %27 = arith.mulf %26, %26 : vector<8x256xf32>
    %cst_16 = arith.constant dense<0.000000e+00> : vector<256xf32>
    %28 = vector.multi_reduction <add>, %27, %cst_16 [0] : vector<8x256xf32> to vector<256xf32>
    %29 = vector.shape_cast %28 : vector<256xf32> to vector<1x256xf32>
    %cst_17 = arith.constant 8.000000e+00 : f32
    %30 = vector.broadcast %cst_17 : f32 to vector<1x256xf32>
    %31 = arith.divf %29, %30 : vector<1x256xf32>
    %cst_18 = arith.constant 9.99999974E-6 : f32
    %32 = vector.broadcast %cst_18 : f32 to vector<1x256xf32>
    %33 = arith.addf %31, %32 : vector<1x256xf32>
    %34 = math.rsqrt %33 : vector<1x256xf32>
    %35 = arith.mulf %19, %34 : vector<1x256xf32>
    %36 = arith.mulf %24, %35 : vector<1x256xf32>
    %37 = arith.subf %20, %36 : vector<1x256xf32>
    %38 = vector.broadcast %35 : vector<1x256xf32> to vector<8x256xf32>
    %39 = arith.mulf %18, %38 : vector<8x256xf32>
    %40 = vector.broadcast %37 : vector<1x256xf32> to vector<8x256xf32>
    %41 = arith.addf %39, %40 : vector<8x256xf32>
    %cst_19 = arith.constant 0.000000e+00 : f32
    %42 = vector.broadcast %cst_19 : f32 to vector<8x256xf32>
    %43 = arith.cmpf oge, %41, %42 : vector<8x256xf32>
    %cst_20 = arith.constant 2.000000e-01 : f32
    %44 = vector.broadcast %cst_20 : f32 to vector<8x256xf32>
    %45 = arith.mulf %44, %41 : vector<8x256xf32>
    %46 = arith.select %43, %41, %45 : vector<8x256xi1>, vector<8x256xf32>
    %47 = arith.truncf %46 : vector<8x256xf32> to vector<8x256xbf16>
    %c0_21 = arith.constant 0 : index
    %c0_22 = arith.constant 0 : index
    %48 = vector.load %arg6[%c0_21, %c0_22] : memref<256x512xbf16, #tpu.memory_space<vmem>>, vector<256x512xbf16>
    %cst_23 = arith.constant dense<0.000000e+00> : vector<8x512xf32>
    %49 = tpu.matmul %47, %48, %cst_23 {dimension_numbers = #tpu.dot_dimension_numbers<[1], [0], [0], [1], [0, 0, 1, 1], [], []>} : vector<8x256xbf16>, vector<256x512xbf16>, vector<8x512xf32> -> vector<8x512xf32>
    %c0_24 = arith.constant 0 : index
    %c0_25 = arith.constant 0 : index
    %50 = vector.load %arg7[%c0_24, %c0_25] : memref<1x512xf32, #tpu.memory_space<vmem>>, vector<1x512xf32>
    %c0_26 = arith.constant 0 : index
    %c0_27 = arith.constant 0 : index
    %51 = vector.load %arg8[%c0_26, %c0_27] : memref<1x512xf32, #tpu.memory_space<vmem>>, vector<1x512xf32>
    %cst_28 = arith.constant dense<0.000000e+00> : vector<512xf32>
    %52 = vector.multi_reduction <add>, %49, %cst_28 [0] : vector<8x512xf32> to vector<512xf32>
    %53 = vector.shape_cast %52 : vector<512xf32> to vector<1x512xf32>
    %cst_29 = arith.constant 8.000000e+00 : f32
    %54 = vector.broadcast %cst_29 : f32 to vector<1x512xf32>
    %55 = arith.divf %53, %54 : vector<1x512xf32>
    %56 = vector.broadcast %55 : vector<1x512xf32> to vector<8x512xf32>
    %57 = arith.subf %49, %56 : vector<8x512xf32>
    %58 = arith.mulf %57, %57 : vector<8x512xf32>
    %cst_30 = arith.constant dense<0.000000e+00> : vector<512xf32>
    %59 = vector.multi_reduction <add>, %58, %cst_30 [0] : vector<8x512xf32> to vector<512xf32>
    %60 = vector.shape_cast %59 : vector<512xf32> to vector<1x512xf32>
    %cst_31 = arith.constant 8.000000e+00 : f32
    %61 = vector.broadcast %cst_31 : f32 to vector<1x512xf32>
    %62 = arith.divf %60, %61 : vector<1x512xf32>
    %cst_32 = arith.constant 9.99999974E-6 : f32
    %63 = vector.broadcast %cst_32 : f32 to vector<1x512xf32>
    %64 = arith.addf %62, %63 : vector<1x512xf32>
    %65 = math.rsqrt %64 : vector<1x512xf32>
    %66 = arith.mulf %50, %65 : vector<1x512xf32>
    %67 = arith.mulf %55, %66 : vector<1x512xf32>
    %68 = arith.subf %51, %67 : vector<1x512xf32>
    %69 = vector.broadcast %66 : vector<1x512xf32> to vector<8x512xf32>
    %70 = arith.mulf %49, %69 : vector<8x512xf32>
    %71 = vector.broadcast %68 : vector<1x512xf32> to vector<8x512xf32>
    %72 = arith.addf %70, %71 : vector<8x512xf32>
    %cst_33 = arith.constant 0.000000e+00 : f32
    %73 = vector.broadcast %cst_33 : f32 to vector<8x512xf32>
    %74 = arith.cmpf oge, %72, %73 : vector<8x512xf32>
    %cst_34 = arith.constant 2.000000e-01 : f32
    %75 = vector.broadcast %cst_34 : f32 to vector<8x512xf32>
    %76 = arith.mulf %75, %72 : vector<8x512xf32>
    %77 = arith.select %74, %72, %76 : vector<8x512xi1>, vector<8x512xf32>
    %c0_i32_35 = arith.constant 0 : i32
    %78 = tpu.memref_slice %arg17[%c0_i32_35] : memref<2x!tpu.dma_semaphore, #tpu.memory_space<semaphore_mem>> -> memref<1x!tpu.dma_semaphore, #tpu.memory_space<semaphore_mem>>
    %79 = tpu.memref_squeeze %78 : memref<1x!tpu.dma_semaphore, #tpu.memory_space<semaphore_mem>> -> memref<!tpu.dma_semaphore, #tpu.memory_space<semaphore_mem>>
    tpu.wait_dma2 semaphore(%79 : memref<!tpu.dma_semaphore, #tpu.memory_space<semaphore_mem>>) src(%arg12 : memref<512x1024xbf16, #tpu.memory_space<any>>) dst(%arg15 : memref<512x1024xbf16, #tpu.memory_space<vmem>>)
    %80 = arith.truncf %77 : vector<8x512xf32> to vector<8x512xbf16>
    %c0_36 = arith.constant 0 : index
    %c0_37 = arith.constant 0 : index
    %81 = vector.load %arg15[%c0_36, %c0_37] : memref<512x1024xbf16, #tpu.memory_space<vmem>>, vector<512x1024xbf16>
    %cst_38 = arith.constant dense<0.000000e+00> : vector<8x1024xf32>
    %82 = tpu.matmul %80, %81, %cst_38 {dimension_numbers = #tpu.dot_dimension_numbers<[1], [0], [0], [1], [0, 0, 1, 1], [], []>} : vector<8x512xbf16>, vector<512x1024xbf16>, vector<8x1024xf32> -> vector<8x1024xf32>
    %c0_39 = arith.constant 0 : index
    %c0_40 = arith.constant 0 : index
    %83 = vector.load %arg9[%c0_39, %c0_40] : memref<1x1024xf32, #tpu.memory_space<vmem>>, vector<1x1024xf32>
    %c0_41 = arith.constant 0 : index
    %c0_42 = arith.constant 0 : index
    %84 = vector.load %arg10[%c0_41, %c0_42] : memref<1x1024xf32, #tpu.memory_space<vmem>>, vector<1x1024xf32>
    %cst_43 = arith.constant dense<0.000000e+00> : vector<1024xf32>
    %85 = vector.multi_reduction <add>, %82, %cst_43 [0] : vector<8x1024xf32> to vector<1024xf32>
    %86 = vector.shape_cast %85 : vector<1024xf32> to vector<1x1024xf32>
    %cst_44 = arith.constant 8.000000e+00 : f32
    %87 = vector.broadcast %cst_44 : f32 to vector<1x1024xf32>
    %88 = arith.divf %86, %87 : vector<1x1024xf32>
    %89 = vector.broadcast %88 : vector<1x1024xf32> to vector<8x1024xf32>
    %90 = arith.subf %82, %89 : vector<8x1024xf32>
    %91 = arith.mulf %90, %90 : vector<8x1024xf32>
    %cst_45 = arith.constant dense<0.000000e+00> : vector<1024xf32>
    %92 = vector.multi_reduction <add>, %91, %cst_45 [0] : vector<8x1024xf32> to vector<1024xf32>
    %93 = vector.shape_cast %92 : vector<1024xf32> to vector<1x1024xf32>
    %cst_46 = arith.constant 8.000000e+00 : f32
    %94 = vector.broadcast %cst_46 : f32 to vector<1x1024xf32>
    %95 = arith.divf %93, %94 : vector<1x1024xf32>
    %cst_47 = arith.constant 9.99999974E-6 : f32
    %96 = vector.broadcast %cst_47 : f32 to vector<1x1024xf32>
    %97 = arith.addf %95, %96 : vector<1x1024xf32>
    %98 = math.rsqrt %97 : vector<1x1024xf32>
    %99 = arith.mulf %83, %98 : vector<1x1024xf32>
    %100 = arith.mulf %88, %99 : vector<1x1024xf32>
    %101 = arith.subf %84, %100 : vector<1x1024xf32>
    %102 = vector.broadcast %99 : vector<1x1024xf32> to vector<8x1024xf32>
    %103 = arith.mulf %82, %102 : vector<8x1024xf32>
    %104 = vector.broadcast %101 : vector<1x1024xf32> to vector<8x1024xf32>
    %105 = arith.addf %103, %104 : vector<8x1024xf32>
    %cst_48 = arith.constant 0.000000e+00 : f32
    %106 = vector.broadcast %cst_48 : f32 to vector<8x1024xf32>
    %107 = arith.cmpf oge, %105, %106 : vector<8x1024xf32>
    %cst_49 = arith.constant 2.000000e-01 : f32
    %108 = vector.broadcast %cst_49 : f32 to vector<8x1024xf32>
    %109 = arith.mulf %108, %105 : vector<8x1024xf32>
    %110 = arith.select %107, %105, %109 : vector<8x1024xi1>, vector<8x1024xf32>
    %c1_i32_50 = arith.constant 1 : i32
    %111 = tpu.memref_slice %arg17[%c1_i32_50] : memref<2x!tpu.dma_semaphore, #tpu.memory_space<semaphore_mem>> -> memref<1x!tpu.dma_semaphore, #tpu.memory_space<semaphore_mem>>
    %112 = tpu.memref_squeeze %111 : memref<1x!tpu.dma_semaphore, #tpu.memory_space<semaphore_mem>> -> memref<!tpu.dma_semaphore, #tpu.memory_space<semaphore_mem>>
    tpu.wait_dma2 semaphore(%112 : memref<!tpu.dma_semaphore, #tpu.memory_space<semaphore_mem>>) src(%arg13 : memref<1024x1024xbf16, #tpu.memory_space<any>>) dst(%arg16 : memref<1024x1024xbf16, #tpu.memory_space<vmem>>)
    %113 = arith.truncf %110 : vector<8x1024xf32> to vector<8x1024xbf16>
    %c0_51 = arith.constant 0 : index
    %c0_52 = arith.constant 0 : index
    %114 = vector.load %arg16[%c0_51, %c0_52] : memref<1024x1024xbf16, #tpu.memory_space<vmem>>, vector<1024x1024xbf16>
    %cst_53 = arith.constant dense<0.000000e+00> : vector<8x1024xf32>
    %115 = tpu.matmul %113, %114, %cst_53 {dimension_numbers = #tpu.dot_dimension_numbers<[1], [0], [0], [1], [0, 0, 1, 1], [], []>} : vector<8x1024xbf16>, vector<1024x1024xbf16>, vector<8x1024xf32> -> vector<8x1024xf32>
    %c0_54 = arith.constant 0 : index
    %c0_55 = arith.constant 0 : index
    %116 = vector.load %arg11[%c0_54, %c0_55] : memref<1x1024xf32, #tpu.memory_space<vmem>>, vector<1x1024xf32>
    %117 = vector.broadcast %116 : vector<1x1024xf32> to vector<8x1024xf32>
    %118 = arith.addf %115, %117 : vector<8x1024xf32>
    %119 = math.tanh %118 : vector<8x1024xf32>
    %c0_56 = arith.constant 0 : index
    %c0_57 = arith.constant 0 : index
    %120 = vector.load %arg14[%c0_56, %c0_57] : memref<8x1024xf32, #tpu.memory_space<vmem>>, vector<8x1024xf32>
    tpu.vector_store %arg14[%c0_56, %c0_57], %119 {strides = array<i32>} : memref<8x1024xf32, #tpu.memory_space<vmem>>, vector<8x1024xf32>,
    return
  }
}

</mosaic_0001>

<bundles_post_ra>
// kernel: tpu_custom_call.1
= control target key start
LH: loop header
LB: loop body
LE: loop exit
PB: predicated region body
PF: predicated region fallthrough
CT: control target
= control target key end

     0   :  { %19 = vsyncpa [#allocation6], 0  ;;  %s4897_s0 = inlined_call_operand.hbm [shape: f32[8,128], index: 0, kind: input, shape index: {}]   ;;  %s4898_s1 = inlined_call_operand.hbm [shape: bf16[128,128], index: 1, kind: input, shape index: {}]   ;;  %s4899_s2 = inlined_call_operand.hbm [shape: f32[1,128], index: 2, kind: input, shape index: {}]   ;;  %s4900_s3 = inlined_call_operand.hbm [shape: bf16[128,256], index: 3, kind: input, shape index: {}]   ;;  %s4901_s4 = inlined_call_operand.hbm [shape: f32[1,256], index: 4, kind: input, shape index: {}]   ;;  %s4902_s5 = inlined_call_operand.hbm [shape: f32[1,256], index: 5, kind: input, shape index: {}]   ;;  %s4903_s6 = inlined_call_operand.hbm [shape: bf16[256,512], index: 6, kind: input, shape index: {}]   ;;  %s4904_s7 = inlined_call_operand.hbm [shape: f32[1,512], index: 7, kind: input, shape index: {}]   ;;  %s4905_s8 = inlined_call_operand.hbm [shape: f32[1,512], index: 8, kind: input, shape index: {}]   ;;  %s4906_s9 = inlined_call_operand.hbm [shape: f32[1,1024], index: 9, kind: input, shape index: {}]   ;;  %s4907_s10 = inlined_call_operand.hbm [shape: f32[1,1024], index: 10, kind: input, shape index: {}]   ;;  %s4908_s11 = inlined_call_operand.hbm [shape: f32[1,1024], index: 11, kind: input, shape index: {}]   ;;  %s4909_s12 = inlined_call_operand.hbm [shape: bf16[512,1024], index: 12, kind: input, shape index: {}]   ;;  %s4910_s13 = inlined_call_operand.hbm [shape: bf16[1024,1024], index: 13, kind: input, shape index: {}]   ;;  %s4911_s14 = inlined_call_operand.hbm [shape: f32[8,1024], index: 14, kind: output, shape index: {}]  }
   0x1   :  { %20 = vsyncpa [#allocation9], 0 }
   0x2   :  { %21 = vsyncpa [#allocation12], 0 }
   0x3   :  { %22 = vsyncpa [#allocation15], 0 }
   0x4   :  { %23 = vsyncpa [#allocation18], 0 }
   0x5   :  { %24 = vsyncpa [#allocation21], 0 }
   0x6   :  { %25 = vsyncpa [#allocation24], 0 }
   0x7   :  { %26 = vsyncpa [#allocation7], 0  ;;  %s4257_s29 = smov [#allocation8]   ;;  %s3951_s17 = scalar_lea.hbm %s4898_s1, 1024 }
   0x8   :  { %s42_s30 = sshll.u32 %s4257_s29, 4  ;;  %p3952_p0 = scmp.ne.s32.totalorder %s4898_s1, %s3951_s17  ;;  %s43_s30 = int_to_ptr.vmem [resolvable:$true] %s42_s30 }
   0x9   :  { %p3955_p1 = scmp.lt.u32.totalorder %s3951_s17, %s4898_s1 }
   0xb   :  { %p3957_p2 = pnand %p3955_p1, %p3952_p0 }
   0xd   :  { %3960 = shalt.err (!%p3957_p2)
}
   0xe   :  { %s3961_s22 = scalar_lea.vmem %s43_s30, 1024  ;;  %p3966_p4 = scmp.lt.s32.totalorder %s43_s30, %s43_s30 }
   0xf   :  { %p3962_p3 = scmp.ne.s32.totalorder %s43_s30, %s3961_s22  ;;  %p3967_p5 = scmp.lt.s32.totalorder %s3961_s22, %s3961_s22 }
  0x11   :  { %p3968_p6 = por %p3967_p5, %p3966_p4 }
  0x13   :  { %p3969_p7 = pnand %p3968_p6, %p3962_p3 }
  0x15   :  { %3972 = shalt.err (!%p3969_p7)
}
  0x16   :  { %s4258_s23 = smov 64   ;;  %s4912_s24 = smov 4  }
  0x17   :  { %48 = dma.hbm_to_vmem [thread:$0]  %s4898_s1, 1024, %s43_s30, [#allocation9], %s4258_s23, %s4258_s23, %s4912_s24  }
  0x18   :  { %s4260_s27 = smov [#allocation11]   ;;  %s3973_s16 = scalar_lea.hbm %s4900_s3, 2048 }
  0x19   :  { %s64_s28 = sshll.u32 %s4260_s27, 4  ;;  %p3974_p8 = scmp.ne.s32.totalorder %s4900_s3, %s3973_s16  ;;  %s65_s28 = int_to_ptr.vmem [resolvable:$true] %s64_s28 }
  0x1a   :  { %p3977_p9 = scmp.lt.u32.totalorder %s3973_s16, %s4900_s3 }
  0x1c   :  { %p3979_p10 = pnand %p3977_p9, %p3974_p8 }
  0x1e   :  { %3982 = shalt.err (!%p3979_p10)
}
  0x1f   :  { %s3983_s21 = scalar_lea.vmem %s65_s28, 2048  ;;  %p3988_p12 = scmp.lt.s32.totalorder %s65_s28, %s65_s28 }
  0x20   :  { %p3984_p11 = scmp.ne.s32.totalorder %s65_s28, %s3983_s21  ;;  %p3989_p13 = scmp.lt.s32.totalorder %s3983_s21, %s3983_s21 }
  0x22   :  { %p3990_p0 = por %p3989_p13, %p3988_p12 }
  0x24   :  { %p3991_p1 = pnand %p3990_p0, %p3984_p11 }
  0x26   :  { %3994 = shalt.err (!%p3991_p1)
}
  0x27   :  { %s4261_s1 = smov 128   ;;  %s4262_s30 = smov 8  }
  0x28   :  { %70 = dma.hbm_to_vmem [thread:$0]  %s4900_s3, 2048, %s65_s28, [#allocation12], %s4261_s1, %s4261_s1, %s4262_s30  }
  0x29   :  { %s4263_s26 = smov [#allocation14]   ;;  %s4264_s29 = smov [#allocation17]  }
  0x2a   :  { %s87_s27 = sshll.u32 %s4263_s26, 4  ;;  %s109_s15 = sshll.u32 %s4264_s29, 4  ;;  %s88_s27 = int_to_ptr.vmem [resolvable:$true] %s87_s27  ;;  %s110_s15 = int_to_ptr.vmem [resolvable:$true] %s109_s15 }
  0x2b   :  { %s3995_s18 = scalar_lea.hbm %s4902_s5, 32 }
  0x2c   :  { %p3996_p2 = scmp.ne.s32.totalorder %s4902_s5, %s3995_s18  ;;  %p3999_p3 = scmp.lt.u32.totalorder %s3995_s18, %s4902_s5 }
  0x2e   :  { %p4001_p4 = pnand %p3999_p3, %p3996_p2 }
  0x30   :  { %4004 = shalt.err (!%p4001_p4)
}
  0x31   :  { %s4005_s3 = scalar_lea.vmem %s88_s27, 32  ;;  %p4010_p6 = scmp.lt.s32.totalorder %s88_s27, %s88_s27 }
  0x32   :  { %p4006_p5 = scmp.ne.s32.totalorder %s88_s27, %s4005_s3  ;;  %p4011_p7 = scmp.lt.s32.totalorder %s4005_s3, %s4005_s3 }
  0x34   :  { %p4012_p8 = por %p4011_p7, %p4010_p6 }
  0x36   :  { %p4013_p9 = pnand %p4012_p8, %p4006_p5 }
  0x38   :  { %4016 = shalt.err (!%p4013_p9)
}
  0x39   :  { %90 = dma.hbm_to_vmem [thread:$0]  %s4902_s5, 32, %s88_s27, [#allocation15]  }
  0x3a   :  { %s4017_s29 = scalar_lea.hbm %s4904_s7, 64 }
  0x3b   :  { %p4018_p10 = scmp.ne.s32.totalorder %s4904_s7, %s4017_s29  ;;  %p4021_p11 = scmp.lt.u32.totalorder %s4017_s29, %s4904_s7 }
  0x3d   :  { %p4023_p12 = pnand %p4021_p11, %p4018_p10 }
  0x3f   :  { %4026 = shalt.err (!%p4023_p12)
}
  0x40   :  { %s4027_s19 = scalar_lea.vmem %s110_s15, 64  ;;  %p4032_p0 = scmp.lt.s32.totalorder %s110_s15, %s110_s15 }
  0x41   :  { %p4028_p13 = scmp.ne.s32.totalorder %s110_s15, %s4027_s19  ;;  %p4033_p1 = scmp.lt.s32.totalorder %s4027_s19, %s4027_s19 }
  0x43   :  { %p4034_p2 = por %p4033_p1, %p4032_p0 }
  0x45   :  { %p4035_p3 = pnand %p4034_p2, %p4028_p13 }
  0x47   :  { %4038 = shalt.err (!%p4035_p3)
}
  0x48   :  { %112 = dma.hbm_to_vmem [thread:$0]  %s4904_s7, 64, %s110_s15, [#allocation18]  }
  0x49   :  { %s4265_s20 = smov [#allocation20]   ;;  %s4266_s3 = smov [#allocation5]  }
  0x4a   :  { %s129_s21 = sshll.u32 %s4265_s20, 4  ;;  %s33_s28 = sshll.u32 %s4266_s3, 4  ;;  %s130_s21 = int_to_ptr.vmem [resolvable:$true] %s129_s21  ;;  %s34_s28 = int_to_ptr.vmem [resolvable:$true] %s33_s28 }
  0x4b   :  { %s4039_s26 = scalar_lea.hbm %s4906_s9, 128 }
  0x4c   :  { %p4040_p4 = scmp.ne.s32.totalorder %s4906_s9, %s4039_s26  ;;  %p4043_p5 = scmp.lt.u32.totalorder %s4039_s26, %s4906_s9 }
  0x4e   :  { %p4045_p6 = pnand %p4043_p5, %p4040_p4 }
  0x50   :  { %4048 = shalt.err (!%p4045_p6)
}
  0x51   :  { %s4049_s7 = scalar_lea.vmem %s130_s21, 128  ;;  %p4054_p8 = scmp.lt.s32.totalorder %s130_s21, %s130_s21 }
  0x52   :  { %p4050_p7 = scmp.ne.s32.totalorder %s130_s21, %s4049_s7  ;;  %p4055_p9 = scmp.lt.s32.totalorder %s4049_s7, %s4049_s7 }
  0x54   :  { %p4056_p10 = por %p4055_p9, %p4054_p8 }
  0x56   :  { %p4057_p11 = pnand %p4056_p10, %p4050_p7 }
  0x58   :  { %4060 = shalt.err (!%p4057_p11)
}
  0x59   :  { %132 = dma.hbm_to_vmem [thread:$0]  %s4906_s9, 128, %s130_s21, [#allocation21]  }
  0x5a   :  { %s4061_s27 = scalar_lea.hbm %s4897_s0, 128 }
  0x5b   :  { %p4062_p12 = scmp.ne.s32.totalorder %s4897_s0, %s4061_s27  ;;  %p4065_p13 = scmp.lt.u32.totalorder %s4061_s27, %s4897_s0 }
  0x5d   :  { %p4067_p0 = pnand %p4065_p13, %p4062_p12 }
  0x5f   :  { %4070 = shalt.err (!%p4067_p0)
}
  0x60   :  { %s4071_s26 = scalar_lea.vmem %s34_s28, 128  ;;  %p4076_p2 = scmp.lt.s32.totalorder %s34_s28, %s34_s28 }
  0x61   :  { %p4072_p1 = scmp.ne.s32.totalorder %s34_s28, %s4071_s26  ;;  %p4077_p3 = scmp.lt.s32.totalorder %s4071_s26, %s4071_s26 }
  0x63   :  { %p4078_p4 = por %p4077_p3, %p4076_p2 }
  0x65   :  { %p4079_p5 = pnand %p4078_p4, %p4072_p1 }
  0x67   :  { %4082 = shalt.err (!%p4079_p5)
}
  0x68   :  { %36 = dma.hbm_to_vmem [thread:$0]  %s4897_s0, 128, %s34_s28, [#allocation6]  }
  0x69   :  { %s4267_s29 = smov [#allocation10]   ;;  %s4268_s24 = smov [#allocation13]  }
  0x6a   :  { %s55_s16 = sshll.u32 %s4267_s29, 4  ;;  %s77_s17 = sshll.u32 %s4268_s24, 4  ;;  %s56_s16 = int_to_ptr.vmem [resolvable:$true] %s55_s16  ;;  %s78_s17 = int_to_ptr.vmem [resolvable:$true] %s77_s17 }
  0x6b   :  { %s4083_s18 = scalar_lea.hbm %s4899_s2, 16 }
  0x6c   :  { %p4084_p6 = scmp.ne.s32.totalorder %s4899_s2, %s4083_s18  ;;  %p4087_p7 = scmp.lt.u32.totalorder %s4083_s18, %s4899_s2 }
  0x6e   :  { %p4089_p8 = pnand %p4087_p7, %p4084_p6 }
  0x70   :  { %4092 = shalt.err (!%p4089_p8)
}
  0x71   :  { %s4093_s0 = scalar_lea.vmem %s56_s16, 16  ;;  %s4097_s28 = scalar_lea.vmem %s56_s16, 32 }
  0x72   :  { %p4094_p9 = scmp.ne.s32.totalorder %s56_s16, %s4093_s0  ;;  %p4098_p10 = scmp.lt.s32.totalorder %s56_s16, %s56_s16 }
  0x73   :  { %p4099_p11 = scmp.lt.s32.totalorder %s4097_s28, %s4093_s0 }
  0x75   :  { %p4100_p12 = por %p4099_p11, %p4098_p10 }
  0x77   :  { %p4101_p13 = pnand %p4100_p12, %p4094_p9 }
  0x79   :  { %4104 = shalt.err (!%p4101_p13)
}
  0x7a   :  { %58 = dma.hbm_to_vmem [thread:$0]  %s4899_s2, 16, %s56_s16, [#allocation9]  }
  0x7b   :  { %s4105_s9 = scalar_lea.hbm %s4901_s4, 32 }
  0x7c   :  { %p4106_p0 = scmp.ne.s32.totalorder %s4901_s4, %s4105_s9  ;;  %p4109_p1 = scmp.lt.u32.totalorder %s4105_s9, %s4901_s4 }
  0x7e   :  { %p4111_p2 = pnand %p4109_p1, %p4106_p0 }
  0x80   :  { %4114 = shalt.err (!%p4111_p2)
}
  0x81   :  { %s4115_s15 = scalar_lea.vmem %s78_s17, 32  ;;  %p4120_p4 = scmp.lt.s32.totalorder %s78_s17, %s78_s17 }
  0x82   :  { %p4116_p3 = scmp.ne.s32.totalorder %s78_s17, %s4115_s15  ;;  %p4121_p5 = scmp.lt.s32.totalorder %s4115_s15, %s4115_s15 }
  0x84   :  { %p4122_p6 = por %p4121_p5, %p4120_p4 }
  0x86   :  { %p4123_p7 = pnand %p4122_p6, %p4116_p3 }
  0x88   :  { %4126 = shalt.err (!%p4123_p7)
}
  0x89   :  { %80 = dma.hbm_to_vmem [thread:$0]  %s4901_s4, 32, %s78_s17, [#allocation12]  }
  0x8a   :  { %s4269_s18 = smov [#allocation16]   ;;  %s4127_s20 = scalar_lea.hbm %s4903_s6, 8192 }
  0x8b   :  { %s96_s19 = sshll.u32 %s4269_s18, 4  ;;  %p4128_p8 = scmp.ne.s32.totalorder %s4903_s6, %s4127_s20  ;;  %s97_s19 = int_to_ptr.vmem [resolvable:$true] %s96_s19 }
  0x8c   :  { %p4131_p9 = scmp.lt.u32.totalorder %s4127_s20, %s4903_s6 }
  0x8e   :  { %p4133_p10 = pnand %p4131_p9, %p4128_p8 }
  0x90   :  { %4136 = shalt.err (!%p4133_p10)
}
  0x91   :  { %s4137_s25 = scalar_lea.vmem %s97_s19, 8192  ;;  %p4142_p12 = scmp.lt.s32.totalorder %s97_s19, %s97_s19 }
  0x92   :  { %p4138_p11 = scmp.ne.s32.totalorder %s97_s19, %s4137_s25  ;;  %p4143_p13 = scmp.lt.s32.totalorder %s4137_s25, %s4137_s25 }
  0x94   :  { %p4144_p0 = por %p4143_p13, %p4142_p12 }
  0x96   :  { %p4145_p1 = pnand %p4144_p0, %p4138_p11 }
  0x98   :  { %4148 = shalt.err (!%p4145_p1)
}
  0x99   :  { %s4270_s4 = smov 256   ;;  %s4271_s17 = smov 16  }
  0x9a   :  { %102 = dma.hbm_to_vmem [thread:$0]  %s4903_s6, 8192, %s97_s19, [#allocation15], %s4270_s4, %s4270_s4, %s4271_s17  }
  0x9b   :  { %s4272_s21 = smov [#allocation19]   ;;  %s4273_s24 = smov [#allocation22]  }
  0x9c   :  { %s119_s29 = sshll.u32 %s4272_s21, 4  ;;  %s139_s7 = sshll.u32 %s4273_s24, 4  ;;  %s120_s29 = int_to_ptr.vmem [resolvable:$true] %s119_s29  ;;  %s140_s7 = int_to_ptr.vmem [resolvable:$true] %s139_s7 }
  0x9d   :  { %s4149_s16 = scalar_lea.hbm %s4905_s8, 64 }
  0x9e   :  { %p4150_p2 = scmp.ne.s32.totalorder %s4905_s8, %s4149_s16  ;;  %p4153_p3 = scmp.lt.u32.totalorder %s4149_s16, %s4905_s8 }
  0xa0   :  { %p4155_p4 = pnand %p4153_p3, %p4150_p2 }
  0xa2   :  { %4158 = shalt.err (!%p4155_p4)
}
  0xa3   :  { %s4159_s6 = scalar_lea.vmem %s120_s29, 64  ;;  %p4164_p6 = scmp.lt.s32.totalorder %s120_s29, %s120_s29 }
  0xa4   :  { %p4160_p5 = scmp.ne.s32.totalorder %s120_s29, %s4159_s6  ;;  %p4165_p7 = scmp.lt.s32.totalorder %s4159_s6, %s4159_s6 }
  0xa6   :  { %p4166_p8 = por %p4165_p7, %p4164_p6 }
  0xa8   :  { %p4167_p9 = pnand %p4166_p8, %p4160_p5 }
  0xaa   :  { %4170 = shalt.err (!%p4167_p9)
}
  0xab   :  { %122 = dma.hbm_to_vmem [thread:$0]  %s4905_s8, 64, %s120_s29, [#allocation18]  }
  0xac   :  { %s4171_s22 = scalar_lea.hbm %s4907_s10, 128 }
  0xad   :  { %p4172_p10 = scmp.ne.s32.totalorder %s4907_s10, %s4171_s22  ;;  %p4175_p11 = scmp.lt.u32.totalorder %s4171_s22, %s4907_s10 }
  0xaf   :  { %p4177_p12 = pnand %p4175_p11, %p4172_p10 }
  0xb1   :  { %4180 = shalt.err (!%p4177_p12)
}
  0xb2   :  { %s4181_s9 = scalar_lea.vmem %s140_s7, 128  ;;  %p4186_p0 = scmp.lt.s32.totalorder %s140_s7, %s140_s7 }
  0xb3   :  { %p4182_p13 = scmp.ne.s32.totalorder %s140_s7, %s4181_s9  ;;  %p4187_p1 = scmp.lt.s32.totalorder %s4181_s9, %s4181_s9 }
  0xb5   :  { %p4188_p2 = por %p4187_p1, %p4186_p0 }
  0xb7   :  { %p4189_p3 = pnand %p4188_p2, %p4182_p13 }
  0xb9   :  { %4192 = shalt.err (!%p4189_p3)
}
  0xba   :  { %142 = dma.hbm_to_vmem [thread:$0]  %s4907_s10, 128, %s140_s7, [#allocation21]  }
  0xbb   :  { %s4274_s29 = smov [#allocation23]   ;;  %s4193_s16 = scalar_lea.hbm %s4908_s11, 128 }
  0xbc   :  { %s149_s24 = sshll.u32 %s4274_s29, 4  ;;  %p4194_p4 = scmp.ne.s32.totalorder %s4908_s11, %s4193_s16  ;;  %s150_s24 = int_to_ptr.vmem [resolvable:$true] %s149_s24 }
  0xbd   :  { %p4197_p5 = scmp.lt.u32.totalorder %s4193_s16, %s4908_s11 }
  0xbf   :  { %p4199_p6 = pnand %p4197_p5, %p4194_p4 }
  0xc1   :  { %4202 = shalt.err (!%p4199_p6)
}
  0xc2   :  { %s4203_s6 = scalar_lea.vmem %s150_s24, 128  ;;  %p4208_p8 = scmp.lt.s32.totalorder %s150_s24, %s150_s24 }
  0xc3   :  { %p4204_p7 = scmp.ne.s32.totalorder %s150_s24, %s4203_s6  ;;  %p4209_p9 = scmp.lt.s32.totalorder %s4203_s6, %s4203_s6 }
  0xc5   :  { %p4210_p10 = por %p4209_p9, %p4208_p8 }
  0xc7   :  { %p4211_p11 = pnand %p4210_p10, %p4204_p7 }
  0xc9   :  { %4214 = shalt.err (!%p4211_p11)
}
  0xca   :  { %152 = dma.hbm_to_vmem [thread:$0]  %s4908_s11, 128, %s150_s24, [#allocation24]  }
  0xcb   :  { %4237 = dma.done.wait [#allocation6], 128  }
  0xcc   :  { %4238 = vsyncadd [#allocation6], 4294967168 }
  0xcd   :  { %4239 = dma.done.wait [#allocation9], 1040  }
  0xce   :  { %4240 = vsyncadd [#allocation9], 4294966256 }
  0xcf   :  { %4241 = dma.done.wait [#allocation12], 2080  }
  0xd0   :  { %4242 = vsyncadd [#allocation12], 4294965216 }
  0xd1   :  { %4243 = dma.done.wait [#allocation15], 8224  }
  0xd2   :  { %4244 = vsyncadd [#allocation15], 4294959072 }
  0xd3   :  { %4245 = dma.done.wait [#allocation18], 128  }
  0xd4   :  { %4246 = vsyncadd [#allocation18], 4294967168 }
  0xd5   :  { %4247 = dma.done.wait [#allocation21], 256  }
  0xd6   :  { %4248 = vsyncadd [#allocation21], 4294967040 }
  0xd7   :  { %4249 = dma.done.wait [#allocation24], 128  }
  0xd8   :  { %4250 = vsyncadd [#allocation24], 4294967168  ;;  %s194_s19 = sld [smem:[#allocation0]]   ;;  %210 = sst [smem:[#allocation27 + $0x2]] %s4262_s30  ;;  %v4275_v0 = vmov 0.0   ;;  %vm4276_vm0 = vmmov 0  }
  0xd9   :  { %3655 = vmatprep.subr.bf16.mxu0 %v4275_v0  ;;  %3671 = vmatprep.mubr.msk.bf16.mxu0 %vm4276_vm0, %v4275_v0  ;;  %212 = sst [smem:[#allocation27 + $0x3]] %s4258_s23  ;;  %s4277_s11 = smov [#allocation2]   ;;  %v4286_v27 = vmov 0  }
  0xda   :  { %s202_s0 = sshll.u32 %s4277_s11, 4  ;;  %214 = sst [smem:[#allocation27 + $0x4]] %s4261_s1  ;;  %505 = vmatprep.mubr.bf16.mxu1 %v4286_v27  ;;  %s203_s0 = int_to_ptr.vmem [resolvable:$true] %s202_s0 }
  0xdb   :  { %220 = sst [smem:[#allocation27 + $0x7]] %s4258_s23  ;;  %s4914_s28 = smov 4  }
  0xdc   :  { %222 = sst [smem:[#allocation27 + $0x8]] %s4914_s28  ;;  %s4278_s3 = smov 1024  }
  0xdd   :  { %206 = sst [smem:[#allocation27]] %s4278_s3  ;;  %s4279_s4 = smov 2  }
  0xde   :  { %s3551_s22 = sshll.u32 %s194_s19, 26  ;;  %208 = sst [smem:[#allocation27 + $0x1]] %s4278_s3 }
  0xdf   :  { %s3552_s25 = sadd.s32 134217728, %s3551_s22  ;;  %216 = sst [smem:[#allocation27 + $0x5]] %s4279_s4 }
  0xe0   :  { %s4280_s17 = smov 512   ;;  %s4281_s26 = smov [#allocation4]  }
  0xe1   :  { %218 = sst [smem:[#allocation27 + $0x6]] %s4280_s17  ;;  %s4282_s9 = smov [#allocation26]  }
  0xe2   :  { %224 = dma.general %s4909_s12, 32768, %s203_s0, %s4281_s26, %s4282_s9, [#allocation27], %s3552_s25, 0  }
  0xe3   :  { %241 = sst [smem:[#allocation29]] %s4278_s3  ;;  %s4283_s29 = smov [#allocation3]  }
  0xe4   :  { %243 = sst [smem:[#allocation29 + $0x1]] %s4278_s3  ;;  %s237_s24 = sshll.u32 %s4283_s29, 4  ;;  %s238_s24 = int_to_ptr.vmem [resolvable:$true] %s237_s24 }
  0xe5   :  { %245 = sst [smem:[#allocation29 + $0x2]] %s4262_s30  ;;  %s4284_s15 = smov [#allocation4 + $0x1]  }
  0xe6   :  { %247 = sst [smem:[#allocation29 + $0x3]] %s4258_s23  ;;  %s4285_s2 = smov [#allocation28]  }
  0xe7   :  { %249 = sst [smem:[#allocation29 + $0x4]] %s4261_s1 }
  0xe8   :  { %251 = sst [smem:[#allocation29 + $0x5]] %s4279_s4 }
  0xe9   :  { %253 = sst [smem:[#allocation29 + $0x6]] %s4280_s17 }
  0xea   :  { %255 = sst [smem:[#allocation29 + $0x7]] %s4258_s23 }
  0xeb   :  { %257 = sst [smem:[#allocation29 + $0x8]] %s4914_s28 }
  0xec   :  { %259 = dma.general %s4910_s13, 65536, %s238_s24, %s4284_s15, %s4285_s2, [#allocation29], %s3552_s25, 0  }
  0xed   :  { %v3779_v1 = vld [vmem:[#allocation8] sm:$0xff]   ;;  %v3780_v2 = vld [vmem:[#allocation8 + $0x8] sm:$0xff]   ;;  %v3781_v3 = vld [vmem:[#allocation8 + $0x10] sm:$0xff]  }
  0xee   :  { %3656 = vmatpush3.bf16.msra.mxu0 %v3779_v1  ;;  %v3787_v4 = vld [vmem:[#allocation11 + $0x4] ss:$8 sps:$4 sm:$0xff]   ;;  %v3789_v5 = vld [vmem:[#allocation11] ss:$8 sps:$4 sm:$0xff]   ;;  %v3782_v6 = vld [vmem:[#allocation8 + $0x18] sm:$0xff]  }
  0xef   :  { %3657 = vmatprep.subr.bf16.mxu0 %v4275_v0  ;;  %v3790_v7 = vld [vmem:[#allocation11 + $0x14] ss:$8 sps:$4 sm:$0xff]   ;;  %473 = vmatprep.subr.bf16.mxu1 %v3787_v4  ;;  %v3792_v8 = vld [vmem:[#allocation11 + $0x10] ss:$8 sps:$4 sm:$0xff]   ;;  %v3793_v9 = vld [vmem:[#allocation11 + $0x24] ss:$8 sps:$4 sm:$0xff]  }
  0xf0   :  { %474 = vmatpush1.bf16.msra.mxu1 %v3789_v5  ;;  %v3783_v10 = vld [vmem:[#allocation8 + $0x20] sm:$0xff]   ;;  %v3784_v11 = vld [vmem:[#allocation8 + $0x28] sm:$0xff]   ;;  %v3798_v14 = vld [vmem:[#allocation11 + $0x30] ss:$8 sps:$4 sm:$0xff]  }
  0xf1   :  { %475 = vmatprep.subr.bf16.mxu1 %v3790_v7  ;;  %v3795_v12 = vld [vmem:[#allocation11 + $0x20] ss:$8 sps:$4 sm:$0xff]   ;;  %v3796_v13 = vld [vmem:[#allocation11 + $0x34] ss:$8 sps:$4 sm:$0xff]   ;;  %v3799_v15 = vld [vmem:[#allocation11 + $0x44] ss:$8 sps:$4 sm:$0xff]  }
  0xf2   :  { %3658 = vmatpush3.bf16.msra.mxu0 %v3780_v2  ;;  %v3785_v16 = vld [vmem:[#allocation8 + $0x30] sm:$0xff]   ;;  %v3801_v17 = vld [vmem:[#allocation11 + $0x40] ss:$8 sps:$4 sm:$0xff]   ;;  %v3786_v19 = vld [vmem:[#allocation8 + $0x38] sm:$0xff]  }
  0xf3   :  { %3659 = vmatprep.subr.bf16.mxu0 %v4275_v0  ;;  %v3802_v18 = vld [vmem:[#allocation11 + $0x54] ss:$8 sps:$4 sm:$0xff]   ;;  %v3804_v21 = vld [vmem:[#allocation11 + $0x50] ss:$8 sps:$4 sm:$0xff]   ;;  %v3805_v23 = vld [vmem:[#allocation11 + $0x64] ss:$8 sps:$4 sm:$0xff]  }
  0xf4   :  { %476 = vmatpush1.bf16.msra.mxu1 %v3792_v8  ;;  %v260_v20 = vld [vmem:[#allocation5] sm:$0xff]  ;;  %v3807_v24 = vld [vmem:[#allocation11 + $0x60] ss:$8 sps:$4 sm:$0xff]   ;;  %v3555_v28 = vld [vmem:[#allocation10] ss:$0 sm:$0xff] }
  0xf5   :  { %477 = vmatprep.subr.bf16.mxu1 %v3793_v9  ;;  %v261_v22 = vpack.c.bf16 %v260_v20, %v260_v20  ;;  %v3808_v25 = vld [vmem:[#allocation11 + $0x74] ss:$8 sps:$4 sm:$0xff]   ;;  %v3810_v26 = vld [vmem:[#allocation11 + $0x70] ss:$8 sps:$4 sm:$0xff]  }
  0xf6   :  { %3660 = vmatpush3.bf16.msra.mxu0 %v3781_v3  ;;  %v3813_v37 = vld [vmem:[#allocation16 + $0x4] ss:$16 sps:$4 sm:$0xff]   ;;  %v3816_v38 = vld [vmem:[#allocation16 + $0xc] ss:$16 sps:$4 sm:$0xff]   ;;  %v3811_v39 = vld [vmem:[#allocation16] ss:$16 sps:$4 sm:$0xff]  }
  0xf7   :  { %3661 = vmatprep.subr.bf16.mxu0 %v4275_v0  ;;  %v3814_v40 = vld [vmem:[#allocation16 + $0x8] ss:$16 sps:$4 sm:$0xff]   ;;  %v3819_v41 = vld [vmem:[#allocation16 + $0x24] ss:$16 sps:$4 sm:$0xff]   ;;  %v3822_v42 = vld [vmem:[#allocation16 + $0x2c] ss:$16 sps:$4 sm:$0xff]  }
  0xf8   :  { %478 = vmatpush1.bf16.msra.mxu1 %v3795_v12  ;;  %v3817_v43 = vld [vmem:[#allocation16 + $0x20] ss:$16 sps:$4 sm:$0xff]   ;;  %v3820_v44 = vld [vmem:[#allocation16 + $0x28] ss:$16 sps:$4 sm:$0xff]   ;;  %v3825_v45 = vld [vmem:[#allocation16 + $0x44] ss:$16 sps:$4 sm:$0xff]  }
  0xf9   :  { %479 = vmatprep.subr.bf16.mxu1 %v3796_v13  ;;  %v3828_v46 = vld [vmem:[#allocation16 + $0x4c] ss:$16 sps:$4 sm:$0xff]   ;;  %v3823_v47 = vld [vmem:[#allocation16 + $0x40] ss:$16 sps:$4 sm:$0xff]   ;;  %v3826_v48 = vld [vmem:[#allocation16 + $0x48] ss:$16 sps:$4 sm:$0xff]  }
  0xfa   :  { %3662 = vmatpush3.bf16.msra.mxu0 %v3782_v6  ;;  %v3831_v49 = vld [vmem:[#allocation16 + $0x64] ss:$16 sps:$4 sm:$0xff]   ;;  %v3834_v50 = vld [vmem:[#allocation16 + $0x6c] ss:$16 sps:$4 sm:$0xff]   ;;  %v3829_v51 = vld [vmem:[#allocation16 + $0x60] ss:$16 sps:$4 sm:$0xff]  }
  0xfb   :  { %3663 = vmatprep.subr.bf16.mxu0 %v4275_v0  ;;  %v3832_v52 = vld [vmem:[#allocation16 + $0x68] ss:$16 sps:$4 sm:$0xff]   ;;  %v3837_v53 = vld [vmem:[#allocation16 + $0x84] ss:$16 sps:$4 sm:$0xff]   ;;  %v3840_v54 = vld [vmem:[#allocation16 + $0x8c] ss:$16 sps:$4 sm:$0xff]  }
  0xfc   :  { %480 = vmatpush1.bf16.msra.mxu1 %v3798_v14  ;;  %v3835_v55 = vld [vmem:[#allocation16 + $0x80] ss:$16 sps:$4 sm:$0xff]   ;;  %v3838_v56 = vld [vmem:[#allocation16 + $0x88] ss:$16 sps:$4 sm:$0xff]   ;;  %v3843_v57 = vld [vmem:[#allocation16 + $0xa4] ss:$16 sps:$4 sm:$0xff]  }
  0xfd   :  { %481 = vmatprep.subr.bf16.mxu1 %v3799_v15  ;;  %v3846_v58 = vld [vmem:[#allocation16 + $0xac] ss:$16 sps:$4 sm:$0xff]   ;;  %v3841_v59 = vld [vmem:[#allocation16 + $0xa0] ss:$16 sps:$4 sm:$0xff]   ;;  %v3844_v60 = vld [vmem:[#allocation16 + $0xa8] ss:$16 sps:$4 sm:$0xff]  }
  0xfe   :  { %3664 = vmatpush3.bf16.msra.mxu0 %v3783_v10  ;;  %v3849_v61 = vld [vmem:[#allocation16 + $0xc4] ss:$16 sps:$4 sm:$0xff]   ;;  %v3847_v62 = vld [vmem:[#allocation16 + $0xc0] ss:$16 sps:$4 sm:$0xff]   ;;  %v3850_v63 = vld [vmem:[#allocation16 + $0xc8] ss:$16 sps:$4 sm:$0xff]  }
  0xff   :  { %3665 = vmatprep.subr.bf16.mxu0 %v4275_v0  ;;  %v3855_v1 = vld [vmem:[#allocation16 + $0xe4] ss:$16 sps:$4 sm:$0xff]   ;;  %v3858_v2 = vld [vmem:[#allocation16 + $0xec] ss:$16 sps:$4 sm:$0xff]   ;;  %v3853_v3 = vld [vmem:[#allocation16 + $0xe0] ss:$16 sps:$4 sm:$0xff]  }
 0x100   :  { %482 = vmatpush1.bf16.msra.mxu1 %v3801_v17  ;;  %v3856_v4 = vld [vmem:[#allocation16 + $0xe8] ss:$16 sps:$4 sm:$0xff]   ;;  %v3861_v5 = vld [vmem:[#allocation16 + $0x104] ss:$16 sps:$4 sm:$0xff]   ;;  %v3864_v6 = vld [vmem:[#allocation16 + $0x10c] ss:$16 sps:$4 sm:$0xff]  }
 0x101   :  { %483 = vmatprep.subr.bf16.mxu1 %v3802_v18  ;;  %v3859_v7 = vld [vmem:[#allocation16 + $0x100] ss:$16 sps:$4 sm:$0xff]   ;;  %v3862_v8 = vld [vmem:[#allocation16 + $0x108] ss:$16 sps:$4 sm:$0xff]   ;;  %v3867_v9 = vld [vmem:[#allocation16 + $0x124] ss:$16 sps:$4 sm:$0xff]  }
 0x102   :  { %3666 = vmatpush3.bf16.msra.mxu0 %v3784_v11  ;;  %v3870_v10 = vld [vmem:[#allocation16 + $0x12c] ss:$16 sps:$4 sm:$0xff]   ;;  %v3865_v11 = vld [vmem:[#allocation16 + $0x120] ss:$16 sps:$4 sm:$0xff]   ;;  %v3868_v12 = vld [vmem:[#allocation16 + $0x128] ss:$16 sps:$4 sm:$0xff]  }
 0x103   :  { %3667 = vmatprep.subr.bf16.mxu0 %v4275_v0  ;;  %v3873_v13 = vld [vmem:[#allocation16 + $0x144] ss:$16 sps:$4 sm:$0xff]   ;;  %v3876_v14 = vld [vmem:[#allocation16 + $0x14c] ss:$16 sps:$4 sm:$0xff]   ;;  %v3871_v15 = vld [vmem:[#allocation16 + $0x140] ss:$16 sps:$4 sm:$0xff]  }
 0x104   :  { %484 = vmatpush1.bf16.msra.mxu1 %v3804_v21  ;;  %v3879_v17 = vld [vmem:[#allocation16 + $0x164] ss:$16 sps:$4 sm:$0xff]   ;;  %v3882_v18 = vld [vmem:[#allocation16 + $0x16c] ss:$16 sps:$4 sm:$0xff]   ;;  %v3880_v20 = vld [vmem:[#allocation16 + $0x168] ss:$16 sps:$4 sm:$0xff]  }
 0x105   :  { %485 = vmatprep.subr.bf16.mxu1 %v3805_v23  ;;  %v3885_v21 = vld [vmem:[#allocation16 + $0x184] ss:$16 sps:$4 sm:$0xff]   ;;  %v3883_v23 = vld [vmem:[#allocation16 + $0x180] ss:$16 sps:$4 sm:$0xff]  }
 0x106   :  { %3668 = vmatpush3.bf16.msra.mxu0 %v3785_v16  ;;  %v3874_v16 = vld [vmem:[#allocation16 + $0x148] ss:$16 sps:$4 sm:$0xff]   ;;  %v3889_v27 = vld [vmem:[#allocation16 + $0x1a0] ss:$16 sps:$4 sm:$0xff]  }
 0x107   :  { %3669 = vmatprep.subr.bf16.mxu0 %v4275_v0  ;;  %v3852_v0 = vld [vmem:[#allocation16 + $0xcc] ss:$16 sps:$4 sm:$0xff]  }
 0x108   :  { %486 = vmatpush1.bf16.msra.mxu1 %v3807_v24  ;;  %v3886_v24 = vld [vmem:[#allocation16 + $0x188] ss:$16 sps:$4 sm:$0xff]  }
 0x109   :  { %487 = vmatprep.subr.bf16.mxu1 %v3808_v25  ;;  %v3891_v25 = vld [vmem:[#allocation16 + $0x1a4] ss:$16 sps:$4 sm:$0xff]  }
 0x10a   :  { %3670 = vmatpush3.bf16.msra.mxu0 %v3786_v19  ;;  %v3877_v19 = vld [vmem:[#allocation16 + $0x160] ss:$16 sps:$4 sm:$0xff]  }
 0x10b   :  { %1011 = vmatprep.subr.bf16.mxu0 %v3813_v37 }
 0x10c   :  { %488 = vmatpush1.bf16.msra.mxu1 %v3810_v26  ;;  %v3894_v26 = vld [vmem:[#allocation16 + $0x1ac] ss:$16 sps:$4 sm:$0xff]  }
 0x10d   :  { %3672 = vmatmul.mubr.bf16.vlgmr.msra.gmra.mrb[0].mxu0 %v261_v22  ;;  %1052 = vmatprep.subr.bf16.mxu1 %v3816_v38  ;;  %v3888_v22 = vld [vmem:[#allocation16 + $0x18c] ss:$16 sps:$4 sm:$0xff]  }
 0x10e   :  { %1012 = vmatpush1.bf16.msra.mxu0 %v3811_v39 }
 0x10f   :  { %1013 = vmatprep.subr.bf16.mxu0 %v3819_v41 }
 0x112   :  { %1014 = vmatpush1.bf16.msra.mxu0 %v3817_v43 }
 0x113   :  { %1015 = vmatprep.subr.bf16.mxu0 %v3825_v45 }
 0x116   :  { %1016 = vmatpush1.bf16.msra.mxu0 %v3823_v47 }
 0x117   :  { %1017 = vmatprep.subr.bf16.mxu0 %v3831_v49 }
 0x11a   :  { %1018 = vmatpush1.bf16.msra.mxu0 %v3829_v51 }
 0x11b   :  { %1019 = vmatprep.subr.bf16.mxu0 %v3837_v53 }
 0x11e   :  { %1020 = vmatpush1.bf16.msra.mxu0 %v3835_v55 }
 0x11f   :  { %1021 = vmatprep.subr.bf16.mxu0 %v3843_v57 }
 0x122   :  { %1022 = vmatpush1.bf16.msra.mxu0 %v3841_v59 }
 0x123   :  { %1023 = vmatprep.subr.bf16.mxu0 %v3849_v61 }
 0x126   :  { %1024 = vmatpush1.bf16.msra.mxu0 %v3847_v62 }
 0x127   :  { %1025 = vmatprep.subr.bf16.mxu0 %v3855_v1 }
 0x12a   :  { %1026 = vmatpush1.bf16.msra.mxu0 %v3853_v3 }
 0x12b   :  { %1027 = vmatprep.subr.bf16.mxu0 %v3861_v5 }
 0x12e   :  { %1028 = vmatpush1.bf16.msra.mxu0 %v3859_v7 }
 0x12f   :  { %1029 = vmatprep.subr.bf16.mxu0 %v3867_v9 }
 0x132   :  { %1030 = vmatpush1.bf16.msra.mxu0 %v3865_v11  ;;  %v4287_v11 = vmov 1966171168  }
 0x133   :  { %1031 = vmatprep.subr.bf16.mxu0 %v3873_v13  ;;  %v559_v13 = vlaneseq }
 0x136   :  { %1032 = vmatpush1.bf16.msra.mxu0 %v3871_v15  ;;  %v4539_v15 = vshrl.u32 %v559_v13, 7 }
 0x137   :  { %1033 = vmatprep.subr.bf16.mxu0 %v3879_v17 }
 0x13a   :  { %1034 = vmatpush1.bf16.msra.mxu0 %v3877_v19 }
 0x13b   :  { %1035 = vmatprep.subr.bf16.mxu0 %v3885_v21  ;;  %v514_v21 = vld [vmem:[#allocation13] sm:$0x3] }
 0x13e   :  { %1036 = vmatpush1.bf16.msra.mxu0 %v3883_v23  ;;  %v4547_v23 = vsub.s32 0, %v4539_v15 }
 0x13f   :  { %1037 = vmatprep.subr.bf16.mxu0 %v3891_v25 }
 0x142   :  { %1038 = vmatpush1.bf16.msra.mxu0 %v3889_v27 }
 0x1e0   :  { %v367_v29 = vpop.f32.mrb[0].mxu0 }
 0x1e1   :  { %v368_v30 = vadd.f32 %v3555_v28, %v367_v29  ;;  %v3673_v31 = vpop.f32.mrb[1].mxu0  ;;  %v3892_v28 = vld [vmem:[#allocation16 + $0x1a8] ss:$16 sps:$4 sm:$0xff]   ;;  %v3897_v29 = vld [vmem:[#allocation16 + $0x1c4] ss:$16 sps:$4 sm:$0xff]  }
 0x1e2   :  { %v370_v32 = vpop.f32.mrb[2].mxu0  ;;  %v3895_v31 = vld [vmem:[#allocation16 + $0x1c0] ss:$16 sps:$4 sm:$0xff]   ;;  %1039 = vmatprep.subr.bf16.mxu0 %v3897_v29 }
 0x1e3   :  { %vm373_vm1 = vcmp.ge.f32.partialorder %v368_v30, 0.0  ;;  %v374_v33 = vmul.f32 0.2, %v368_v30  ;;  %v3674_v34 = vpop.f32.mrb[3].mxu0  ;;  %v3898_v32 = vld [vmem:[#allocation16 + $0x1c8] ss:$16 sps:$4 sm:$0xff]   ;;  %1040 = vmatpush1.bf16.msra.mxu0 %v3895_v31 }
 0x1e4   :  { %v3901_v34 = vld [vmem:[#allocation16 + $0x1e0] ss:$16 sps:$4 sm:$0xff]  }
 0x1e5   :  { %v375_v35 = vsel %vm373_vm1, %v368_v30, %v374_v33  ;;  %v3900_v30 = vld [vmem:[#allocation16 + $0x1cc] ss:$16 sps:$4 sm:$0xff]   ;;  %v3903_v33 = vld [vmem:[#allocation16 + $0x1e4] ss:$16 sps:$4 sm:$0xff]  }
 0x1e6   :  { %v376_v36 = vpack.c.bf16 %v375_v35, %v375_v35  ;;  %v3906_v35 = vld [vmem:[#allocation16 + $0x1ec] ss:$16 sps:$4 sm:$0xff]   ;;  %1041 = vmatprep.subr.bf16.mxu0 %v3903_v33 }
 0x1e7   :  { %1042 = vmatpush1.bf16.msra.mxu0 %v3901_v34  ;;  %v515_v34 = vld [vmem:[#allocation14] sm:$0x3] }
 0x1e8   :  { %506 = vmatmul.mubr.bf16.vlgmr.msra.gmra.mrb[0].mxu1 %v376_v36  ;;  %v3904_v36 = vld [vmem:[#allocation16 + $0x1e8] ss:$16 sps:$4 sm:$0xff]  }
 0x1e9   :  { %1053 = vmatpush1.bf16.msra.mxu1 %v3814_v40 }
 0x1ea   :  { %1054 = vmatprep.subr.bf16.mxu1 %v3822_v42 }
 0x1ed   :  { %1055 = vmatpush1.bf16.msra.mxu1 %v3820_v44 }
 0x1ee   :  { %1056 = vmatprep.subr.bf16.mxu1 %v3828_v46 }
 0x1f1   :  { %1057 = vmatpush1.bf16.msra.mxu1 %v3826_v48 }
 0x1f2   :  { %1058 = vmatprep.subr.bf16.mxu1 %v3834_v50 }
 0x1f5   :  { %1059 = vmatpush1.bf16.msra.mxu1 %v3832_v52 }
 0x1f6   :  { %1060 = vmatprep.subr.bf16.mxu1 %v3840_v54 }
 0x1f9   :  { %1061 = vmatpush1.bf16.msra.mxu1 %v3838_v56 }
 0x1fa   :  { %1062 = vmatprep.subr.bf16.mxu1 %v3846_v58 }
 0x1fd   :  { %1063 = vmatpush1.bf16.msra.mxu1 %v3844_v60 }
 0x1fe   :  { %1064 = vmatprep.subr.bf16.mxu1 %v3852_v0 }
 0x201   :  { %1065 = vmatpush1.bf16.msra.mxu1 %v3850_v63 }
 0x202   :  { %1066 = vmatprep.subr.bf16.mxu1 %v3858_v2 }
 0x205   :  { %1067 = vmatpush1.bf16.msra.mxu1 %v3856_v4 }
 0x206   :  { %1068 = vmatprep.subr.bf16.mxu1 %v3864_v6 }
 0x209   :  { %1069 = vmatpush1.bf16.msra.mxu1 %v3862_v8 }
 0x20a   :  { %1070 = vmatprep.subr.bf16.mxu1 %v3870_v10 }
 0x20d   :  { %1071 = vmatpush1.bf16.msra.mxu1 %v3868_v12  ;;  %v557_v12 = vunpack.c.l.s4 %v4287_v11 }
 0x20e   :  { %1072 = vmatprep.subr.bf16.mxu1 %v3876_v14 }
 0x20f   :  { %v558_v14 = vunpack.c.0.s8 %v557_v12 }
 0x211   :  { %1073 = vmatpush1.bf16.msra.mxu1 %v3874_v16  ;;  %v4542_v17 = vsub.s32 %v558_v14, %v4539_v15 }
 0x212   :  { %1074 = vmatprep.subr.bf16.mxu1 %v3882_v18 }
 0x215   :  { %1075 = vmatpush1.bf16.msra.mxu1 %v3880_v20 }
 0x216   :  { %1076 = vmatprep.subr.bf16.mxu1 %v3888_v22 }
 0x219   :  { %1077 = vmatpush1.bf16.msra.mxu1 %v3886_v24  ;;  %v4550_v24 = vsub.s32 1, %v4539_v15 }
 0x21a   :  { %1078 = vmatprep.subr.bf16.mxu1 %v3894_v26 }
 0x21d   :  { %1079 = vmatpush1.bf16.msra.mxu1 %v3892_v28 }
 0x21e   :  { %1080 = vmatprep.subr.bf16.mxu1 %v3900_v30 }
 0x221   :  { %1081 = vmatpush1.bf16.msra.mxu1 %v3898_v32 }
 0x222   :  { %1082 = vmatprep.subr.bf16.mxu1 %v3906_v35 }
 0x225   :  { %1083 = vmatpush1.bf16.msra.mxu1 %v3904_v36 }
 0x2bb   :  { %v507_v37 = vpop.f32.mrb[0].mxu1 }
 0x2bc   :  { %v516_v38 = vrot.slane %v507_v37, 4  ;;  %v509_v39 = vpop.f32.mrb[1].mxu1 }
 0x2bd   :  { %v522_v40 = vrot.slane %v509_v39, 4  ;;  %v511_v41 = vpop.f32.mrb[2].mxu1 }
 0x2be   :  { %v517_v42 = vadd.f32 %v516_v38, %v507_v37  ;;  %v512_v43 = vpop.f32.mrb[3].mxu1 }
 0x2bf   :  { %v523_v44 = vadd.f32 %v522_v40, %v509_v39 }
 0x2c0   :  { %v518_v45 = vrot.slane %v517_v42, 2 }
 0x2c1   :  { %v524_v46 = vrot.slane %v523_v44, 2 }
 0x2c2   :  { %v519_v47 = vadd.f32 %v518_v45, %v517_v42 }
 0x2c3   :  { %v525_v48 = vadd.f32 %v524_v46, %v523_v44 }
 0x2c4   :  { %v520_v49 = vrot.slane %v519_v47, 1 }
 0x2c5   :  { %v526_v50 = vrot.slane %v525_v48, 1 }
 0x2c6   :  { %v521_v51 = vadd.f32 %v520_v49, %v519_v47 }
 0x2c7   :  { %v527_v52 = vadd.f32 %v526_v50, %v525_v48 }
 0x2c8   :  { %v529_v53 = vmul.f32 0.125, %v521_v51 }
 0x2c9   :  { %v530_v54 = vmul.f32 0.125, %v527_v52 }
 0x2ca   :  { %v531_v55 = vsub.f32 %v507_v37, %v529_v53 }
 0x2cb   :  { %v532_v56 = vsub.f32 %v509_v39, %v530_v54 }
 0x2cc   :  { %v533_v57 = vmul.f32 %v531_v55, %v531_v55 }
 0x2cd   :  { %v534_v58 = vmul.f32 %v532_v56, %v532_v56 }
 0x2ce   :  { %v535_v59 = vrot.slane %v533_v57, 4 }
 0x2cf   :  { %v541_v60 = vrot.slane %v534_v58, 4 }
 0x2d0   :  { %v536_v61 = vadd.f32 %v535_v59, %v533_v57 }
 0x2d1   :  { %v542_v62 = vadd.f32 %v541_v60, %v534_v58 }
 0x2d2   :  { %v537_v63 = vrot.slane %v536_v61, 2 }
 0x2d3   :  { %v543_v0 = vrot.slane %v542_v62, 2 }
 0x2d4   :  { %v538_v1 = vadd.f32 %v537_v63, %v536_v61 }
 0x2d5   :  { %v544_v2 = vadd.f32 %v543_v0, %v542_v62 }
 0x2d6   :  { %v539_v3 = vrot.slane %v538_v1, 1 }
 0x2d7   :  { %v545_v4 = vrot.slane %v544_v2, 1 }
 0x2d8   :  { %v540_v5 = vadd.f32 %v539_v3, %v538_v1 }
 0x2d9   :  { %v546_v6 = vadd.f32 %v545_v4, %v544_v2 }
 0x2da   :  { %v547_v7 = vmul.f32 0.125, %v540_v5 }
 0x2db   :  { %v548_v8 = vmul.f32 0.125, %v546_v6 }
 0x2dc   :  { %v549_v9 = vadd.f32 1e-05, %v547_v7 }
 0x2dd   :  { %v550_v10 = vadd.f32 1e-05, %v548_v8 }
 0x2de   :  { %3907 = vrsqrt.f32 %v549_v9 }
 0x2df   :  { %3909 = vrsqrt.f32 %v550_v10 }
 0x2e8   :  { %v3908_v16 = vpop.eup %3907 }
 0x2e9   :  { %v3910_v18 = vpop.eup %3909 }
 0x2ea   :  { %v555_v19 = vcombine.low %v3908_v16, %v3910_v18 }
 0x2ec   :  { %v562_v20 = vrot.slane %v555_v19, %v4542_v17 }
 0x2ee   :  { %v569_v22 = vrot.slane %v562_v20, %v4542_v17 }
 0x2f0   :  { %v571_v25 = vmul.f32 %v569_v22, %v514_v21 }
 0x2f2   :  { %v576_v26 = vrot.slane %v571_v25, %v4547_v23  ;;  %v580_v27 = vrot.slane %v571_v25, %v4550_v24 }
 0x2f4   :  { %v583_v28 = vmul.f32 %v576_v26, %v529_v53  ;;  %v584_v29 = vmul.f32 %v580_v27, %v530_v54  ;;  %v604_v30 = vmul.f32 %v576_v26, %v507_v37  ;;  %v605_v31 = vmul.f32 %v580_v27, %v509_v39 }
 0x2f6   :  { %v587_v32 = vcombine.low %v583_v28, %v584_v29 }
 0x2f8   :  { %v594_v33 = vrot.slane %v587_v32, %v4542_v17 }
 0x2fa   :  { %v601_v35 = vrot.slane %v594_v33, %v4542_v17 }
 0x2fc   :  { %v603_v36 = vsub.f32 %v515_v34, %v601_v35 }
 0x2fe   :  { %v610_v38 = vrot.slane %v603_v36, %v4547_v23  ;;  %v614_v40 = vrot.slane %v603_v36, %v4550_v24 }
 0x300   :  { %v618_v41 = vadd.f32 %v614_v40, %v605_v31  ;;  %v617_v42 = vadd.f32 %v610_v38, %v604_v30 }
 0x302   :  { %vm620_vm2 = vcmp.ge.f32.partialorder %v618_v41, 0.0  ;;  %v622_v43 = vmul.f32 0.2, %v618_v41  ;;  %vm619_vm3 = vcmp.ge.f32.partialorder %v617_v42, 0.0  ;;  %v621_v44 = vmul.f32 0.2, %v617_v42 }
 0x304   :  { %v624_v45 = vsel %vm620_vm2, %v618_v41, %v622_v43  ;;  %v623_v37 = vsel %vm619_vm3, %v617_v42, %v621_v44 }
 0x305   :  { %v626_v39 = vpack.c.bf16 %v624_v45, %v624_v45  ;;  %v625_v46 = vpack.c.bf16 %v623_v37, %v623_v37 }
 0x307   :  { %1043 = vmatprep.mubr.bf16.mxu0 %v626_v39  ;;  %1084 = vmatprep.mubr.bf16.mxu1 %v626_v39 }
 0x308   :  { %1044 = vmatmul.mubr.bf16.vlgmr.msra.gmra.mrb[4].mxu0 %v625_v46  ;;  %1085 = vmatmul.mubr.bf16.vlgmr.msra.gmra.mrb[4].mxu1 %v625_v46 }
 0x3db   :  { %v4558_v47 = vpop.f32.mrb[4].mxu0  ;;  %v4560_v48 = vpop.f32.mrb[4].mxu1 }
 0x3dc   :  { %v1095_v49 = vrot.slane %v4558_v47, 4  ;;  %v1107_v50 = vrot.slane %v4560_v48, 4  ;;  %v4564_v51 = vpop.f32.mrb[5].mxu0  ;;  %v4566_v52 = vpop.f32.mrb[5].mxu1 }
 0x3dd   :  { %v1101_v53 = vrot.slane %v4564_v51, 4  ;;  %v1113_v54 = vrot.slane %v4566_v52, 4  ;;  %v1049_v55 = vpop.f32.mrb[6].mxu0  ;;  %v1090_v56 = vpop.f32.mrb[6].mxu1 }
 0x3de   :  { %v1096_v57 = vadd.f32 %v1095_v49, %v4558_v47  ;;  %v1108_v58 = vadd.f32 %v1107_v50, %v4560_v48  ;;  %v1050_v59 = vpop.f32.mrb[7].mxu0  ;;  %v1091_v60 = vpop.f32.mrb[7].mxu1 }
 0x3df   :  { %v1102_v61 = vadd.f32 %v1101_v53, %v4564_v51  ;;  %v1114_v62 = vadd.f32 %v1113_v54, %v4566_v52 }
 0x3e0   :  { %v1097_v63 = vrot.slane %v1096_v57, 2  ;;  %v1109_v0 = vrot.slane %v1108_v58, 2 }
 0x3e1   :  { %v1103_v1 = vrot.slane %v1102_v61, 2  ;;  %v1115_v2 = vrot.slane %v1114_v62, 2 }
 0x3e2   :  { %v1098_v3 = vadd.f32 %v1097_v63, %v1096_v57  ;;  %v1110_v4 = vadd.f32 %v1109_v0, %v1108_v58 }
 0x3e3   :  { %v1104_v5 = vadd.f32 %v1103_v1, %v1102_v61  ;;  %v1116_v6 = vadd.f32 %v1115_v2, %v1114_v62 }
 0x3e4   :  { %v1099_v7 = vrot.slane %v1098_v3, 1  ;;  %v1111_v8 = vrot.slane %v1110_v4, 1 }
 0x3e5   :  { %v1105_v9 = vrot.slane %v1104_v5, 1  ;;  %v1117_v10 = vrot.slane %v1116_v6, 1 }
 0x3e6   :  { %v1100_v11 = vadd.f32 %v1099_v7, %v1098_v3  ;;  %v1112_v12 = vadd.f32 %v1111_v8, %v1110_v4 }
 0x3e7   :  { %v1106_v13 = vadd.f32 %v1105_v9, %v1104_v5  ;;  %v1118_v14 = vadd.f32 %v1117_v10, %v1116_v6 }
 0x3e8   :  { %v4574_v16 = vmul.f32 0.125, %v1100_v11  ;;  %v4576_v18 = vmul.f32 0.125, %v1112_v12  ;;  %v1093_v12 = vld [vmem:[#allocation17] sm:$0xf] }
 0x3e9   :  { %v4578_v19 = vmul.f32 0.125, %v1106_v13  ;;  %v4580_v20 = vmul.f32 0.125, %v1118_v14  ;;  %v4594_v14 = vsub.s32 2, %v4539_v15 }
 0x3ea   :  { %v1123_v21 = vsub.f32 %v4558_v47, %v4574_v16  ;;  %v1125_v22 = vsub.f32 %v4560_v48, %v4576_v18 }
 0x3eb   :  { %v1124_v25 = vsub.f32 %v4564_v51, %v4578_v19  ;;  %v1126_v26 = vsub.f32 %v4566_v52, %v4580_v20 }
 0x3ec   :  { %v1127_v27 = vmul.f32 %v1123_v21, %v1123_v21  ;;  %v1129_v28 = vmul.f32 %v1125_v22, %v1125_v22  ;;  %v4597_v21 = vsub.s32 3, %v4539_v15 }
 0x3ed   :  { %v1128_v29 = vmul.f32 %v1124_v25, %v1124_v25  ;;  %v1130_v30 = vmul.f32 %v1126_v26, %v1126_v26 }
 0x3ee   :  { %v1131_v31 = vrot.slane %v1127_v27, 4  ;;  %v1143_v32 = vrot.slane %v1129_v28, 4 }
 0x3ef   :  { %v1137_v33 = vrot.slane %v1128_v29, 4  ;;  %v1149_v34 = vrot.slane %v1130_v30, 4 }
 0x3f0   :  { %v1132_v35 = vadd.f32 %v1131_v31, %v1127_v27  ;;  %v1144_v36 = vadd.f32 %v1143_v32, %v1129_v28 }
 0x3f1   :  { %v1138_v38 = vadd.f32 %v1137_v33, %v1128_v29  ;;  %v1150_v40 = vadd.f32 %v1149_v34, %v1130_v30 }
 0x3f2   :  { %v1133_v41 = vrot.slane %v1132_v35, 2  ;;  %v1145_v42 = vrot.slane %v1144_v36, 2 }
 0x3f3   :  { %v1139_v43 = vrot.slane %v1138_v38, 2  ;;  %v1151_v44 = vrot.slane %v1150_v40, 2 }
 0x3f4   :  { %v1134_v45 = vadd.f32 %v1133_v41, %v1132_v35  ;;  %v1146_v37 = vadd.f32 %v1145_v42, %v1144_v36 }
 0x3f5   :  { %v1140_v39 = vadd.f32 %v1139_v43, %v1138_v38  ;;  %v1152_v46 = vadd.f32 %v1151_v44, %v1150_v40 }
 0x3f6   :  { %v1135_v49 = vrot.slane %v1134_v45, 1  ;;  %v1147_v50 = vrot.slane %v1146_v37, 1 }
 0x3f7   :  { %v1141_v53 = vrot.slane %v1140_v39, 1  ;;  %v1153_v54 = vrot.slane %v1152_v46, 1 }
 0x3f8   :  { %v1136_v55 = vadd.f32 %v1135_v49, %v1134_v45  ;;  %v1148_v56 = vadd.f32 %v1147_v50, %v1146_v37 }
 0x3f9   :  { %v1142_v57 = vadd.f32 %v1141_v53, %v1140_v39  ;;  %v1154_v58 = vadd.f32 %v1153_v54, %v1152_v46 }
 0x3fa   :  { %v1155_v59 = vmul.f32 0.125, %v1136_v55  ;;  %v1157_v60 = vmul.f32 0.125, %v1148_v56 }
 0x3fb   :  { %v1156_v61 = vmul.f32 0.125, %v1142_v57  ;;  %v1158_v62 = vmul.f32 0.125, %v1154_v58 }
 0x3fc   :  { %v1159_v63 = vadd.f32 1e-05, %v1155_v59  ;;  %v1161_v0 = vadd.f32 1e-05, %v1157_v60 }
 0x3fd   :  { %v1160_v1 = vadd.f32 1e-05, %v1156_v61  ;;  %v1162_v2 = vadd.f32 1e-05, %v1158_v62 }
 0x3fe   :  { %3911 = vrsqrt.f32 %v1159_v63 }
 0x3ff   :  { %3913 = vrsqrt.f32 %v1161_v0 }
 0x400   :  { %3915 = vrsqrt.f32 %v1160_v1 }
 0x401   :  { %3917 = vrsqrt.f32 %v1162_v2 }
 0x408   :  { %v3912_v3 = vpop.eup %3911 }
 0x409   :  { %v3914_v4 = vpop.eup %3913 }
 0x40a   :  { %v3916_v5 = vpop.eup %3915 }
 0x40b   :  { %v3918_v6 = vpop.eup %3917  ;;  %v1171_v7 = vcombine.low %v3912_v3, %v3916_v5 }
 0x40c   :  { %v1172_v8 = vcombine.low %v3914_v4, %v3918_v6 }
 0x40d   :  { %v1179_v9 = vrot.slane %v1171_v7, %v4542_v17 }
 0x40e   :  { %v1186_v10 = vrot.slane %v1172_v8, %v4542_v17 }
 0x410   :  { %v1187_v11 = vcombine.low %v1179_v9, %v1186_v10 }
 0x412   :  { %v1194_v13 = vrot.slane %v1187_v11, %v4542_v17 }
 0x414   :  { %v1196_v22 = vmul.f32 %v1194_v13, %v1093_v12 }
 0x416   :  { %v1201_v25 = vrot.slane %v1196_v22, %v4547_v23  ;;  %v1205_v26 = vrot.slane %v1196_v22, %v4550_v24  ;;  %v1209_v27 = vrot.slane %v1196_v22, %v4594_v14  ;;  %v1213_v28 = vrot.slane %v1196_v22, %v4597_v21 }
 0x418   :  { %v1218_v29 = vmul.f32 %v1201_v25, %v4574_v16  ;;  %v1219_v30 = vmul.f32 %v1205_v26, %v4578_v19  ;;  %v1220_v31 = vmul.f32 %v1209_v27, %v4576_v18  ;;  %v1221_v32 = vmul.f32 %v1213_v28, %v4580_v20  ;;  %v1094_v19 = vld [vmem:[#allocation19] sm:$0xf] }
 0x419   :  { %v1252_v33 = vmul.f32 %v1201_v25, %v4558_v47  ;;  %v1253_v34 = vmul.f32 %v1205_v26, %v4564_v51  ;;  %v1254_v35 = vmul.f32 %v1209_v27, %v4560_v48  ;;  %v1255_v36 = vmul.f32 %v1213_v28, %v4566_v52 }
 0x41a   :  { %v1226_v38 = vcombine.low %v1218_v29, %v1219_v30  ;;  %v1227_v40 = vcombine.low %v1220_v31, %v1221_v32 }
 0x41c   :  { %v1234_v41 = vrot.slane %v1226_v38, %v4542_v17  ;;  %v1241_v16 = vrot.slane %v1227_v40, %v4542_v17 }
 0x41e   :  { %v1242_v42 = vcombine.low %v1234_v41, %v1241_v16 }
 0x420   :  { %v1249_v18 = vrot.slane %v1242_v42, %v4542_v17 }
 0x422   :  { %v1251_v43 = vsub.f32 %v1094_v19, %v1249_v18 }
 0x424   :  { %v1260_v20 = vrot.slane %v1251_v43, %v4547_v23  ;;  %v1264_v47 = vrot.slane %v1251_v43, %v4550_v24  ;;  %v1268_v51 = vrot.slane %v1251_v43, %v4594_v14  ;;  %v1272_v48 = vrot.slane %v1251_v43, %v4597_v21 }
 0x426   :  { %v1277_v52 = vadd.f32 %v1260_v20, %v1252_v33  ;;  %v1278_v44 = vadd.f32 %v1264_v47, %v1253_v34  ;;  %v1279_v45 = vadd.f32 %v1268_v51, %v1254_v35  ;;  %v1280_v37 = vadd.f32 %v1272_v48, %v1255_v36 }
 0x428   :  { %vm1281_vm4 = vcmp.ge.f32.partialorder %v1277_v52, 0.0  ;;  %vm1282_vm5 = vcmp.ge.f32.partialorder %v1278_v44, 0.0  ;;  %vm1283_vm6 = vcmp.ge.f32.partialorder %v1279_v45, 0.0  ;;  %vm1284_vm7 = vcmp.ge.f32.partialorder %v1280_v37, 0.0 }
 0x429   :  { %v1285_v39 = vmul.f32 0.2, %v1277_v52  ;;  %v1286_v46 = vmul.f32 0.2, %v1278_v44  ;;  %v1287_v49 = vmul.f32 0.2, %v1279_v45 }
 0x42a   :  { %v1288_v50 = vmul.f32 0.2, %v1280_v37 }
 0x42b   :  { %v4618_v53 = vsel %vm1281_vm4, %v1277_v52, %v1285_v39  ;;  %v1290_v54 = vsel %vm1282_vm5, %v1278_v44, %v1286_v46  ;;  %v4620_v55 = vsel %vm1283_vm6, %v1279_v45, %v1287_v49 }
 0x42c   :  { %v4622_v56 = vsel %vm1284_vm7, %v1280_v37, %v1288_v50 }
 0x42d   :  { %4251 = dma.done.wait [#allocation4], 32768 }
 0x42e   :  { %4252 = vsyncadd [#allocation4], 4294934528  ;;  %v4624_v57 = vpack.c.bf16 %v1290_v54, %v1290_v54  ;;  %v1302_v58 = vld [vmem:[#allocation2 + $0x8] sm:$0xff]  ;;  %v1304_v59 = vld [vmem:[#allocation2 + $0x18] sm:$0xff] }
 0x42f   :  { %v1301_v60 = vld [vmem:[#allocation2] sm:$0xff]  ;;  %1557 = vmatprep.subr.bf16.mxu0 %v1302_v58  ;;  %1639 = vmatprep.subr.bf16.mxu1 %v1304_v59  ;;  %v1303_v61 = vld [vmem:[#allocation2 + $0x10] sm:$0xff]  ;;  %v1310_v62 = vld [vmem:[#allocation2 + $0x48] sm:$0xff] }
 0x430   :  { %1589 = vmatprep.mubr.bf16.mxu0 %v4624_v57  ;;  %1671 = vmatprep.mubr.bf16.mxu1 %v4624_v57  ;;  %v1312_v63 = vld [vmem:[#allocation2 + $0x58] sm:$0xff]  ;;  %v1309_v0 = vld [vmem:[#allocation2 + $0x40] sm:$0xff]  ;;  %v1311_v1 = vld [vmem:[#allocation2 + $0x50] sm:$0xff] }
 0x431   :  { %1558 = vmatpush1.bf16.msra.mxu0 %v1301_v60  ;;  %1640 = vmatpush1.bf16.msra.mxu1 %v1303_v61  ;;  %v1318_v2 = vld [vmem:[#allocation2 + $0x88] sm:$0xff]  ;;  %v1320_v3 = vld [vmem:[#allocation2 + $0x98] sm:$0xff]  ;;  %v1317_v4 = vld [vmem:[#allocation2 + $0x80] sm:$0xff] }
 0x432   :  { %1559 = vmatprep.subr.bf16.mxu0 %v1310_v62  ;;  %1641 = vmatprep.subr.bf16.mxu1 %v1312_v63  ;;  %v1319_v5 = vld [vmem:[#allocation2 + $0x90] sm:$0xff]  ;;  %v1326_v6 = vld [vmem:[#allocation2 + $0xc8] sm:$0xff]  ;;  %v1328_v7 = vld [vmem:[#allocation2 + $0xd8] sm:$0xff] }
 0x433   :  { %v1325_v8 = vld [vmem:[#allocation2 + $0xc0] sm:$0xff]  ;;  %v1327_v9 = vld [vmem:[#allocation2 + $0xd0] sm:$0xff]  ;;  %v1334_v10 = vld [vmem:[#allocation2 + $0x108] sm:$0xff] }
 0x434   :  { %v1336_v11 = vld [vmem:[#allocation2 + $0x118] sm:$0xff]  ;;  %v1333_v12 = vld [vmem:[#allocation2 + $0x100] sm:$0xff]  ;;  %v1335_v13 = vld [vmem:[#allocation2 + $0x110] sm:$0xff] }
 0x435   :  { %1560 = vmatpush1.bf16.msra.mxu0 %v1309_v0  ;;  %1642 = vmatpush1.bf16.msra.mxu1 %v1311_v1  ;;  %v1342_v22 = vld [vmem:[#allocation2 + $0x148] sm:$0xff]  ;;  %v1344_v25 = vld [vmem:[#allocation2 + $0x158] sm:$0xff]  ;;  %v1341_v26 = vld [vmem:[#allocation2 + $0x140] sm:$0xff] }
 0x436   :  { %1561 = vmatprep.subr.bf16.mxu0 %v1318_v2  ;;  %1643 = vmatprep.subr.bf16.mxu1 %v1320_v3  ;;  %v1343_v27 = vld [vmem:[#allocation2 + $0x150] sm:$0xff]  ;;  %v1350_v28 = vld [vmem:[#allocation2 + $0x188] sm:$0xff]  ;;  %v1352_v29 = vld [vmem:[#allocation2 + $0x198] sm:$0xff] }
 0x437   :  { %v1349_v30 = vld [vmem:[#allocation2 + $0x180] sm:$0xff]  ;;  %v1351_v31 = vld [vmem:[#allocation2 + $0x190] sm:$0xff]  ;;  %v1358_v32 = vld [vmem:[#allocation2 + $0x1c8] sm:$0xff] }
 0x438   :  { %v1360_v33 = vld [vmem:[#allocation2 + $0x1d8] sm:$0xff]  ;;  %v1357_v34 = vld [vmem:[#allocation2 + $0x1c0] sm:$0xff]  ;;  %v1359_v35 = vld [vmem:[#allocation2 + $0x1d0] sm:$0xff] }
 0x439   :  { %1562 = vmatpush1.bf16.msra.mxu0 %v1317_v4  ;;  %1644 = vmatpush1.bf16.msra.mxu1 %v1319_v5  ;;  %v1366_v36 = vld [vmem:[#allocation2 + $0x208] sm:$0xff]  ;;  %v1368_v38 = vld [vmem:[#allocation2 + $0x218] sm:$0xff]  ;;  %v1365_v40 = vld [vmem:[#allocation2 + $0x200] sm:$0xff] }
 0x43a   :  { %1563 = vmatprep.subr.bf16.mxu0 %v1326_v6  ;;  %1645 = vmatprep.subr.bf16.mxu1 %v1328_v7  ;;  %v1367_v41 = vld [vmem:[#allocation2 + $0x210] sm:$0xff]  ;;  %v1374_v16 = vld [vmem:[#allocation2 + $0x248] sm:$0xff]  ;;  %v1376_v42 = vld [vmem:[#allocation2 + $0x258] sm:$0xff]  ;;  %v4630_v6 = vpack.c.bf16 %v4618_v53, %v4618_v53 }
 0x43b   :  { %v1373_v19 = vld [vmem:[#allocation2 + $0x240] sm:$0xff]  ;;  %v1375_v18 = vld [vmem:[#allocation2 + $0x250] sm:$0xff]  ;;  %v1382_v43 = vld [vmem:[#allocation2 + $0x288] sm:$0xff] }
 0x43c   :  { %v1384_v20 = vld [vmem:[#allocation2 + $0x298] sm:$0xff]  ;;  %v1381_v47 = vld [vmem:[#allocation2 + $0x280] sm:$0xff]  ;;  %v1383_v51 = vld [vmem:[#allocation2 + $0x290] sm:$0xff] }
 0x43d   :  { %1564 = vmatpush1.bf16.msra.mxu0 %v1325_v8  ;;  %1646 = vmatpush1.bf16.msra.mxu1 %v1327_v9  ;;  %v1390_v48 = vld [vmem:[#allocation2 + $0x2c8] sm:$0xff]  ;;  %v1392_v52 = vld [vmem:[#allocation2 + $0x2d8] sm:$0xff]  ;;  %v1389_v44 = vld [vmem:[#allocation2 + $0x2c0] sm:$0xff] }
 0x43e   :  { %1565 = vmatprep.subr.bf16.mxu0 %v1334_v10  ;;  %1647 = vmatprep.subr.bf16.mxu1 %v1336_v11  ;;  %v1391_v45 = vld [vmem:[#allocation2 + $0x2d0] sm:$0xff]  ;;  %v1398_v37 = vld [vmem:[#allocation2 + $0x308] sm:$0xff]  ;;  %v1400_v39 = vld [vmem:[#allocation2 + $0x318] sm:$0xff]  ;;  %v4634_v11 = vpack.c.bf16 %v4622_v56, %v4622_v56 }
 0x43f   :  { %v1397_v46 = vld [vmem:[#allocation2 + $0x300] sm:$0xff]  ;;  %v1399_v49 = vld [vmem:[#allocation2 + $0x310] sm:$0xff]  ;;  %v1406_v50 = vld [vmem:[#allocation2 + $0x348] sm:$0xff] }
 0x440   :  { %v1408_v54 = vld [vmem:[#allocation2 + $0x358] sm:$0xff]  ;;  %v1405_v58 = vld [vmem:[#allocation2 + $0x340] sm:$0xff]  ;;  %v1407_v59 = vld [vmem:[#allocation2 + $0x350] sm:$0xff] }
 0x441   :  { %1566 = vmatpush1.bf16.msra.mxu0 %v1333_v12  ;;  %1648 = vmatpush1.bf16.msra.mxu1 %v1335_v13  ;;  %v1414_v60 = vld [vmem:[#allocation2 + $0x388] sm:$0xff]  ;;  %v1416_v61 = vld [vmem:[#allocation2 + $0x398] sm:$0xff]  ;;  %v1413_v62 = vld [vmem:[#allocation2 + $0x380] sm:$0xff] }
 0x442   :  { %1567 = vmatprep.subr.bf16.mxu0 %v1342_v22  ;;  %1649 = vmatprep.subr.bf16.mxu1 %v1344_v25  ;;  %v1415_v63 = vld [vmem:[#allocation2 + $0x390] sm:$0xff]  ;;  %v1422_v0 = vld [vmem:[#allocation2 + $0x3c8] sm:$0xff]  ;;  %v1424_v1 = vld [vmem:[#allocation2 + $0x3d8] sm:$0xff] }
 0x443   :  { %v1421_v2 = vld [vmem:[#allocation2 + $0x3c0] sm:$0xff]  ;;  %v1423_v3 = vld [vmem:[#allocation2 + $0x3d0] sm:$0xff]  ;;  %v1430_v4 = vld [vmem:[#allocation2 + $0x408] sm:$0xff] }
 0x444   :  { %v1432_v5 = vld [vmem:[#allocation2 + $0x418] sm:$0xff]  ;;  %v1429_v7 = vld [vmem:[#allocation2 + $0x400] sm:$0xff]  ;;  %v1431_v8 = vld [vmem:[#allocation2 + $0x410] sm:$0xff] }
 0x445   :  { %1568 = vmatpush1.bf16.msra.mxu0 %v1341_v26  ;;  %1650 = vmatpush1.bf16.msra.mxu1 %v1343_v27  ;;  %v1438_v9 = vld [vmem:[#allocation2 + $0x448] sm:$0xff]  ;;  %v1440_v10 = vld [vmem:[#allocation2 + $0x458] sm:$0xff]  ;;  %v1437_v53 = vld [vmem:[#allocation2 + $0x440] sm:$0xff] }
 0x446   :  { %1569 = vmatprep.subr.bf16.mxu0 %v1350_v28  ;;  %1651 = vmatprep.subr.bf16.mxu1 %v1352_v29  ;;  %v1439_v12 = vld [vmem:[#allocation2 + $0x450] sm:$0xff]  ;;  %v1446_v13 = vld [vmem:[#allocation2 + $0x488] sm:$0xff]  ;;  %v1448_v22 = vld [vmem:[#allocation2 + $0x498] sm:$0xff] }
 0x447   :  { %v1445_v56 = vld [vmem:[#allocation2 + $0x480] sm:$0xff]  ;;  %v1447_v25 = vld [vmem:[#allocation2 + $0x490] sm:$0xff]  ;;  %v1454_v26 = vld [vmem:[#allocation2 + $0x4c8] sm:$0xff] }
 0x448   :  { %v1456_v27 = vld [vmem:[#allocation2 + $0x4d8] sm:$0xff]  ;;  %v1453_v28 = vld [vmem:[#allocation2 + $0x4c0] sm:$0xff]  ;;  %v1455_v29 = vld [vmem:[#allocation2 + $0x4d0] sm:$0xff] }
 0x449   :  { %1570 = vmatpush1.bf16.msra.mxu0 %v1349_v30  ;;  %1652 = vmatpush1.bf16.msra.mxu1 %v1351_v31  ;;  %v1462_v30 = vld [vmem:[#allocation2 + $0x508] sm:$0xff]  ;;  %v1464_v31 = vld [vmem:[#allocation2 + $0x518] sm:$0xff] }
 0x44a   :  { %1571 = vmatprep.subr.bf16.mxu0 %v1358_v32  ;;  %1653 = vmatprep.subr.bf16.mxu1 %v1360_v33  ;;  %v1461_v32 = vld [vmem:[#allocation2 + $0x500] sm:$0xff]  ;;  %v1463_v33 = vld [vmem:[#allocation2 + $0x510] sm:$0xff] }
 0x44d   :  { %1572 = vmatpush1.bf16.msra.mxu0 %v1357_v34  ;;  %1654 = vmatpush1.bf16.msra.mxu1 %v1359_v35  ;;  %v1470_v34 = vld [vmem:[#allocation2 + $0x548] sm:$0xff]  ;;  %v1472_v35 = vld [vmem:[#allocation2 + $0x558] sm:$0xff] }
 0x44e   :  { %1573 = vmatprep.subr.bf16.mxu0 %v1366_v36  ;;  %1655 = vmatprep.subr.bf16.mxu1 %v1368_v38  ;;  %v1469_v36 = vld [vmem:[#allocation2 + $0x540] sm:$0xff]  ;;  %v1471_v38 = vld [vmem:[#allocation2 + $0x550] sm:$0xff] }
 0x451   :  { %1574 = vmatpush1.bf16.msra.mxu0 %v1365_v40  ;;  %1656 = vmatpush1.bf16.msra.mxu1 %v1367_v41  ;;  %v1478_v40 = vld [vmem:[#allocation2 + $0x588] sm:$0xff]  ;;  %v1480_v41 = vld [vmem:[#allocation2 + $0x598] sm:$0xff] }
 0x452   :  { %1575 = vmatprep.subr.bf16.mxu0 %v1374_v16  ;;  %1657 = vmatprep.subr.bf16.mxu1 %v1376_v42  ;;  %v1477_v16 = vld [vmem:[#allocation2 + $0x580] sm:$0xff]  ;;  %v1479_v42 = vld [vmem:[#allocation2 + $0x590] sm:$0xff] }
 0x455   :  { %1576 = vmatpush1.bf16.msra.mxu0 %v1373_v19  ;;  %1658 = vmatpush1.bf16.msra.mxu1 %v1375_v18  ;;  %v1486_v19 = vld [vmem:[#allocation2 + $0x5c8] sm:$0xff]  ;;  %v1488_v18 = vld [vmem:[#allocation2 + $0x5d8] sm:$0xff] }
 0x456   :  { %1577 = vmatprep.subr.bf16.mxu0 %v1382_v43  ;;  %1659 = vmatprep.subr.bf16.mxu1 %v1384_v20  ;;  %v1485_v43 = vld [vmem:[#allocation2 + $0x5c0] sm:$0xff]  ;;  %v1487_v20 = vld [vmem:[#allocation2 + $0x5d0] sm:$0xff] }
 0x459   :  { %1578 = vmatpush1.bf16.msra.mxu0 %v1381_v47  ;;  %1660 = vmatpush1.bf16.msra.mxu1 %v1383_v51  ;;  %v1494_v47 = vld [vmem:[#allocation2 + $0x608] sm:$0xff]  ;;  %v1496_v51 = vld [vmem:[#allocation2 + $0x618] sm:$0xff] }
 0x45a   :  { %1579 = vmatprep.subr.bf16.mxu0 %v1390_v48  ;;  %1661 = vmatprep.subr.bf16.mxu1 %v1392_v52  ;;  %v1493_v48 = vld [vmem:[#allocation2 + $0x600] sm:$0xff]  ;;  %v1495_v52 = vld [vmem:[#allocation2 + $0x610] sm:$0xff] }
 0x45d   :  { %1580 = vmatpush1.bf16.msra.mxu0 %v1389_v44  ;;  %1662 = vmatpush1.bf16.msra.mxu1 %v1391_v45  ;;  %v1502_v44 = vld [vmem:[#allocation2 + $0x648] sm:$0xff]  ;;  %v1504_v45 = vld [vmem:[#allocation2 + $0x658] sm:$0xff] }
 0x45e   :  { %1581 = vmatprep.subr.bf16.mxu0 %v1398_v37  ;;  %1663 = vmatprep.subr.bf16.mxu1 %v1400_v39  ;;  %v1501_v37 = vld [vmem:[#allocation2 + $0x640] sm:$0xff]  ;;  %v1503_v39 = vld [vmem:[#allocation2 + $0x650] sm:$0xff] }
 0x461   :  { %1582 = vmatpush1.bf16.msra.mxu0 %v1397_v46  ;;  %1664 = vmatpush1.bf16.msra.mxu1 %v1399_v49  ;;  %v1510_v46 = vld [vmem:[#allocation2 + $0x688] sm:$0xff]  ;;  %v1512_v49 = vld [vmem:[#allocation2 + $0x698] sm:$0xff] }
 0x462   :  { %1583 = vmatprep.subr.bf16.mxu0 %v1406_v50  ;;  %1665 = vmatprep.subr.bf16.mxu1 %v1408_v54  ;;  %v1509_v50 = vld [vmem:[#allocation2 + $0x680] sm:$0xff]  ;;  %v1511_v54 = vld [vmem:[#allocation2 + $0x690] sm:$0xff] }
 0x465   :  { %1584 = vmatpush1.bf16.msra.mxu0 %v1405_v58  ;;  %1666 = vmatpush1.bf16.msra.mxu1 %v1407_v59  ;;  %v1518_v58 = vld [vmem:[#allocation2 + $0x6c8] sm:$0xff]  ;;  %v1520_v59 = vld [vmem:[#allocation2 + $0x6d8] sm:$0xff] }
 0x466   :  { %1585 = vmatprep.subr.bf16.mxu0 %v1414_v60  ;;  %1667 = vmatprep.subr.bf16.mxu1 %v1416_v61  ;;  %v1517_v60 = vld [vmem:[#allocation2 + $0x6c0] sm:$0xff]  ;;  %v1519_v61 = vld [vmem:[#allocation2 + $0x6d0] sm:$0xff] }
 0x469   :  { %1586 = vmatpush1.bf16.msra.mxu0 %v1413_v62  ;;  %1668 = vmatpush1.bf16.msra.mxu1 %v1415_v63  ;;  %v1526_v62 = vld [vmem:[#allocation2 + $0x708] sm:$0xff]  ;;  %v1528_v63 = vld [vmem:[#allocation2 + $0x718] sm:$0xff] }
 0x46a   :  { %1587 = vmatprep.subr.bf16.mxu0 %v1422_v0  ;;  %1669 = vmatprep.subr.bf16.mxu1 %v1424_v1  ;;  %v1525_v0 = vld [vmem:[#allocation2 + $0x700] sm:$0xff]  ;;  %v1527_v1 = vld [vmem:[#allocation2 + $0x710] sm:$0xff] }
 0x46d   :  { %1588 = vmatpush1.bf16.msra.mxu0 %v1421_v2  ;;  %1670 = vmatpush1.bf16.msra.mxu1 %v1423_v3  ;;  %v1534_v2 = vld [vmem:[#allocation2 + $0x748] sm:$0xff]  ;;  %v1536_v3 = vld [vmem:[#allocation2 + $0x758] sm:$0xff] }
 0x46e   :  { %1598 = vmatprep.subr.bf16.mxu0 %v1430_v4  ;;  %1680 = vmatprep.subr.bf16.mxu1 %v1432_v5  ;;  %v1533_v4 = vld [vmem:[#allocation2 + $0x740] sm:$0xff]  ;;  %v1535_v5 = vld [vmem:[#allocation2 + $0x750] sm:$0xff] }
 0x470   :  { %1590 = vmatmul.mubr.bf16.vlgmr.msra.gmra.mrb[8].mxu0 %v4630_v6  ;;  %1672 = vmatmul.mubr.bf16.vlgmr.msra.gmra.mrb[8].mxu1 %v4630_v6 }
 0x471   :  { %1599 = vmatpush1.bf16.msra.mxu0 %v1429_v7  ;;  %1681 = vmatpush1.bf16.msra.mxu1 %v1431_v8  ;;  %v1542_v7 = vld [vmem:[#allocation2 + $0x788] sm:$0xff]  ;;  %v1544_v8 = vld [vmem:[#allocation2 + $0x798] sm:$0xff] }
 0x472   :  { %1600 = vmatprep.subr.bf16.mxu0 %v1438_v9  ;;  %1682 = vmatprep.subr.bf16.mxu1 %v1440_v10  ;;  %v1541_v9 = vld [vmem:[#allocation2 + $0x780] sm:$0xff]  ;;  %v1543_v10 = vld [vmem:[#allocation2 + $0x790] sm:$0xff] }
 0x473   :  { %1630 = vmatprep.mubr.bf16.mxu0 %v4634_v11  ;;  %1712 = vmatprep.mubr.bf16.mxu1 %v4634_v11 }
 0x475   :  { %1601 = vmatpush1.bf16.msra.mxu0 %v1437_v53  ;;  %1683 = vmatpush1.bf16.msra.mxu1 %v1439_v12  ;;  %v1550_v53 = vld [vmem:[#allocation2 + $0x7c8] sm:$0xff]  ;;  %v1552_v12 = vld [vmem:[#allocation2 + $0x7d8] sm:$0xff] }
 0x476   :  { %1602 = vmatprep.subr.bf16.mxu0 %v1446_v13  ;;  %1684 = vmatprep.subr.bf16.mxu1 %v1448_v22  ;;  %v1549_v13 = vld [vmem:[#allocation2 + $0x7c0] sm:$0xff]  ;;  %v1551_v22 = vld [vmem:[#allocation2 + $0x7d0] sm:$0xff] }
 0x479   :  { %1603 = vmatpush1.bf16.msra.mxu0 %v1445_v56  ;;  %1685 = vmatpush1.bf16.msra.mxu1 %v1447_v25  ;;  %v1306_v56 = vld [vmem:[#allocation2 + $0x28] sm:$0xff]  ;;  %v1308_v25 = vld [vmem:[#allocation2 + $0x38] sm:$0xff] }
 0x47a   :  { %1604 = vmatprep.subr.bf16.mxu0 %v1454_v26  ;;  %1686 = vmatprep.subr.bf16.mxu1 %v1456_v27  ;;  %v4642_v26 = vpack.c.bf16 %v4620_v55, %v4620_v55  ;;  %v1305_v27 = vld [vmem:[#allocation2 + $0x20] sm:$0xff]  ;;  %v1322_v55 = vld [vmem:[#allocation2 + $0xa8] sm:$0xff] }
 0x47d   :  { %1605 = vmatpush1.bf16.msra.mxu0 %v1453_v28  ;;  %1687 = vmatpush1.bf16.msra.mxu1 %v1455_v29  ;;  %v1307_v28 = vld [vmem:[#allocation2 + $0x30] sm:$0xff]  ;;  %v1314_v29 = vld [vmem:[#allocation2 + $0x68] sm:$0xff] }
 0x47e   :  { %1606 = vmatprep.subr.bf16.mxu0 %v1462_v30  ;;  %1688 = vmatprep.subr.bf16.mxu1 %v1464_v31  ;;  %v1316_v30 = vld [vmem:[#allocation2 + $0x78] sm:$0xff]  ;;  %v1313_v31 = vld [vmem:[#allocation2 + $0x60] sm:$0xff] }
 0x481   :  { %1607 = vmatpush1.bf16.msra.mxu0 %v1461_v32  ;;  %1689 = vmatpush1.bf16.msra.mxu1 %v1463_v33  ;;  %v1315_v32 = vld [vmem:[#allocation2 + $0x70] sm:$0xff]  ;;  %v1324_v33 = vld [vmem:[#allocation2 + $0xb8] sm:$0xff] }
 0x482   :  { %1608 = vmatprep.subr.bf16.mxu0 %v1470_v34  ;;  %1690 = vmatprep.subr.bf16.mxu1 %v1472_v35  ;;  %v1321_v34 = vld [vmem:[#allocation2 + $0xa0] sm:$0xff]  ;;  %v1323_v35 = vld [vmem:[#allocation2 + $0xb0] sm:$0xff] }
 0x485   :  { %1609 = vmatpush1.bf16.msra.mxu0 %v1469_v36  ;;  %1691 = vmatpush1.bf16.msra.mxu1 %v1471_v38  ;;  %v1330_v36 = vld [vmem:[#allocation2 + $0xe8] sm:$0xff]  ;;  %v1332_v38 = vld [vmem:[#allocation2 + $0xf8] sm:$0xff] }
 0x486   :  { %1610 = vmatprep.subr.bf16.mxu0 %v1478_v40  ;;  %1692 = vmatprep.subr.bf16.mxu1 %v1480_v41  ;;  %v1329_v40 = vld [vmem:[#allocation2 + $0xe0] sm:$0xff]  ;;  %v1331_v41 = vld [vmem:[#allocation2 + $0xf0] sm:$0xff] }
 0x489   :  { %1611 = vmatpush1.bf16.msra.mxu0 %v1477_v16  ;;  %1693 = vmatpush1.bf16.msra.mxu1 %v1479_v42  ;;  %v1338_v16 = vld [vmem:[#allocation2 + $0x128] sm:$0xff]  ;;  %v1340_v42 = vld [vmem:[#allocation2 + $0x138] sm:$0xff] }
 0x48a   :  { %1612 = vmatprep.subr.bf16.mxu0 %v1486_v19  ;;  %1694 = vmatprep.subr.bf16.mxu1 %v1488_v18  ;;  %v1339_v19 = vld [vmem:[#allocation2 + $0x130] sm:$0xff]  ;;  %v1346_v18 = vld [vmem:[#allocation2 + $0x168] sm:$0xff] }
 0x48d   :  { %1613 = vmatpush1.bf16.msra.mxu0 %v1485_v43  ;;  %1695 = vmatpush1.bf16.msra.mxu1 %v1487_v20  ;;  %v1348_v43 = vld [vmem:[#allocation2 + $0x178] sm:$0xff]  ;;  %v1345_v20 = vld [vmem:[#allocation2 + $0x160] sm:$0xff] }
 0x48e   :  { %1614 = vmatprep.subr.bf16.mxu0 %v1494_v47  ;;  %1696 = vmatprep.subr.bf16.mxu1 %v1496_v51  ;;  %v1347_v47 = vld [vmem:[#allocation2 + $0x170] sm:$0xff]  ;;  %v1354_v51 = vld [vmem:[#allocation2 + $0x1a8] sm:$0xff] }
 0x491   :  { %1615 = vmatpush1.bf16.msra.mxu0 %v1493_v48  ;;  %1697 = vmatpush1.bf16.msra.mxu1 %v1495_v52  ;;  %v1356_v48 = vld [vmem:[#allocation2 + $0x1b8] sm:$0xff]  ;;  %v1353_v52 = vld [vmem:[#allocation2 + $0x1a0] sm:$0xff] }
 0x492   :  { %1616 = vmatprep.subr.bf16.mxu0 %v1502_v44  ;;  %1698 = vmatprep.subr.bf16.mxu1 %v1504_v45  ;;  %v1355_v44 = vld [vmem:[#allocation2 + $0x1b0] sm:$0xff]  ;;  %v1362_v45 = vld [vmem:[#allocation2 + $0x1e8] sm:$0xff] }
 0x495   :  { %1617 = vmatpush1.bf16.msra.mxu0 %v1501_v37  ;;  %1699 = vmatpush1.bf16.msra.mxu1 %v1503_v39  ;;  %v1364_v37 = vld [vmem:[#allocation2 + $0x1f8] sm:$0xff]  ;;  %v1361_v39 = vld [vmem:[#allocation2 + $0x1e0] sm:$0xff] }
 0x496   :  { %1618 = vmatprep.subr.bf16.mxu0 %v1510_v46  ;;  %1700 = vmatprep.subr.bf16.mxu1 %v1512_v49  ;;  %v1363_v46 = vld [vmem:[#allocation2 + $0x1f0] sm:$0xff]  ;;  %v1370_v49 = vld [vmem:[#allocation2 + $0x228] sm:$0xff] }
 0x499   :  { %1619 = vmatpush1.bf16.msra.mxu0 %v1509_v50  ;;  %1701 = vmatpush1.bf16.msra.mxu1 %v1511_v54  ;;  %v1372_v50 = vld [vmem:[#allocation2 + $0x238] sm:$0xff]  ;;  %v1369_v54 = vld [vmem:[#allocation2 + $0x220] sm:$0xff] }
 0x49a   :  { %1620 = vmatprep.subr.bf16.mxu0 %v1518_v58  ;;  %1702 = vmatprep.subr.bf16.mxu1 %v1520_v59  ;;  %v1371_v58 = vld [vmem:[#allocation2 + $0x230] sm:$0xff]  ;;  %v1378_v59 = vld [vmem:[#allocation2 + $0x268] sm:$0xff] }
 0x49d   :  { %1621 = vmatpush1.bf16.msra.mxu0 %v1517_v60  ;;  %1703 = vmatpush1.bf16.msra.mxu1 %v1519_v61  ;;  %v1380_v60 = vld [vmem:[#allocation2 + $0x278] sm:$0xff]  ;;  %v1377_v61 = vld [vmem:[#allocation2 + $0x260] sm:$0xff] }
 0x49e   :  { %1622 = vmatprep.subr.bf16.mxu0 %v1526_v62  ;;  %1704 = vmatprep.subr.bf16.mxu1 %v1528_v63  ;;  %v1379_v62 = vld [vmem:[#allocation2 + $0x270] sm:$0xff]  ;;  %v1386_v63 = vld [vmem:[#allocation2 + $0x2a8] sm:$0xff] }
 0x4a1   :  { %1623 = vmatpush1.bf16.msra.mxu0 %v1525_v0  ;;  %1705 = vmatpush1.bf16.msra.mxu1 %v1527_v1  ;;  %v1388_v0 = vld [vmem:[#allocation2 + $0x2b8] sm:$0xff]  ;;  %v1385_v1 = vld [vmem:[#allocation2 + $0x2a0] sm:$0xff] }
 0x4a2   :  { %1624 = vmatprep.subr.bf16.mxu0 %v1534_v2  ;;  %1706 = vmatprep.subr.bf16.mxu1 %v1536_v3  ;;  %v1387_v2 = vld [vmem:[#allocation2 + $0x2b0] sm:$0xff]  ;;  %v1394_v3 = vld [vmem:[#allocation2 + $0x2e8] sm:$0xff] }
 0x4a5   :  { %1625 = vmatpush1.bf16.msra.mxu0 %v1533_v4  ;;  %1707 = vmatpush1.bf16.msra.mxu1 %v1535_v5  ;;  %v1396_v4 = vld [vmem:[#allocation2 + $0x2f8] sm:$0xff]  ;;  %v1393_v5 = vld [vmem:[#allocation2 + $0x2e0] sm:$0xff] }
 0x4a6   :  { %1626 = vmatprep.subr.bf16.mxu0 %v1542_v7  ;;  %1708 = vmatprep.subr.bf16.mxu1 %v1544_v8  ;;  %v1395_v7 = vld [vmem:[#allocation2 + $0x2f0] sm:$0xff]  ;;  %v1402_v8 = vld [vmem:[#allocation2 + $0x328] sm:$0xff] }
 0x4a9   :  { %1627 = vmatpush1.bf16.msra.mxu0 %v1541_v9  ;;  %1709 = vmatpush1.bf16.msra.mxu1 %v1543_v10  ;;  %v1404_v9 = vld [vmem:[#allocation2 + $0x338] sm:$0xff]  ;;  %v1401_v10 = vld [vmem:[#allocation2 + $0x320] sm:$0xff] }
 0x4aa   :  { %1628 = vmatprep.subr.bf16.mxu0 %v1550_v53  ;;  %1710 = vmatprep.subr.bf16.mxu1 %v1552_v12  ;;  %v1403_v53 = vld [vmem:[#allocation2 + $0x330] sm:$0xff]  ;;  %v1410_v12 = vld [vmem:[#allocation2 + $0x368] sm:$0xff] }
 0x4ad   :  { %1629 = vmatpush1.bf16.msra.mxu0 %v1549_v13  ;;  %1711 = vmatpush1.bf16.msra.mxu1 %v1551_v22  ;;  %v1412_v13 = vld [vmem:[#allocation2 + $0x378] sm:$0xff]  ;;  %v1409_v22 = vld [vmem:[#allocation2 + $0x360] sm:$0xff] }
 0x4ae   :  { %1721 = vmatprep.subr.bf16.mxu0 %v1306_v56  ;;  %1803 = vmatprep.subr.bf16.mxu1 %v1308_v25  ;;  %v1411_v56 = vld [vmem:[#allocation2 + $0x370] sm:$0xff]  ;;  %v1418_v25 = vld [vmem:[#allocation2 + $0x3a8] sm:$0xff] }
 0x4b0   :  { %1631 = vmatmul.mubr.bf16.vlgmr.msra.gmra.mrb[8].mxu0 %v4642_v26  ;;  %1713 = vmatmul.mubr.bf16.vlgmr.msra.gmra.mrb[8].mxu1 %v4642_v26 }
 0x4b1   :  { %1722 = vmatpush1.bf16.msra.mxu0 %v1305_v27  ;;  %1804 = vmatpush1.bf16.msra.mxu1 %v1307_v28  ;;  %v1420_v27 = vld [vmem:[#allocation2 + $0x3b8] sm:$0xff]  ;;  %v1417_v28 = vld [vmem:[#allocation2 + $0x3a0] sm:$0xff] }
 0x4b2   :  { %1723 = vmatprep.subr.bf16.mxu0 %v1314_v29  ;;  %1805 = vmatprep.subr.bf16.mxu1 %v1316_v30  ;;  %v1419_v29 = vld [vmem:[#allocation2 + $0x3b0] sm:$0xff]  ;;  %v1426_v30 = vld [vmem:[#allocation2 + $0x3e8] sm:$0xff] }
 0x4b3   :  { %1753 = vmatprep.mubr.bf16.mxu0 %v4624_v57  ;;  %1835 = vmatprep.mubr.bf16.mxu1 %v4624_v57  ;;  %v1337_v57 = vld [vmem:[#allocation2 + $0x120] sm:$0xff] }
 0x4b5   :  { %1724 = vmatpush1.bf16.msra.mxu0 %v1313_v31  ;;  %1806 = vmatpush1.bf16.msra.mxu1 %v1315_v32  ;;  %v1428_v31 = vld [vmem:[#allocation2 + $0x3f8] sm:$0xff]  ;;  %v1425_v32 = vld [vmem:[#allocation2 + $0x3e0] sm:$0xff] }
 0x4b6   :  { %1725 = vmatprep.subr.bf16.mxu0 %v1322_v55  ;;  %1807 = vmatprep.subr.bf16.mxu1 %v1324_v33  ;;  %v1427_v55 = vld [vmem:[#allocation2 + $0x3f0] sm:$0xff]  ;;  %v1434_v33 = vld [vmem:[#allocation2 + $0x428] sm:$0xff] }
 0x4b9   :  { %1726 = vmatpush1.bf16.msra.mxu0 %v1321_v34  ;;  %1808 = vmatpush1.bf16.msra.mxu1 %v1323_v35  ;;  %v1436_v34 = vld [vmem:[#allocation2 + $0x438] sm:$0xff]  ;;  %v1433_v35 = vld [vmem:[#allocation2 + $0x420] sm:$0xff] }
 0x4ba   :  { %1727 = vmatprep.subr.bf16.mxu0 %v1330_v36  ;;  %1809 = vmatprep.subr.bf16.mxu1 %v1332_v38  ;;  %v1435_v36 = vld [vmem:[#allocation2 + $0x430] sm:$0xff]  ;;  %v1442_v38 = vld [vmem:[#allocation2 + $0x468] sm:$0xff] }
 0x4bd   :  { %1728 = vmatpush1.bf16.msra.mxu0 %v1329_v40  ;;  %1810 = vmatpush1.bf16.msra.mxu1 %v1331_v41  ;;  %v1444_v40 = vld [vmem:[#allocation2 + $0x478] sm:$0xff]  ;;  %v1441_v41 = vld [vmem:[#allocation2 + $0x460] sm:$0xff] }
 0x4be   :  { %1729 = vmatprep.subr.bf16.mxu0 %v1338_v16  ;;  %1811 = vmatprep.subr.bf16.mxu1 %v1340_v42  ;;  %v1443_v16 = vld [vmem:[#allocation2 + $0x470] sm:$0xff]  ;;  %v1450_v42 = vld [vmem:[#allocation2 + $0x4a8] sm:$0xff] }
 0x4c1   :  { %1730 = vmatpush1.bf16.msra.mxu0 %v1337_v57  ;;  %1812 = vmatpush1.bf16.msra.mxu1 %v1339_v19  ;;  %v1452_v57 = vld [vmem:[#allocation2 + $0x4b8] sm:$0xff]  ;;  %v1449_v19 = vld [vmem:[#allocation2 + $0x4a0] sm:$0xff] }
 0x4c2   :  { %1731 = vmatprep.subr.bf16.mxu0 %v1346_v18  ;;  %1813 = vmatprep.subr.bf16.mxu1 %v1348_v43  ;;  %v1451_v18 = vld [vmem:[#allocation2 + $0x4b0] sm:$0xff]  ;;  %v1458_v43 = vld [vmem:[#allocation2 + $0x4e8] sm:$0xff] }
 0x4c5   :  { %1732 = vmatpush1.bf16.msra.mxu0 %v1345_v20  ;;  %1814 = vmatpush1.bf16.msra.mxu1 %v1347_v47  ;;  %v1457_v20 = vld [vmem:[#allocation2 + $0x4e0] sm:$0xff]  ;;  %v1459_v47 = vld [vmem:[#allocation2 + $0x4f0] sm:$0xff] }
 0x4c6   :  { %1733 = vmatprep.subr.bf16.mxu0 %v1354_v51  ;;  %1815 = vmatprep.subr.bf16.mxu1 %v1356_v48  ;;  %v1466_v51 = vld [vmem:[#allocation2 + $0x528] sm:$0xff]  ;;  %v1468_v48 = vld [vmem:[#allocation2 + $0x538] sm:$0xff] }
 0x4c9   :  { %1734 = vmatpush1.bf16.msra.mxu0 %v1353_v52  ;;  %1816 = vmatpush1.bf16.msra.mxu1 %v1355_v44  ;;  %v1467_v52 = vld [vmem:[#allocation2 + $0x530] sm:$0xff]  ;;  %v1474_v44 = vld [vmem:[#allocation2 + $0x568] sm:$0xff] }
 0x4ca   :  { %1735 = vmatprep.subr.bf16.mxu0 %v1362_v45  ;;  %1817 = vmatprep.subr.bf16.mxu1 %v1364_v37  ;;  %v1476_v45 = vld [vmem:[#allocation2 + $0x578] sm:$0xff]  ;;  %v1473_v37 = vld [vmem:[#allocation2 + $0x560] sm:$0xff] }
 0x4cd   :  { %1736 = vmatpush1.bf16.msra.mxu0 %v1361_v39  ;;  %1818 = vmatpush1.bf16.msra.mxu1 %v1363_v46  ;;  %v1475_v39 = vld [vmem:[#allocation2 + $0x570] sm:$0xff]  ;;  %v1482_v46 = vld [vmem:[#allocation2 + $0x5a8] sm:$0xff] }
 0x4ce   :  { %1737 = vmatprep.subr.bf16.mxu0 %v1370_v49  ;;  %1819 = vmatprep.subr.bf16.mxu1 %v1372_v50  ;;  %v1484_v49 = vld [vmem:[#allocation2 + $0x5b8] sm:$0xff]  ;;  %v1481_v50 = vld [vmem:[#allocation2 + $0x5a0] sm:$0xff] }
 0x4d1   :  { %1738 = vmatpush1.bf16.msra.mxu0 %v1369_v54  ;;  %1820 = vmatpush1.bf16.msra.mxu1 %v1371_v58  ;;  %v1483_v54 = vld [vmem:[#allocation2 + $0x5b0] sm:$0xff]  ;;  %v1490_v58 = vld [vmem:[#allocation2 + $0x5e8] sm:$0xff] }
 0x4d2   :  { %1739 = vmatprep.subr.bf16.mxu0 %v1378_v59  ;;  %1821 = vmatprep.subr.bf16.mxu1 %v1380_v60  ;;  %v1492_v59 = vld [vmem:[#allocation2 + $0x5f8] sm:$0xff]  ;;  %v1489_v60 = vld [vmem:[#allocation2 + $0x5e0] sm:$0xff] }
 0x4d5   :  { %1740 = vmatpush1.bf16.msra.mxu0 %v1377_v61  ;;  %1822 = vmatpush1.bf16.msra.mxu1 %v1379_v62  ;;  %v1491_v61 = vld [vmem:[#allocation2 + $0x5f0] sm:$0xff]  ;;  %v1498_v62 = vld [vmem:[#allocation2 + $0x628] sm:$0xff] }
 0x4d6   :  { %1741 = vmatprep.subr.bf16.mxu0 %v1386_v63  ;;  %1823 = vmatprep.subr.bf16.mxu1 %v1388_v0  ;;  %v1500_v63 = vld [vmem:[#allocation2 + $0x638] sm:$0xff]  ;;  %v1497_v0 = vld [vmem:[#allocation2 + $0x620] sm:$0xff] }
 0x4d9   :  { %1742 = vmatpush1.bf16.msra.mxu0 %v1385_v1  ;;  %1824 = vmatpush1.bf16.msra.mxu1 %v1387_v2  ;;  %v1499_v1 = vld [vmem:[#allocation2 + $0x630] sm:$0xff]  ;;  %v1506_v2 = vld [vmem:[#allocation2 + $0x668] sm:$0xff] }
 0x4da   :  { %1743 = vmatprep.subr.bf16.mxu0 %v1394_v3  ;;  %1825 = vmatprep.subr.bf16.mxu1 %v1396_v4  ;;  %v1508_v3 = vld [vmem:[#allocation2 + $0x678] sm:$0xff]  ;;  %v1505_v4 = vld [vmem:[#allocation2 + $0x660] sm:$0xff] }
 0x4dd   :  { %1744 = vmatpush1.bf16.msra.mxu0 %v1393_v5  ;;  %1826 = vmatpush1.bf16.msra.mxu1 %v1395_v7  ;;  %v1507_v5 = vld [vmem:[#allocation2 + $0x670] sm:$0xff]  ;;  %v1514_v7 = vld [vmem:[#allocation2 + $0x6a8] sm:$0xff] }
 0x4de   :  { %1745 = vmatprep.subr.bf16.mxu0 %v1402_v8  ;;  %1827 = vmatprep.subr.bf16.mxu1 %v1404_v9  ;;  %v1516_v8 = vld [vmem:[#allocation2 + $0x6b8] sm:$0xff]  ;;  %v1513_v9 = vld [vmem:[#allocation2 + $0x6a0] sm:$0xff] }
 0x4e1   :  { %1746 = vmatpush1.bf16.msra.mxu0 %v1401_v10  ;;  %1828 = vmatpush1.bf16.msra.mxu1 %v1403_v53  ;;  %v1515_v10 = vld [vmem:[#allocation2 + $0x6b0] sm:$0xff]  ;;  %v1522_v53 = vld [vmem:[#allocation2 + $0x6e8] sm:$0xff] }
 0x4e2   :  { %1747 = vmatprep.subr.bf16.mxu0 %v1410_v12  ;;  %1829 = vmatprep.subr.bf16.mxu1 %v1412_v13  ;;  %v1524_v12 = vld [vmem:[#allocation2 + $0x6f8] sm:$0xff]  ;;  %v1521_v13 = vld [vmem:[#allocation2 + $0x6e0] sm:$0xff] }
 0x4e5   :  { %1748 = vmatpush1.bf16.msra.mxu0 %v1409_v22  ;;  %1830 = vmatpush1.bf16.msra.mxu1 %v1411_v56  ;;  %v1523_v22 = vld [vmem:[#allocation2 + $0x6f0] sm:$0xff]  ;;  %v1530_v56 = vld [vmem:[#allocation2 + $0x728] sm:$0xff] }
 0x4e6   :  { %1749 = vmatprep.subr.bf16.mxu0 %v1418_v25  ;;  %1831 = vmatprep.subr.bf16.mxu1 %v1420_v27  ;;  %v1532_v25 = vld [vmem:[#allocation2 + $0x738] sm:$0xff]  ;;  %v1529_v27 = vld [vmem:[#allocation2 + $0x720] sm:$0xff] }
 0x4e9   :  { %1750 = vmatpush1.bf16.msra.mxu0 %v1417_v28  ;;  %1832 = vmatpush1.bf16.msra.mxu1 %v1419_v29  ;;  %v1531_v28 = vld [vmem:[#allocation2 + $0x730] sm:$0xff]  ;;  %v1538_v29 = vld [vmem:[#allocation2 + $0x768] sm:$0xff] }
 0x4ea   :  { %1751 = vmatprep.subr.bf16.mxu0 %v1426_v30  ;;  %1833 = vmatprep.subr.bf16.mxu1 %v1428_v31  ;;  %v1540_v30 = vld [vmem:[#allocation2 + $0x778] sm:$0xff]  ;;  %v1537_v31 = vld [vmem:[#allocation2 + $0x760] sm:$0xff] }
 0x4ed   :  { %1752 = vmatpush1.bf16.msra.mxu0 %v1425_v32  ;;  %1834 = vmatpush1.bf16.msra.mxu1 %v1427_v55  ;;  %v1539_v32 = vld [vmem:[#allocation2 + $0x770] sm:$0xff]  ;;  %v1546_v55 = vld [vmem:[#allocation2 + $0x7a8] sm:$0xff] }
 0x4ee   :  { %1762 = vmatprep.subr.bf16.mxu0 %v1434_v33  ;;  %1844 = vmatprep.subr.bf16.mxu1 %v1436_v34  ;;  %v1548_v33 = vld [vmem:[#allocation2 + $0x7b8] sm:$0xff]  ;;  %v1545_v34 = vld [vmem:[#allocation2 + $0x7a0] sm:$0xff] }
 0x4f0   :  { %1754 = vmatmul.mubr.bf16.vlgmr.msra.gmra.mrb[12].mxu0 %v4630_v6  ;;  %1836 = vmatmul.mubr.bf16.vlgmr.msra.gmra.mrb[12].mxu1 %v4630_v6  ;;  %v1460_v6 = vld [vmem:[#allocation2 + $0x4f8] sm:$0xff] }
 0x4f1   :  { %1763 = vmatpush1.bf16.msra.mxu0 %v1433_v35  ;;  %1845 = vmatpush1.bf16.msra.mxu1 %v1435_v36  ;;  %v1547_v35 = vld [vmem:[#allocation2 + $0x7b0] sm:$0xff]  ;;  %v1554_v36 = vld [vmem:[#allocation2 + $0x7e8] sm:$0xff] }
 0x4f2   :  { %1764 = vmatprep.subr.bf16.mxu0 %v1442_v38  ;;  %1846 = vmatprep.subr.bf16.mxu1 %v1444_v40  ;;  %v1556_v38 = vld [vmem:[#allocation2 + $0x7f8] sm:$0xff]  ;;  %v1553_v40 = vld [vmem:[#allocation2 + $0x7e0] sm:$0xff] }
 0x4f3   :  { %1794 = vmatprep.mubr.bf16.mxu0 %v4634_v11  ;;  %1876 = vmatprep.mubr.bf16.mxu1 %v4634_v11  ;;  %v1465_v11 = vld [vmem:[#allocation2 + $0x520] sm:$0xff] }
 0x4f5   :  { %1765 = vmatpush1.bf16.msra.mxu0 %v1441_v41  ;;  %1847 = vmatpush1.bf16.msra.mxu1 %v1443_v16  ;;  %v1555_v41 = vld [vmem:[#allocation2 + $0x7f0] sm:$0xff] }
 0x4f6   :  { %1766 = vmatprep.subr.bf16.mxu0 %v1450_v42  ;;  %1848 = vmatprep.subr.bf16.mxu1 %v1452_v57 }
 0x4f9   :  { %1767 = vmatpush1.bf16.msra.mxu0 %v1449_v19  ;;  %1849 = vmatpush1.bf16.msra.mxu1 %v1451_v18 }
 0x4fa   :  { %1768 = vmatprep.subr.bf16.mxu0 %v1458_v43  ;;  %1850 = vmatprep.subr.bf16.mxu1 %v1460_v6 }
 0x4fd   :  { %1769 = vmatpush1.bf16.msra.mxu0 %v1457_v20  ;;  %1851 = vmatpush1.bf16.msra.mxu1 %v1459_v47 }
 0x4fe   :  { %1770 = vmatprep.subr.bf16.mxu0 %v1466_v51  ;;  %1852 = vmatprep.subr.bf16.mxu1 %v1468_v48 }
 0x501   :  { %1771 = vmatpush1.bf16.msra.mxu0 %v1465_v11  ;;  %1853 = vmatpush1.bf16.msra.mxu1 %v1467_v52 }
 0x502   :  { %1772 = vmatprep.subr.bf16.mxu0 %v1474_v44  ;;  %1854 = vmatprep.subr.bf16.mxu1 %v1476_v45 }
 0x505   :  { %1773 = vmatpush1.bf16.msra.mxu0 %v1473_v37  ;;  %1855 = vmatpush1.bf16.msra.mxu1 %v1475_v39 }
 0x506   :  { %1774 = vmatprep.subr.bf16.mxu0 %v1482_v46  ;;  %1856 = vmatprep.subr.bf16.mxu1 %v1484_v49 }
 0x509   :  { %1775 = vmatpush1.bf16.msra.mxu0 %v1481_v50  ;;  %1857 = vmatpush1.bf16.msra.mxu1 %v1483_v54 }
 0x50a   :  { %1776 = vmatprep.subr.bf16.mxu0 %v1490_v58  ;;  %1858 = vmatprep.subr.bf16.mxu1 %v1492_v59 }
 0x50d   :  { %1777 = vmatpush1.bf16.msra.mxu0 %v1489_v60  ;;  %1859 = vmatpush1.bf16.msra.mxu1 %v1491_v61 }
 0x50e   :  { %1778 = vmatprep.subr.bf16.mxu0 %v1498_v62  ;;  %1860 = vmatprep.subr.bf16.mxu1 %v1500_v63 }
 0x511   :  { %1779 = vmatpush1.bf16.msra.mxu0 %v1497_v0  ;;  %1861 = vmatpush1.bf16.msra.mxu1 %v1499_v1 }
 0x512   :  { %1780 = vmatprep.subr.bf16.mxu0 %v1506_v2  ;;  %1862 = vmatprep.subr.bf16.mxu1 %v1508_v3 }
 0x515   :  { %1781 = vmatpush1.bf16.msra.mxu0 %v1505_v4  ;;  %1863 = vmatpush1.bf16.msra.mxu1 %v1507_v5 }
 0x516   :  { %1782 = vmatprep.subr.bf16.mxu0 %v1514_v7  ;;  %1864 = vmatprep.subr.bf16.mxu1 %v1516_v8 }
 0x519   :  { %1783 = vmatpush1.bf16.msra.mxu0 %v1513_v9  ;;  %1865 = vmatpush1.bf16.msra.mxu1 %v1515_v10 }
 0x51a   :  { %1784 = vmatprep.subr.bf16.mxu0 %v1522_v53  ;;  %1866 = vmatprep.subr.bf16.mxu1 %v1524_v12 }
 0x51d   :  { %1785 = vmatpush1.bf16.msra.mxu0 %v1521_v13  ;;  %1867 = vmatpush1.bf16.msra.mxu1 %v1523_v22 }
 0x51e   :  { %1786 = vmatprep.subr.bf16.mxu0 %v1530_v56  ;;  %1868 = vmatprep.subr.bf16.mxu1 %v1532_v25 }
 0x521   :  { %1787 = vmatpush1.bf16.msra.mxu0 %v1529_v27  ;;  %1869 = vmatpush1.bf16.msra.mxu1 %v1531_v28 }
 0x522   :  { %1788 = vmatprep.subr.bf16.mxu0 %v1538_v29  ;;  %1870 = vmatprep.subr.bf16.mxu1 %v1540_v30 }
 0x525   :  { %1789 = vmatpush1.bf16.msra.mxu0 %v1537_v31  ;;  %1871 = vmatpush1.bf16.msra.mxu1 %v1539_v32 }
 0x526   :  { %1790 = vmatprep.subr.bf16.mxu0 %v1546_v55  ;;  %1872 = vmatprep.subr.bf16.mxu1 %v1548_v33 }
 0x529   :  { %1791 = vmatpush1.bf16.msra.mxu0 %v1545_v34  ;;  %1873 = vmatpush1.bf16.msra.mxu1 %v1547_v35 }
 0x52a   :  { %1792 = vmatprep.subr.bf16.mxu0 %v1554_v36  ;;  %1874 = vmatprep.subr.bf16.mxu1 %v1556_v38 }
 0x52d   :  { %1793 = vmatpush1.bf16.msra.mxu0 %v1553_v40  ;;  %1875 = vmatpush1.bf16.msra.mxu1 %v1555_v41 }
 0x530   :  { %1795 = vmatmul.mubr.bf16.vlgmr.msra.gmra.mrb[12].mxu0 %v4642_v26  ;;  %1877 = vmatmul.mubr.bf16.vlgmr.msra.gmra.mrb[12].mxu1 %v4642_v26 }
 0x583   :  { %v4654_v16 = vpop.f32.mrb[8].mxu0  ;;  %v4656_v42 = vpop.f32.mrb[8].mxu1 }
 0x584   :  { %v1887_v57 = vrot.slane %v4654_v16, 4  ;;  %v1899_v19 = vrot.slane %v4656_v42, 4  ;;  %v4660_v18 = vpop.f32.mrb[9].mxu0  ;;  %v4662_v43 = vpop.f32.mrb[9].mxu1 }
 0x585   :  { %v1893_v6 = vrot.slane %v4660_v18, 4  ;;  %v1905_v20 = vrot.slane %v4662_v43, 4  ;;  %v1636_v47 = vpop.f32.mrb[10].mxu0  ;;  %v1718_v51 = vpop.f32.mrb[10].mxu1 }
 0x586   :  { %v1888_v26 = vadd.f32 %v1887_v57, %v4654_v16  ;;  %v1900_v48 = vadd.f32 %v1899_v19, %v4656_v42  ;;  %v1637_v11 = vpop.f32.mrb[11].mxu0  ;;  %v1719_v52 = vpop.f32.mrb[11].mxu1 }
 0x587   :  { %v1894_v44 = vadd.f32 %v1893_v6, %v4660_v18  ;;  %v1906_v45 = vadd.f32 %v1905_v20, %v4662_v43 }
 0x588   :  { %v1889_v37 = vrot.slane %v1888_v26, 2  ;;  %v1901_v39 = vrot.slane %v1900_v48, 2 }
 0x589   :  { %v1895_v46 = vrot.slane %v1894_v44, 2  ;;  %v1907_v49 = vrot.slane %v1906_v45, 2 }
 0x58a   :  { %v1890_v50 = vadd.f32 %v1889_v37, %v1888_v26  ;;  %v1902_v54 = vadd.f32 %v1901_v39, %v1900_v48 }
 0x58b   :  { %v1896_v58 = vadd.f32 %v1895_v46, %v1894_v44  ;;  %v1908_v59 = vadd.f32 %v1907_v49, %v1906_v45 }
 0x58c   :  { %v1891_v60 = vrot.slane %v1890_v50, 1  ;;  %v1903_v61 = vrot.slane %v1902_v54, 1 }
 0x58d   :  { %v1897_v62 = vrot.slane %v1896_v58, 1  ;;  %v1909_v63 = vrot.slane %v1908_v59, 1 }
 0x58e   :  { %v1892_v0 = vadd.f32 %v1891_v60, %v1890_v50  ;;  %v1904_v1 = vadd.f32 %v1903_v61, %v1902_v54 }
 0x58f   :  { %v1898_v2 = vadd.f32 %v1897_v62, %v1896_v58  ;;  %v1910_v3 = vadd.f32 %v1909_v63, %v1908_v59 }
 0x590   :  { %v4670_v4 = vmul.f32 0.125, %v1892_v0  ;;  %v4672_v5 = vmul.f32 0.125, %v1904_v1 }
 0x591   :  { %v4674_v7 = vmul.f32 0.125, %v1898_v2  ;;  %v4676_v8 = vmul.f32 0.125, %v1910_v3 }
 0x592   :  { %v1943_v9 = vsub.f32 %v4654_v16, %v4670_v4  ;;  %v1945_v10 = vsub.f32 %v4656_v42, %v4672_v5 }
 0x593   :  { %v1944_v53 = vsub.f32 %v4660_v18, %v4674_v7  ;;  %v1946_v12 = vsub.f32 %v4662_v43, %v4676_v8 }
 0x594   :  { %v1951_v13 = vmul.f32 %v1943_v9, %v1943_v9  ;;  %v1953_v22 = vmul.f32 %v1945_v10, %v1945_v10 }
 0x595   :  { %v1952_v56 = vmul.f32 %v1944_v53, %v1944_v53  ;;  %v1954_v25 = vmul.f32 %v1946_v12, %v1946_v12 }
 0x596   :  { %v1959_v27 = vrot.slane %v1951_v13, 4  ;;  %v1971_v28 = vrot.slane %v1953_v22, 4 }
 0x597   :  { %v1965_v29 = vrot.slane %v1952_v56, 4  ;;  %v1977_v30 = vrot.slane %v1954_v25, 4 }
 0x598   :  { %v1960_v31 = vadd.f32 %v1959_v27, %v1951_v13  ;;  %v1972_v32 = vadd.f32 %v1971_v28, %v1953_v22 }
 0x599   :  { %v1966_v55 = vadd.f32 %v1965_v29, %v1952_v56  ;;  %v1978_v33 = vadd.f32 %v1977_v30, %v1954_v25 }
 0x59a   :  { %v1961_v34 = vrot.slane %v1960_v31, 2  ;;  %v1973_v35 = vrot.slane %v1972_v32, 2 }
 0x59b   :  { %v1967_v36 = vrot.slane %v1966_v55, 2  ;;  %v1979_v38 = vrot.slane %v1978_v33, 2 }
 0x59c   :  { %v1962_v40 = vadd.f32 %v1961_v34, %v1960_v31  ;;  %v1974_v41 = vadd.f32 %v1973_v35, %v1972_v32 }
 0x59d   :  { %v1968_v57 = vadd.f32 %v1967_v36, %v1966_v55  ;;  %v1980_v19 = vadd.f32 %v1979_v38, %v1978_v33 }
 0x59e   :  { %v1963_v6 = vrot.slane %v1962_v40, 1  ;;  %v1975_v20 = vrot.slane %v1974_v41, 1 }
 0x59f   :  { %v1969_v47 = vrot.slane %v1968_v57, 1  ;;  %v1981_v51 = vrot.slane %v1980_v19, 1 }
 0x5a0   :  { %v1964_v26 = vadd.f32 %v1963_v6, %v1962_v40  ;;  %v1976_v48 = vadd.f32 %v1975_v20, %v1974_v41 }
 0x5a1   :  { %v1970_v11 = vadd.f32 %v1969_v47, %v1968_v57  ;;  %v1982_v52 = vadd.f32 %v1981_v51, %v1980_v19 }
 0x5a2   :  { %v2007_v44 = vmul.f32 0.125, %v1964_v26  ;;  %v2009_v45 = vmul.f32 0.125, %v1976_v48 }
 0x5a3   :  { %v2008_v37 = vmul.f32 0.125, %v1970_v11  ;;  %v2010_v39 = vmul.f32 0.125, %v1982_v52 }
 0x5a4   :  { %v2015_v46 = vadd.f32 1e-05, %v2007_v44  ;;  %v2017_v49 = vadd.f32 1e-05, %v2009_v45 }
 0x5a5   :  { %v2016_v50 = vadd.f32 1e-05, %v2008_v37  ;;  %v2018_v54 = vadd.f32 1e-05, %v2010_v39 }
 0x5a6   :  { %3919 = vrsqrt.f32 %v2015_v46 }
 0x5a7   :  { %3921 = vrsqrt.f32 %v2017_v49 }
 0x5a8   :  { %3923 = vrsqrt.f32 %v2016_v50 }
 0x5a9   :  { %3925 = vrsqrt.f32 %v2018_v54 }
 0x5b0   :  { %v3920_v58 = vpop.eup %3919 }
 0x5b1   :  { %v3922_v59 = vpop.eup %3921 }
 0x5b2   :  { %v3924_v60 = vpop.eup %3923 }
 0x5b3   :  { %v3926_v61 = vpop.eup %3925  ;;  %v2039_v62 = vcombine.low %v3920_v58, %v3924_v60 }
 0x5b4   :  { %v2040_v63 = vcombine.low %v3922_v59, %v3926_v61 }
 0x5b5   :  { %v4687_v0 = vrot.slane %v2039_v62, %v4542_v17 }
 0x5b6   :  { %v4690_v1 = vrot.slane %v2040_v63, %v4542_v17 }
 0x5b8   :  { %v2071_v2 = vcombine.low %v4687_v0, %v4690_v1 }
 0x603   :  { %v4694_v3 = vpop.f32.mrb[12].mxu0  ;;  %v4696_v9 = vpop.f32.mrb[12].mxu1 }
 0x604   :  { %v1911_v10 = vrot.slane %v4694_v3, 4  ;;  %v1923_v53 = vrot.slane %v4696_v9, 4  ;;  %v4700_v12 = vpop.f32.mrb[13].mxu0  ;;  %v4702_v13 = vpop.f32.mrb[13].mxu1 }
 0x605   :  { %v1917_v22 = vrot.slane %v4700_v12, 4  ;;  %v1929_v56 = vrot.slane %v4702_v13, 4  ;;  %v1800_v25 = vpop.f32.mrb[14].mxu0  ;;  %v1882_v27 = vpop.f32.mrb[14].mxu1 }
 0x606   :  { %v1912_v28 = vadd.f32 %v1911_v10, %v4694_v3  ;;  %v1924_v29 = vadd.f32 %v1923_v53, %v4696_v9  ;;  %v1801_v30 = vpop.f32.mrb[15].mxu0  ;;  %v1883_v31 = vpop.f32.mrb[15].mxu1 }
 0x607   :  { %v1918_v32 = vadd.f32 %v1917_v22, %v4700_v12  ;;  %v1930_v55 = vadd.f32 %v1929_v56, %v4702_v13 }
 0x608   :  { %v1913_v33 = vrot.slane %v1912_v28, 2  ;;  %v1925_v34 = vrot.slane %v1924_v29, 2 }
 0x609   :  { %v1919_v35 = vrot.slane %v1918_v32, 2  ;;  %v1931_v36 = vrot.slane %v1930_v55, 2 }
 0x60a   :  { %v1914_v38 = vadd.f32 %v1913_v33, %v1912_v28  ;;  %v1926_v40 = vadd.f32 %v1925_v34, %v1924_v29 }
 0x60b   :  { %v1920_v41 = vadd.f32 %v1919_v35, %v1918_v32  ;;  %v1932_v57 = vadd.f32 %v1931_v36, %v1930_v55 }
 0x60c   :  { %v1915_v19 = vrot.slane %v1914_v38, 1  ;;  %v1927_v6 = vrot.slane %v1926_v40, 1 }
 0x60d   :  { %v1921_v20 = vrot.slane %v1920_v41, 1  ;;  %v1933_v47 = vrot.slane %v1932_v57, 1 }
 0x60e   :  { %v1916_v51 = vadd.f32 %v1915_v19, %v1914_v38  ;;  %v1928_v26 = vadd.f32 %v1927_v6, %v1926_v40 }
 0x60f   :  { %v1922_v48 = vadd.f32 %v1921_v20, %v1920_v41  ;;  %v1934_v11 = vadd.f32 %v1933_v47, %v1932_v57 }
 0x610   :  { %v4710_v52 = vmul.f32 0.125, %v1916_v51  ;;  %v4712_v44 = vmul.f32 0.125, %v1928_v26 }
 0x611   :  { %v4714_v45 = vmul.f32 0.125, %v1922_v48  ;;  %v4716_v37 = vmul.f32 0.125, %v1934_v11 }
 0x612   :  { %v1947_v39 = vsub.f32 %v4694_v3, %v4710_v52  ;;  %v1949_v46 = vsub.f32 %v4696_v9, %v4712_v44 }
 0x613   :  { %v1948_v49 = vsub.f32 %v4700_v12, %v4714_v45  ;;  %v1950_v50 = vsub.f32 %v4702_v13, %v4716_v37 }
 0x614   :  { %v1955_v54 = vmul.f32 %v1947_v39, %v1947_v39  ;;  %v1957_v58 = vmul.f32 %v1949_v46, %v1949_v46 }
 0x615   :  { %v1956_v59 = vmul.f32 %v1948_v49, %v1948_v49  ;;  %v1958_v60 = vmul.f32 %v1950_v50, %v1950_v50 }
 0x616   :  { %v1983_v61 = vrot.slane %v1955_v54, 4  ;;  %v1995_v62 = vrot.slane %v1957_v58, 4 }
 0x617   :  { %v1989_v63 = vrot.slane %v1956_v59, 4  ;;  %v2001_v10 = vrot.slane %v1958_v60, 4 }
 0x618   :  { %v1984_v53 = vadd.f32 %v1983_v61, %v1955_v54  ;;  %v1996_v22 = vadd.f32 %v1995_v62, %v1957_v58 }
 0x619   :  { %v1990_v56 = vadd.f32 %v1989_v63, %v1956_v59  ;;  %v2002_v25 = vadd.f32 %v2001_v10, %v1958_v60  ;;  %v2079_v63 = vrot.slane %v2071_v2, %v4542_v17 }
 0x61a   :  { %v1985_v27 = vrot.slane %v1984_v53, 2  ;;  %v1997_v28 = vrot.slane %v1996_v22, 2 }
 0x61b   :  { %v1991_v29 = vrot.slane %v1990_v56, 2  ;;  %v2003_v30 = vrot.slane %v2002_v25, 2 }
 0x61c   :  { %v1986_v31 = vadd.f32 %v1985_v27, %v1984_v53  ;;  %v1998_v32 = vadd.f32 %v1997_v28, %v1996_v22  ;;  %v1885_v53 = vld [vmem:[#allocation20] sm:$0xff]  ;;  %v4740_v27 = vsub.s32 6, %v4539_v15  ;;  %v4743_v28 = vsub.s32 7, %v4539_v15 }
 0x61d   :  { %v1992_v55 = vadd.f32 %v1991_v29, %v1990_v56  ;;  %v2004_v33 = vadd.f32 %v2003_v30, %v2002_v25  ;;  %v4734_v56 = vsub.s32 4, %v4539_v15  ;;  %v4737_v25 = vsub.s32 5, %v4539_v15 }
 0x61e   :  { %v1987_v34 = vrot.slane %v1986_v31, 1  ;;  %v1999_v35 = vrot.slane %v1998_v32, 1 }
 0x61f   :  { %v1993_v36 = vrot.slane %v1992_v55, 1  ;;  %v2005_v38 = vrot.slane %v2004_v33, 1 }
 0x620   :  { %v1988_v40 = vadd.f32 %v1987_v34, %v1986_v31  ;;  %v2000_v41 = vadd.f32 %v1999_v35, %v1998_v32 }
 0x621   :  { %v1994_v57 = vadd.f32 %v1993_v36, %v1992_v55  ;;  %v2006_v19 = vadd.f32 %v2005_v38, %v2004_v33 }
 0x622   :  { %v2011_v6 = vmul.f32 0.125, %v1988_v40  ;;  %v2013_v20 = vmul.f32 0.125, %v2000_v41 }
 0x623   :  { %v2012_v47 = vmul.f32 0.125, %v1994_v57  ;;  %v2014_v51 = vmul.f32 0.125, %v2006_v19 }
 0x624   :  { %v2019_v26 = vadd.f32 1e-05, %v2011_v6  ;;  %v2021_v48 = vadd.f32 1e-05, %v2013_v20 }
 0x625   :  { %v2020_v11 = vadd.f32 1e-05, %v2012_v47  ;;  %v2022_v39 = vadd.f32 1e-05, %v2014_v51 }
 0x626   :  { %3927 = vrsqrt.f32 %v2019_v26 }
 0x627   :  { %3929 = vrsqrt.f32 %v2021_v48 }
 0x628   :  { %3931 = vrsqrt.f32 %v2020_v11 }
 0x629   :  { %3933 = vrsqrt.f32 %v2022_v39  ;;  %v1886_v39 = vld [vmem:[#allocation22] sm:$0xff] }
 0x630   :  { %v3928_v46 = vpop.eup %3927 }
 0x631   :  { %v3930_v49 = vpop.eup %3929 }
 0x632   :  { %v3932_v50 = vpop.eup %3931 }
 0x633   :  { %v3934_v54 = vpop.eup %3933  ;;  %v2041_v58 = vcombine.low %v3928_v46, %v3932_v50 }
 0x634   :  { %v2042_v59 = vcombine.low %v3930_v49, %v3934_v54 }
 0x635   :  { %v2063_v60 = vrot.slane %v2041_v58, %v4542_v17 }
 0x636   :  { %v2070_v61 = vrot.slane %v2042_v59, %v4542_v17 }
 0x638   :  { %v2072_v62 = vcombine.low %v2063_v60, %v2070_v61 }
 0x63a   :  { %v2086_v10 = vrot.slane %v2072_v62, %v4542_v17 }
 0x63c   :  { %v2087_v22 = vcombine.low %v2079_v63, %v2086_v10 }
 0x63e   :  { %v2089_v29 = vmul.f32 %v2087_v22, %v1885_v53 }
 0x640   :  { %v2094_v0 = vrot.slane %v2089_v29, %v4547_v23  ;;  %v2098_v1 = vrot.slane %v2089_v29, %v4550_v24  ;;  %v2102_v2 = vrot.slane %v2089_v29, %v4594_v14  ;;  %v2106_v30 = vrot.slane %v2089_v29, %v4597_v21 }
 0x641   :  { %v2110_v31 = vrot.slane %v2089_v29, %v4734_v56  ;;  %v2114_v32 = vrot.slane %v2089_v29, %v4737_v25  ;;  %v2118_v55 = vrot.slane %v2089_v29, %v4740_v27  ;;  %v2122_v33 = vrot.slane %v2089_v29, %v4743_v28 }
 0x642   :  { %v2131_v15 = vmul.f32 %v2094_v0, %v4670_v4  ;;  %v2132_v34 = vmul.f32 %v2098_v1, %v4674_v7  ;;  %v2133_v35 = vmul.f32 %v2102_v2, %v4672_v5  ;;  %v2134_v36 = vmul.f32 %v2106_v30, %v4676_v8 }
 0x643   :  { %v2135_v38 = vmul.f32 %v2110_v31, %v4710_v52  ;;  %v2136_v40 = vmul.f32 %v2114_v32, %v4714_v45  ;;  %v2137_v41 = vmul.f32 %v2118_v55, %v4712_v44  ;;  %v2138_v57 = vmul.f32 %v2122_v33, %v4716_v37 }
 0x644   :  { %v2147_v19 = vcombine.low %v2131_v15, %v2132_v34  ;;  %v2148_v6 = vcombine.low %v2133_v35, %v2134_v36  ;;  %v2198_v20 = vmul.f32 %v2094_v0, %v4654_v16  ;;  %v2199_v4 = vmul.f32 %v2098_v1, %v4660_v18 }
 0x645   :  { %v2149_v47 = vcombine.low %v2135_v38, %v2136_v40  ;;  %v2150_v7 = vcombine.low %v2137_v41, %v2138_v57  ;;  %v2200_v5 = vmul.f32 %v2102_v2, %v4656_v42  ;;  %v2201_v8 = vmul.f32 %v2106_v30, %v4662_v43 }
 0x646   :  { %v2157_v52 = vrot.slane %v2147_v19, %v4542_v17  ;;  %v2164_v45 = vrot.slane %v2148_v6, %v4542_v17  ;;  %v2202_v44 = vmul.f32 %v2110_v31, %v4694_v3  ;;  %v2203_v37 = vmul.f32 %v2114_v32, %v4700_v12 }
 0x647   :  { %v2171_v51 = vrot.slane %v2149_v47, %v4542_v17  ;;  %v2178_v16 = vrot.slane %v2150_v7, %v4542_v17  ;;  %v2204_v18 = vmul.f32 %v2118_v55, %v4696_v9  ;;  %v2205_v26 = vmul.f32 %v2122_v33, %v4702_v13 }
 0x648   :  { %v2179_v48 = vcombine.low %v2157_v52, %v2164_v45 }
 0x649   :  { %v2180_v42 = vcombine.low %v2171_v51, %v2178_v16 }
 0x64a   :  { %v2187_v43 = vrot.slane %v2179_v48, %v4542_v17 }
 0x64b   :  { %v2194_v11 = vrot.slane %v2180_v42, %v4542_v17 }
 0x64d   :  { %v2195_v46 = vcombine.low %v2187_v43, %v2194_v11 }
 0x64f   :  { %v2197_v49 = vsub.f32 %v1886_v39, %v2195_v46 }
 0x651   :  { %v2210_v3 = vrot.slane %v2197_v49, %v4547_v23  ;;  %v2214_v12 = vrot.slane %v2197_v49, %v4550_v24  ;;  %v2218_v50 = vrot.slane %v2197_v49, %v4594_v14  ;;  %v2222_v54 = vrot.slane %v2197_v49, %v4597_v21 }
 0x652   :  { %v2226_v9 = vrot.slane %v2197_v49, %v4734_v56  ;;  %v2230_v13 = vrot.slane %v2197_v49, %v4737_v25  ;;  %v2234_v58 = vrot.slane %v2197_v49, %v4740_v27  ;;  %v2238_v59 = vrot.slane %v2197_v49, %v4743_v28 }
 0x653   :  { %v2247_v17 = vadd.f32 %v2210_v3, %v2198_v20  ;;  %v2248_v60 = vadd.f32 %v2214_v12, %v2199_v4  ;;  %v2249_v61 = vadd.f32 %v2218_v50, %v2200_v5  ;;  %v2250_v62 = vadd.f32 %v2222_v54, %v2201_v8 }
 0x654   :  { %v2251_v63 = vadd.f32 %v2226_v9, %v2202_v44  ;;  %v2252_v10 = vadd.f32 %v2230_v13, %v2203_v37  ;;  %v2253_v53 = vadd.f32 %v2234_v58, %v2204_v18  ;;  %v2254_v22 = vadd.f32 %v2238_v59, %v2205_v26 }
 0x655   :  { %vm2255_vm8 = vcmp.ge.f32.partialorder %v2247_v17, 0.0  ;;  %vm2256_vm9 = vcmp.ge.f32.partialorder %v2248_v60, 0.0  ;;  %vm2257_vm10 = vcmp.ge.f32.partialorder %v2249_v61, 0.0  ;;  %vm2258_vm11 = vcmp.ge.f32.partialorder %v2250_v62, 0.0 }
 0x656   :  { %vm2259_vm12 = vcmp.ge.f32.partialorder %v2251_v63, 0.0  ;;  %vm2260_vm13 = vcmp.ge.f32.partialorder %v2252_v10, 0.0  ;;  %vm2261_vm14 = vcmp.ge.f32.partialorder %v2253_v53, 0.0  ;;  %vm2262_vm15 = vcmp.ge.f32.partialorder %v2254_v22, 0.0 }
 0x657   :  { %v2263_v29 = vmul.f32 0.2, %v2247_v17  ;;  %v2264_v0 = vmul.f32 0.2, %v2248_v60  ;;  %v2265_v1 = vmul.f32 0.2, %v2249_v61 }
 0x658   :  { %v2266_v2 = vmul.f32 0.2, %v2250_v62  ;;  %v2267_v30 = vmul.f32 0.2, %v2251_v63  ;;  %v2268_v31 = vmul.f32 0.2, %v2252_v10 }
 0x659   :  { %v2269_v32 = vmul.f32 0.2, %v2253_v53  ;;  %v2270_v55 = vmul.f32 0.2, %v2254_v22  ;;  %v4784_v33 = vsel %vm2255_vm8, %v2247_v17, %v2263_v29  ;;  %v2272_v15 = vsel %vm2256_vm9, %v2248_v60, %v2264_v0 }
 0x65a   :  { %v4788_v34 = vsel %vm2257_vm10, %v2249_v61, %v2265_v1  ;;  %v4791_v35 = vsel %vm2258_vm11, %v2250_v62, %v2266_v2  ;;  %v4794_v36 = vsel %vm2259_vm12, %v2251_v63, %v2267_v30  ;;  %v4797_v38 = vsel %vm2260_vm13, %v2252_v10, %v2268_v31 }
 0x65b   :  { %v4800_v40 = vsel %vm2261_vm14, %v2253_v53, %v2269_v32  ;;  %v4803_v41 = vsel %vm2262_vm15, %v2254_v22, %v2270_v55 }
 0x65c   :  { %4253 = dma.done.wait [#allocation4 + $0x1], 65536 }
 0x65d   :  { %4254 = vsyncadd [#allocation4 + $0x1], 4294901760  ;;  %v4805_v57 = vpack.c.bf16 %v2272_v15, %v2272_v15  ;;  %v2292_v19 = vld [vmem:[#allocation3 + $0x8] sm:$0xff]  ;;  %v2294_v6 = vld [vmem:[#allocation3 + $0x18] sm:$0xff]  ;;  %s4288_s13 = smov [#allocation25]  }
 0x65e   :  { %v2291_v20 = vld [vmem:[#allocation3] sm:$0xff]  ;;  %2845 = vmatprep.subr.bf16.mxu0 %v2292_v19  ;;  %3009 = vmatprep.subr.bf16.mxu1 %v2294_v6  ;;  %v2293_v4 = vld [vmem:[#allocation3 + $0x10] sm:$0xff]  ;;  %v2300_v47 = vld [vmem:[#allocation3 + $0x48] sm:$0xff]  ;;  %s3523_s23 = sshll.u32 %s4288_s13, 4  ;;  %s3524_s23 = int_to_ptr.vmem [resolvable:$true] %s3523_s23 }
 0x65f   :  { %2877 = vmatprep.mubr.bf16.mxu0 %v4805_v57  ;;  %3041 = vmatprep.mubr.bf16.mxu1 %v4805_v57  ;;  %v2302_v7 = vld [vmem:[#allocation3 + $0x58] sm:$0xff]  ;;  %v2299_v5 = vld [vmem:[#allocation3 + $0x40] sm:$0xff]  ;;  %v2301_v8 = vld [vmem:[#allocation3 + $0x50] sm:$0xff]  ;;  %s4215_s1 = scalar_lea.vmem %s3524_s23, 1024  ;;  %p4220_p13 = scmp.lt.s32.totalorder %s3524_s23, %s3524_s23 }
 0x660   :  { %2846 = vmatpush1.bf16.msra.mxu0 %v2291_v20  ;;  %3010 = vmatpush1.bf16.msra.mxu1 %v2293_v4  ;;  %v2308_v52 = vld [vmem:[#allocation3 + $0x88] sm:$0xff]  ;;  %v2310_v45 = vld [vmem:[#allocation3 + $0x98] sm:$0xff]  ;;  %v2307_v44 = vld [vmem:[#allocation3 + $0x80] sm:$0xff]  ;;  %p4216_p12 = scmp.ne.s32.totalorder %s3524_s23, %s4215_s1  ;;  %p4221_p0 = scmp.lt.s32.totalorder %s4215_s1, %s4215_s1 }
 0x661   :  { %2847 = vmatprep.subr.bf16.mxu0 %v2300_v47  ;;  %3011 = vmatprep.subr.bf16.mxu1 %v2302_v7  ;;  %v2309_v37 = vld [vmem:[#allocation3 + $0x90] sm:$0xff]  ;;  %v2316_v51 = vld [vmem:[#allocation3 + $0xc8] sm:$0xff]  ;;  %v2318_v16 = vld [vmem:[#allocation3 + $0xd8] sm:$0xff] }
 0x662   :  { %v2315_v18 = vld [vmem:[#allocation3 + $0xc0] sm:$0xff]  ;;  %v2317_v26 = vld [vmem:[#allocation3 + $0xd0] sm:$0xff]  ;;  %v2324_v48 = vld [vmem:[#allocation3 + $0x108] sm:$0xff]  ;;  %p4222_p1 = por %p4221_p0, %p4220_p13 }
 0x663   :  { %v2326_v42 = vld [vmem:[#allocation3 + $0x118] sm:$0xff]  ;;  %v2323_v43 = vld [vmem:[#allocation3 + $0x100] sm:$0xff]  ;;  %v2325_v11 = vld [vmem:[#allocation3 + $0x110] sm:$0xff] }
 0x664   :  { %2848 = vmatpush1.bf16.msra.mxu0 %v2299_v5  ;;  %3012 = vmatpush1.bf16.msra.mxu1 %v2301_v8  ;;  %v2332_v39 = vld [vmem:[#allocation3 + $0x148] sm:$0xff]  ;;  %v2334_v46 = vld [vmem:[#allocation3 + $0x158] sm:$0xff]  ;;  %v2331_v49 = vld [vmem:[#allocation3 + $0x140] sm:$0xff]  ;;  %p4223_p2 = pnand %p4222_p1, %p4216_p12 }
 0x665   :  { %2849 = vmatprep.subr.bf16.mxu0 %v2308_v52  ;;  %3013 = vmatprep.subr.bf16.mxu1 %v2310_v45  ;;  %v2333_v3 = vld [vmem:[#allocation3 + $0x150] sm:$0xff]  ;;  %v2340_v12 = vld [vmem:[#allocation3 + $0x188] sm:$0xff]  ;;  %v2342_v50 = vld [vmem:[#allocation3 + $0x198] sm:$0xff] }
 0x666   :  { %v2339_v54 = vld [vmem:[#allocation3 + $0x180] sm:$0xff]  ;;  %v2341_v9 = vld [vmem:[#allocation3 + $0x190] sm:$0xff]  ;;  %v2348_v13 = vld [vmem:[#allocation3 + $0x1c8] sm:$0xff] }
 0x667   :  { %v2350_v58 = vld [vmem:[#allocation3 + $0x1d8] sm:$0xff]  ;;  %v2347_v59 = vld [vmem:[#allocation3 + $0x1c0] sm:$0xff]  ;;  %v2349_v17 = vld [vmem:[#allocation3 + $0x1d0] sm:$0xff] }
 0x668   :  { %2850 = vmatpush1.bf16.msra.mxu0 %v2307_v44  ;;  %3014 = vmatpush1.bf16.msra.mxu1 %v2309_v37  ;;  %v2356_v60 = vld [vmem:[#allocation3 + $0x208] sm:$0xff]  ;;  %v2358_v61 = vld [vmem:[#allocation3 + $0x218] sm:$0xff]  ;;  %v2355_v62 = vld [vmem:[#allocation3 + $0x200] sm:$0xff] }
 0x669   :  { %2851 = vmatprep.subr.bf16.mxu0 %v2316_v51  ;;  %3015 = vmatprep.subr.bf16.mxu1 %v2318_v16  ;;  %v2357_v63 = vld [vmem:[#allocation3 + $0x210] sm:$0xff]  ;;  %v2364_v10 = vld [vmem:[#allocation3 + $0x248] sm:$0xff]  ;;  %v2366_v53 = vld [vmem:[#allocation3 + $0x258] sm:$0xff] }
 0x66a   :  { %v2363_v22 = vld [vmem:[#allocation3 + $0x240] sm:$0xff]  ;;  %v2365_v29 = vld [vmem:[#allocation3 + $0x250] sm:$0xff]  ;;  %v2372_v0 = vld [vmem:[#allocation3 + $0x288] sm:$0xff] }
 0x66b   :  { %v2374_v1 = vld [vmem:[#allocation3 + $0x298] sm:$0xff]  ;;  %v2371_v2 = vld [vmem:[#allocation3 + $0x280] sm:$0xff]  ;;  %v2373_v30 = vld [vmem:[#allocation3 + $0x290] sm:$0xff] }
 0x66c   :  { %2852 = vmatpush1.bf16.msra.mxu0 %v2315_v18  ;;  %3016 = vmatpush1.bf16.msra.mxu1 %v2317_v26  ;;  %v2380_v31 = vld [vmem:[#allocation3 + $0x2c8] sm:$0xff]  ;;  %v2382_v32 = vld [vmem:[#allocation3 + $0x2d8] sm:$0xff]  ;;  %v2379_v55 = vld [vmem:[#allocation3 + $0x2c0] sm:$0xff] }
 0x66d   :  { %2853 = vmatprep.subr.bf16.mxu0 %v2324_v48  ;;  %3017 = vmatprep.subr.bf16.mxu1 %v2326_v42  ;;  %v2381_v15 = vld [vmem:[#allocation3 + $0x2d0] sm:$0xff]  ;;  %v2388_v19 = vld [vmem:[#allocation3 + $0x308] sm:$0xff]  ;;  %v2390_v6 = vld [vmem:[#allocation3 + $0x318] sm:$0xff] }
 0x66e   :  { %v2387_v20 = vld [vmem:[#allocation3 + $0x300] sm:$0xff]  ;;  %v2389_v4 = vld [vmem:[#allocation3 + $0x310] sm:$0xff]  ;;  %v2396_v47 = vld [vmem:[#allocation3 + $0x348] sm:$0xff] }
 0x66f   :  { %v2398_v7 = vld [vmem:[#allocation3 + $0x358] sm:$0xff]  ;;  %v2395_v5 = vld [vmem:[#allocation3 + $0x340] sm:$0xff]  ;;  %v2397_v8 = vld [vmem:[#allocation3 + $0x350] sm:$0xff] }
 0x670   :  { %2854 = vmatpush1.bf16.msra.mxu0 %v2323_v43  ;;  %3018 = vmatpush1.bf16.msra.mxu1 %v2325_v11  ;;  %v2404_v52 = vld [vmem:[#allocation3 + $0x388] sm:$0xff]  ;;  %v2406_v45 = vld [vmem:[#allocation3 + $0x398] sm:$0xff]  ;;  %v2403_v44 = vld [vmem:[#allocation3 + $0x380] sm:$0xff]  ;;  %v4811_v43 = vpack.c.bf16 %v4784_v33, %v4784_v33 }
 0x671   :  { %2855 = vmatprep.subr.bf16.mxu0 %v2332_v39  ;;  %3019 = vmatprep.subr.bf16.mxu1 %v2334_v46  ;;  %v2405_v37 = vld [vmem:[#allocation3 + $0x390] sm:$0xff]  ;;  %v2412_v51 = vld [vmem:[#allocation3 + $0x3c8] sm:$0xff]  ;;  %v2414_v16 = vld [vmem:[#allocation3 + $0x3d8] sm:$0xff] }
 0x672   :  { %v2411_v18 = vld [vmem:[#allocation3 + $0x3c0] sm:$0xff]  ;;  %v2413_v26 = vld [vmem:[#allocation3 + $0x3d0] sm:$0xff]  ;;  %v2420_v48 = vld [vmem:[#allocation3 + $0x408] sm:$0xff] }
 0x673   :  { %v2422_v42 = vld [vmem:[#allocation3 + $0x418] sm:$0xff]  ;;  %v2419_v11 = vld [vmem:[#allocation3 + $0x400] sm:$0xff]  ;;  %v2421_v39 = vld [vmem:[#allocation3 + $0x410] sm:$0xff] }
 0x674   :  { %2856 = vmatpush1.bf16.msra.mxu0 %v2331_v49  ;;  %3020 = vmatpush1.bf16.msra.mxu1 %v2333_v3  ;;  %v2428_v46 = vld [vmem:[#allocation3 + $0x448] sm:$0xff]  ;;  %v2430_v49 = vld [vmem:[#allocation3 + $0x458] sm:$0xff]  ;;  %v4815_v3 = vpack.c.bf16 %v4791_v35, %v4791_v35  ;;  %v2427_v33 = vld [vmem:[#allocation3 + $0x440] sm:$0xff] }
 0x675   :  { %2857 = vmatprep.subr.bf16.mxu0 %v2340_v12  ;;  %3021 = vmatprep.subr.bf16.mxu1 %v2342_v50  ;;  %v2429_v12 = vld [vmem:[#allocation3 + $0x450] sm:$0xff]  ;;  %v2436_v50 = vld [vmem:[#allocation3 + $0x488] sm:$0xff]  ;;  %v2435_v35 = vld [vmem:[#allocation3 + $0x480] sm:$0xff] }
 0x678   :  { %2858 = vmatpush1.bf16.msra.mxu0 %v2339_v54  ;;  %3022 = vmatpush1.bf16.msra.mxu1 %v2341_v9  ;;  %v2438_v54 = vld [vmem:[#allocation3 + $0x498] sm:$0xff]  ;;  %v2437_v9 = vld [vmem:[#allocation3 + $0x490] sm:$0xff] }
 0x679   :  { %2859 = vmatprep.subr.bf16.mxu0 %v2348_v13  ;;  %3023 = vmatprep.subr.bf16.mxu1 %v2350_v58  ;;  %v2444_v13 = vld [vmem:[#allocation3 + $0x4c8] sm:$0xff]  ;;  %v2446_v58 = vld [vmem:[#allocation3 + $0x4d8] sm:$0xff] }
 0x67c   :  { %2860 = vmatpush1.bf16.msra.mxu0 %v2347_v59  ;;  %3024 = vmatpush1.bf16.msra.mxu1 %v2349_v17  ;;  %v2443_v59 = vld [vmem:[#allocation3 + $0x4c0] sm:$0xff]  ;;  %v2445_v17 = vld [vmem:[#allocation3 + $0x4d0] sm:$0xff] }
 0x67d   :  { %2861 = vmatprep.subr.bf16.mxu0 %v2356_v60  ;;  %3025 = vmatprep.subr.bf16.mxu1 %v2358_v61  ;;  %v2452_v60 = vld [vmem:[#allocation3 + $0x508] sm:$0xff]  ;;  %v2454_v61 = vld [vmem:[#allocation3 + $0x518] sm:$0xff] }
 0x680   :  { %2862 = vmatpush1.bf16.msra.mxu0 %v2355_v62  ;;  %3026 = vmatpush1.bf16.msra.mxu1 %v2357_v63  ;;  %v2451_v62 = vld [vmem:[#allocation3 + $0x500] sm:$0xff]  ;;  %v2453_v63 = vld [vmem:[#allocation3 + $0x510] sm:$0xff] }
 0x681   :  { %2863 = vmatprep.subr.bf16.mxu0 %v2364_v10  ;;  %3027 = vmatprep.subr.bf16.mxu1 %v2366_v53  ;;  %v2460_v10 = vld [vmem:[#allocation3 + $0x548] sm:$0xff]  ;;  %v2462_v53 = vld [vmem:[#allocation3 + $0x558] sm:$0xff] }
 0x684   :  { %2864 = vmatpush1.bf16.msra.mxu0 %v2363_v22  ;;  %3028 = vmatpush1.bf16.msra.mxu1 %v2365_v29  ;;  %v2459_v22 = vld [vmem:[#allocation3 + $0x540] sm:$0xff]  ;;  %v2461_v29 = vld [vmem:[#allocation3 + $0x550] sm:$0xff] }
 0x685   :  { %2865 = vmatprep.subr.bf16.mxu0 %v2372_v0  ;;  %3029 = vmatprep.subr.bf16.mxu1 %v2374_v1  ;;  %v2468_v0 = vld [vmem:[#allocation3 + $0x588] sm:$0xff]  ;;  %v2470_v1 = vld [vmem:[#allocation3 + $0x598] sm:$0xff] }
 0x688   :  { %2866 = vmatpush1.bf16.msra.mxu0 %v2371_v2  ;;  %3030 = vmatpush1.bf16.msra.mxu1 %v2373_v30  ;;  %v2467_v2 = vld [vmem:[#allocation3 + $0x580] sm:$0xff]  ;;  %v2469_v30 = vld [vmem:[#allocation3 + $0x590] sm:$0xff] }
 0x689   :  { %2867 = vmatprep.subr.bf16.mxu0 %v2380_v31  ;;  %3031 = vmatprep.subr.bf16.mxu1 %v2382_v32  ;;  %v2476_v31 = vld [vmem:[#allocation3 + $0x5c8] sm:$0xff]  ;;  %v2478_v32 = vld [vmem:[#allocation3 + $0x5d8] sm:$0xff] }
 0x68c   :  { %2868 = vmatpush1.bf16.msra.mxu0 %v2379_v55  ;;  %3032 = vmatpush1.bf16.msra.mxu1 %v2381_v15  ;;  %v2475_v55 = vld [vmem:[#allocation3 + $0x5c0] sm:$0xff]  ;;  %v2477_v15 = vld [vmem:[#allocation3 + $0x5d0] sm:$0xff] }
 0x68d   :  { %2869 = vmatprep.subr.bf16.mxu0 %v2388_v19  ;;  %3033 = vmatprep.subr.bf16.mxu1 %v2390_v6  ;;  %v2484_v19 = vld [vmem:[#allocation3 + $0x608] sm:$0xff]  ;;  %v2486_v6 = vld [vmem:[#allocation3 + $0x618] sm:$0xff] }
 0x690   :  { %2870 = vmatpush1.bf16.msra.mxu0 %v2387_v20  ;;  %3034 = vmatpush1.bf16.msra.mxu1 %v2389_v4  ;;  %v2483_v20 = vld [vmem:[#allocation3 + $0x600] sm:$0xff]  ;;  %v2485_v4 = vld [vmem:[#allocation3 + $0x610] sm:$0xff] }
 0x691   :  { %2871 = vmatprep.subr.bf16.mxu0 %v2396_v47  ;;  %3035 = vmatprep.subr.bf16.mxu1 %v2398_v7  ;;  %v2492_v47 = vld [vmem:[#allocation3 + $0x648] sm:$0xff]  ;;  %v2494_v7 = vld [vmem:[#allocation3 + $0x658] sm:$0xff] }
 0x694   :  { %2872 = vmatpush1.bf16.msra.mxu0 %v2395_v5  ;;  %3036 = vmatpush1.bf16.msra.mxu1 %v2397_v8  ;;  %v2491_v5 = vld [vmem:[#allocation3 + $0x640] sm:$0xff]  ;;  %v2493_v8 = vld [vmem:[#allocation3 + $0x650] sm:$0xff] }
 0x695   :  { %2873 = vmatprep.subr.bf16.mxu0 %v2404_v52  ;;  %3037 = vmatprep.subr.bf16.mxu1 %v2406_v45  ;;  %v2500_v52 = vld [vmem:[#allocation3 + $0x688] sm:$0xff]  ;;  %v2502_v45 = vld [vmem:[#allocation3 + $0x698] sm:$0xff] }
 0x698   :  { %2874 = vmatpush1.bf16.msra.mxu0 %v2403_v44  ;;  %3038 = vmatpush1.bf16.msra.mxu1 %v2405_v37  ;;  %v2499_v44 = vld [vmem:[#allocation3 + $0x680] sm:$0xff]  ;;  %v2501_v37 = vld [vmem:[#allocation3 + $0x690] sm:$0xff] }
 0x699   :  { %2875 = vmatprep.subr.bf16.mxu0 %v2412_v51  ;;  %3039 = vmatprep.subr.bf16.mxu1 %v2414_v16  ;;  %v2508_v51 = vld [vmem:[#allocation3 + $0x6c8] sm:$0xff]  ;;  %v2510_v16 = vld [vmem:[#allocation3 + $0x6d8] sm:$0xff] }
 0x69c   :  { %2876 = vmatpush1.bf16.msra.mxu0 %v2411_v18  ;;  %3040 = vmatpush1.bf16.msra.mxu1 %v2413_v26  ;;  %v2507_v18 = vld [vmem:[#allocation3 + $0x6c0] sm:$0xff]  ;;  %v2509_v26 = vld [vmem:[#allocation3 + $0x6d0] sm:$0xff] }
 0x69d   :  { %2886 = vmatprep.subr.bf16.mxu0 %v2420_v48  ;;  %3050 = vmatprep.subr.bf16.mxu1 %v2422_v42  ;;  %v2516_v48 = vld [vmem:[#allocation3 + $0x708] sm:$0xff]  ;;  %v2518_v42 = vld [vmem:[#allocation3 + $0x718] sm:$0xff] }
 0x69f   :  { %2878 = vmatmul.mubr.bf16.vlgmr.msra.gmra.mrb[16].mxu0 %v4811_v43  ;;  %3042 = vmatmul.mubr.bf16.vlgmr.msra.gmra.mrb[16].mxu1 %v4811_v43 }
 0x6a0   :  { %2887 = vmatpush1.bf16.msra.mxu0 %v2419_v11  ;;  %3051 = vmatpush1.bf16.msra.mxu1 %v2421_v39  ;;  %v2515_v11 = vld [vmem:[#allocation3 + $0x700] sm:$0xff]  ;;  %v2517_v39 = vld [vmem:[#allocation3 + $0x710] sm:$0xff] }
 0x6a1   :  { %2888 = vmatprep.subr.bf16.mxu0 %v2428_v46  ;;  %3052 = vmatprep.subr.bf16.mxu1 %v2430_v49  ;;  %v2524_v46 = vld [vmem:[#allocation3 + $0x748] sm:$0xff]  ;;  %v2526_v49 = vld [vmem:[#allocation3 + $0x758] sm:$0xff] }
 0x6a2   :  { %2918 = vmatprep.mubr.bf16.mxu0 %v4815_v3  ;;  %3082 = vmatprep.mubr.bf16.mxu1 %v4815_v3 }
 0x6a4   :  { %2889 = vmatpush1.bf16.msra.mxu0 %v2427_v33  ;;  %3053 = vmatpush1.bf16.msra.mxu1 %v2429_v12  ;;  %v2523_v33 = vld [vmem:[#allocation3 + $0x740] sm:$0xff]  ;;  %v2525_v12 = vld [vmem:[#allocation3 + $0x750] sm:$0xff] }
 0x6a5   :  { %2890 = vmatprep.subr.bf16.mxu0 %v2436_v50  ;;  %3054 = vmatprep.subr.bf16.mxu1 %v2438_v54  ;;  %v2532_v50 = vld [vmem:[#allocation3 + $0x788] sm:$0xff]  ;;  %v2534_v54 = vld [vmem:[#allocation3 + $0x798] sm:$0xff] }
 0x6a8   :  { %2891 = vmatpush1.bf16.msra.mxu0 %v2435_v35  ;;  %3055 = vmatpush1.bf16.msra.mxu1 %v2437_v9  ;;  %v2531_v35 = vld [vmem:[#allocation3 + $0x780] sm:$0xff]  ;;  %v2533_v9 = vld [vmem:[#allocation3 + $0x790] sm:$0xff] }
 0x6a9   :  { %2892 = vmatprep.subr.bf16.mxu0 %v2444_v13  ;;  %3056 = vmatprep.subr.bf16.mxu1 %v2446_v58  ;;  %v2540_v13 = vld [vmem:[#allocation3 + $0x7c8] sm:$0xff]  ;;  %v2542_v58 = vld [vmem:[#allocation3 + $0x7d8] sm:$0xff] }
 0x6ac   :  { %2893 = vmatpush1.bf16.msra.mxu0 %v2443_v59  ;;  %3057 = vmatpush1.bf16.msra.mxu1 %v2445_v17  ;;  %v2539_v59 = vld [vmem:[#allocation3 + $0x7c0] sm:$0xff]  ;;  %v2541_v17 = vld [vmem:[#allocation3 + $0x7d0] sm:$0xff] }
 0x6ad   :  { %2894 = vmatprep.subr.bf16.mxu0 %v2452_v60  ;;  %3058 = vmatprep.subr.bf16.mxu1 %v2454_v61  ;;  %v2548_v60 = vld [vmem:[#allocation3 + $0x808] sm:$0xff]  ;;  %v2550_v61 = vld [vmem:[#allocation3 + $0x818] sm:$0xff] }
 0x6b0   :  { %2895 = vmatpush1.bf16.msra.mxu0 %v2451_v62  ;;  %3059 = vmatpush1.bf16.msra.mxu1 %v2453_v63  ;;  %v4823_v62 = vpack.c.bf16 %v4788_v34, %v4788_v34  ;;  %v2547_v63 = vld [vmem:[#allocation3 + $0x800] sm:$0xff] }
 0x6b1   :  { %2896 = vmatprep.subr.bf16.mxu0 %v2460_v10  ;;  %3060 = vmatprep.subr.bf16.mxu1 %v2462_v53  ;;  %v2549_v10 = vld [vmem:[#allocation3 + $0x810] sm:$0xff]  ;;  %v2556_v53 = vld [vmem:[#allocation3 + $0x848] sm:$0xff]  ;;  %v2555_v34 = vld [vmem:[#allocation3 + $0x840] sm:$0xff] }
 0x6b4   :  { %2897 = vmatpush1.bf16.msra.mxu0 %v2459_v22  ;;  %3061 = vmatpush1.bf16.msra.mxu1 %v2461_v29  ;;  %v2558_v22 = vld [vmem:[#allocation3 + $0x858] sm:$0xff]  ;;  %v4827_v29 = vpack.c.bf16 %v4797_v38, %v4797_v38  ;;  %v2563_v38 = vld [vmem:[#allocation3 + $0x880] sm:$0xff] }
 0x6b5   :  { %2898 = vmatprep.subr.bf16.mxu0 %v2468_v0  ;;  %3062 = vmatprep.subr.bf16.mxu1 %v2470_v1  ;;  %v2557_v0 = vld [vmem:[#allocation3 + $0x850] sm:$0xff]  ;;  %v2564_v1 = vld [vmem:[#allocation3 + $0x888] sm:$0xff] }
 0x6b8   :  { %2899 = vmatpush1.bf16.msra.mxu0 %v2467_v2  ;;  %3063 = vmatpush1.bf16.msra.mxu1 %v2469_v30  ;;  %v2566_v2 = vld [vmem:[#allocation3 + $0x898] sm:$0xff]  ;;  %v2565_v30 = vld [vmem:[#allocation3 + $0x890] sm:$0xff] }
 0x6b9   :  { %2900 = vmatprep.subr.bf16.mxu0 %v2476_v31  ;;  %3064 = vmatprep.subr.bf16.mxu1 %v2478_v32  ;;  %v2572_v31 = vld [vmem:[#allocation3 + $0x8c8] sm:$0xff]  ;;  %v2574_v32 = vld [vmem:[#allocation3 + $0x8d8] sm:$0xff] }
 0x6bc   :  { %2901 = vmatpush1.bf16.msra.mxu0 %v2475_v55  ;;  %3065 = vmatpush1.bf16.msra.mxu1 %v2477_v15  ;;  %v2571_v55 = vld [vmem:[#allocation3 + $0x8c0] sm:$0xff]  ;;  %v2573_v15 = vld [vmem:[#allocation3 + $0x8d0] sm:$0xff] }
 0x6bd   :  { %2902 = vmatprep.subr.bf16.mxu0 %v2484_v19  ;;  %3066 = vmatprep.subr.bf16.mxu1 %v2486_v6  ;;  %v2580_v19 = vld [vmem:[#allocation3 + $0x908] sm:$0xff]  ;;  %v2582_v6 = vld [vmem:[#allocation3 + $0x918] sm:$0xff] }
 0x6c0   :  { %2903 = vmatpush1.bf16.msra.mxu0 %v2483_v20  ;;  %3067 = vmatpush1.bf16.msra.mxu1 %v2485_v4  ;;  %v2579_v20 = vld [vmem:[#allocation3 + $0x900] sm:$0xff]  ;;  %v2581_v4 = vld [vmem:[#allocation3 + $0x910] sm:$0xff] }
 0x6c1   :  { %2904 = vmatprep.subr.bf16.mxu0 %v2492_v47  ;;  %3068 = vmatprep.subr.bf16.mxu1 %v2494_v7  ;;  %v2588_v47 = vld [vmem:[#allocation3 + $0x948] sm:$0xff]  ;;  %v2590_v7 = vld [vmem:[#allocation3 + $0x958] sm:$0xff] }
 0x6c4   :  { %2905 = vmatpush1.bf16.msra.mxu0 %v2491_v5  ;;  %3069 = vmatpush1.bf16.msra.mxu1 %v2493_v8  ;;  %v2587_v5 = vld [vmem:[#allocation3 + $0x940] sm:$0xff]  ;;  %v2589_v8 = vld [vmem:[#allocation3 + $0x950] sm:$0xff] }
 0x6c5   :  { %2906 = vmatprep.subr.bf16.mxu0 %v2500_v52  ;;  %3070 = vmatprep.subr.bf16.mxu1 %v2502_v45  ;;  %v2596_v52 = vld [vmem:[#allocation3 + $0x988] sm:$0xff]  ;;  %v2598_v45 = vld [vmem:[#allocation3 + $0x998] sm:$0xff] }
 0x6c8   :  { %2907 = vmatpush1.bf16.msra.mxu0 %v2499_v44  ;;  %3071 = vmatpush1.bf16.msra.mxu1 %v2501_v37  ;;  %v2595_v44 = vld [vmem:[#allocation3 + $0x980] sm:$0xff]  ;;  %v2597_v37 = vld [vmem:[#allocation3 + $0x990] sm:$0xff] }
 0x6c9   :  { %2908 = vmatprep.subr.bf16.mxu0 %v2508_v51  ;;  %3072 = vmatprep.subr.bf16.mxu1 %v2510_v16  ;;  %v2604_v51 = vld [vmem:[#allocation3 + $0x9c8] sm:$0xff]  ;;  %v2606_v16 = vld [vmem:[#allocation3 + $0x9d8] sm:$0xff] }
 0x6cc   :  { %2909 = vmatpush1.bf16.msra.mxu0 %v2507_v18  ;;  %3073 = vmatpush1.bf16.msra.mxu1 %v2509_v26  ;;  %v2603_v18 = vld [vmem:[#allocation3 + $0x9c0] sm:$0xff]  ;;  %v2605_v26 = vld [vmem:[#allocation3 + $0x9d0] sm:$0xff] }
 0x6cd   :  { %2910 = vmatprep.subr.bf16.mxu0 %v2516_v48  ;;  %3074 = vmatprep.subr.bf16.mxu1 %v2518_v42  ;;  %v2612_v48 = vld [vmem:[#allocation3 + $0xa08] sm:$0xff]  ;;  %v2614_v42 = vld [vmem:[#allocation3 + $0xa18] sm:$0xff] }
 0x6d0   :  { %2911 = vmatpush1.bf16.msra.mxu0 %v2515_v11  ;;  %3075 = vmatpush1.bf16.msra.mxu1 %v2517_v39  ;;  %v2611_v11 = vld [vmem:[#allocation3 + $0xa00] sm:$0xff]  ;;  %v2613_v39 = vld [vmem:[#allocation3 + $0xa10] sm:$0xff] }
 0x6d1   :  { %2912 = vmatprep.subr.bf16.mxu0 %v2524_v46  ;;  %3076 = vmatprep.subr.bf16.mxu1 %v2526_v49  ;;  %v2620_v46 = vld [vmem:[#allocation3 + $0xa48] sm:$0xff]  ;;  %v2622_v49 = vld [vmem:[#allocation3 + $0xa58] sm:$0xff] }
 0x6d4   :  { %2913 = vmatpush1.bf16.msra.mxu0 %v2523_v33  ;;  %3077 = vmatpush1.bf16.msra.mxu1 %v2525_v12  ;;  %v2619_v33 = vld [vmem:[#allocation3 + $0xa40] sm:$0xff]  ;;  %v2621_v12 = vld [vmem:[#allocation3 + $0xa50] sm:$0xff] }
 0x6d5   :  { %2914 = vmatprep.subr.bf16.mxu0 %v2532_v50  ;;  %3078 = vmatprep.subr.bf16.mxu1 %v2534_v54  ;;  %v2628_v50 = vld [vmem:[#allocation3 + $0xa88] sm:$0xff]  ;;  %v2630_v54 = vld [vmem:[#allocation3 + $0xa98] sm:$0xff] }
 0x6d8   :  { %2915 = vmatpush1.bf16.msra.mxu0 %v2531_v35  ;;  %3079 = vmatpush1.bf16.msra.mxu1 %v2533_v9  ;;  %v2627_v35 = vld [vmem:[#allocation3 + $0xa80] sm:$0xff]  ;;  %v2629_v9 = vld [vmem:[#allocation3 + $0xa90] sm:$0xff] }
 0x6d9   :  { %2916 = vmatprep.subr.bf16.mxu0 %v2540_v13  ;;  %3080 = vmatprep.subr.bf16.mxu1 %v2542_v58  ;;  %v2636_v13 = vld [vmem:[#allocation3 + $0xac8] sm:$0xff]  ;;  %v2638_v58 = vld [vmem:[#allocation3 + $0xad8] sm:$0xff] }
 0x6dc   :  { %2917 = vmatpush1.bf16.msra.mxu0 %v2539_v59  ;;  %3081 = vmatpush1.bf16.msra.mxu1 %v2541_v17  ;;  %v2635_v59 = vld [vmem:[#allocation3 + $0xac0] sm:$0xff]  ;;  %v2637_v17 = vld [vmem:[#allocation3 + $0xad0] sm:$0xff] }
 0x6dd   :  { %2927 = vmatprep.subr.bf16.mxu0 %v2548_v60  ;;  %3091 = vmatprep.subr.bf16.mxu1 %v2550_v61  ;;  %v2644_v60 = vld [vmem:[#allocation3 + $0xb08] sm:$0xff]  ;;  %v2646_v61 = vld [vmem:[#allocation3 + $0xb18] sm:$0xff] }
 0x6df   :  { %2919 = vmatmul.mubr.bf16.vlgmr.msra.gmra.mrb[16].mxu0 %v4823_v62  ;;  %3083 = vmatmul.mubr.bf16.vlgmr.msra.gmra.mrb[16].mxu1 %v4823_v62 }
 0x6e0   :  { %2928 = vmatpush1.bf16.msra.mxu0 %v2547_v63  ;;  %3092 = vmatpush1.bf16.msra.mxu1 %v2549_v10  ;;  %v2643_v63 = vld [vmem:[#allocation3 + $0xb00] sm:$0xff]  ;;  %v2645_v10 = vld [vmem:[#allocation3 + $0xb10] sm:$0xff] }
 0x6e1   :  { %2929 = vmatprep.subr.bf16.mxu0 %v2556_v53  ;;  %3093 = vmatprep.subr.bf16.mxu1 %v2558_v22  ;;  %v2652_v53 = vld [vmem:[#allocation3 + $0xb48] sm:$0xff]  ;;  %v2654_v22 = vld [vmem:[#allocation3 + $0xb58] sm:$0xff] }
 0x6e2   :  { %2959 = vmatprep.mubr.bf16.mxu0 %v4827_v29  ;;  %3123 = vmatprep.mubr.bf16.mxu1 %v4827_v29 }
 0x6e4   :  { %2930 = vmatpush1.bf16.msra.mxu0 %v2555_v34  ;;  %3094 = vmatpush1.bf16.msra.mxu1 %v2557_v0  ;;  %v2651_v34 = vld [vmem:[#allocation3 + $0xb40] sm:$0xff]  ;;  %v2653_v0 = vld [vmem:[#allocation3 + $0xb50] sm:$0xff] }
 0x6e5   :  { %2931 = vmatprep.subr.bf16.mxu0 %v2564_v1  ;;  %3095 = vmatprep.subr.bf16.mxu1 %v2566_v2  ;;  %v2660_v1 = vld [vmem:[#allocation3 + $0xb88] sm:$0xff]  ;;  %v2662_v2 = vld [vmem:[#allocation3 + $0xb98] sm:$0xff] }
 0x6e8   :  { %2932 = vmatpush1.bf16.msra.mxu0 %v2563_v38  ;;  %3096 = vmatpush1.bf16.msra.mxu1 %v2565_v30  ;;  %v2659_v38 = vld [vmem:[#allocation3 + $0xb80] sm:$0xff]  ;;  %v2661_v30 = vld [vmem:[#allocation3 + $0xb90] sm:$0xff] }
 0x6e9   :  { %2933 = vmatprep.subr.bf16.mxu0 %v2572_v31  ;;  %3097 = vmatprep.subr.bf16.mxu1 %v2574_v32  ;;  %v2668_v31 = vld [vmem:[#allocation3 + $0xbc8] sm:$0xff]  ;;  %v2670_v32 = vld [vmem:[#allocation3 + $0xbd8] sm:$0xff] }
 0x6ec   :  { %2934 = vmatpush1.bf16.msra.mxu0 %v2571_v55  ;;  %3098 = vmatpush1.bf16.msra.mxu1 %v2573_v15  ;;  %v2667_v55 = vld [vmem:[#allocation3 + $0xbc0] sm:$0xff]  ;;  %v2669_v15 = vld [vmem:[#allocation3 + $0xbd0] sm:$0xff] }
 0x6ed   :  { %2935 = vmatprep.subr.bf16.mxu0 %v2580_v19  ;;  %3099 = vmatprep.subr.bf16.mxu1 %v2582_v6  ;;  %v2676_v19 = vld [vmem:[#allocation3 + $0xc08] sm:$0xff]  ;;  %v2678_v6 = vld [vmem:[#allocation3 + $0xc18] sm:$0xff] }
 0x6f0   :  { %2936 = vmatpush1.bf16.msra.mxu0 %v2579_v20  ;;  %3100 = vmatpush1.bf16.msra.mxu1 %v2581_v4  ;;  %v4835_v20 = vpack.c.bf16 %v4794_v36, %v4794_v36  ;;  %v2675_v4 = vld [vmem:[#allocation3 + $0xc00] sm:$0xff] }
 0x6f1   :  { %2937 = vmatprep.subr.bf16.mxu0 %v2588_v47  ;;  %3101 = vmatprep.subr.bf16.mxu1 %v2590_v7  ;;  %v2677_v47 = vld [vmem:[#allocation3 + $0xc10] sm:$0xff]  ;;  %v2684_v7 = vld [vmem:[#allocation3 + $0xc48] sm:$0xff]  ;;  %v2683_v36 = vld [vmem:[#allocation3 + $0xc40] sm:$0xff] }
 0x6f4   :  { %2938 = vmatpush1.bf16.msra.mxu0 %v2587_v5  ;;  %3102 = vmatpush1.bf16.msra.mxu1 %v2589_v8  ;;  %v2686_v5 = vld [vmem:[#allocation3 + $0xc58] sm:$0xff]  ;;  %v4839_v8 = vpack.c.bf16 %v4803_v41, %v4803_v41  ;;  %v2691_v41 = vld [vmem:[#allocation3 + $0xc80] sm:$0xff] }
 0x6f5   :  { %2939 = vmatprep.subr.bf16.mxu0 %v2596_v52  ;;  %3103 = vmatprep.subr.bf16.mxu1 %v2598_v45  ;;  %v2685_v52 = vld [vmem:[#allocation3 + $0xc50] sm:$0xff]  ;;  %v2692_v45 = vld [vmem:[#allocation3 + $0xc88] sm:$0xff] }
 0x6f8   :  { %2940 = vmatpush1.bf16.msra.mxu0 %v2595_v44  ;;  %3104 = vmatpush1.bf16.msra.mxu1 %v2597_v37  ;;  %v2694_v44 = vld [vmem:[#allocation3 + $0xc98] sm:$0xff]  ;;  %v2693_v37 = vld [vmem:[#allocation3 + $0xc90] sm:$0xff] }
 0x6f9   :  { %2941 = vmatprep.subr.bf16.mxu0 %v2604_v51  ;;  %3105 = vmatprep.subr.bf16.mxu1 %v2606_v16  ;;  %v2700_v51 = vld [vmem:[#allocation3 + $0xcc8] sm:$0xff]  ;;  %v2702_v16 = vld [vmem:[#allocation3 + $0xcd8] sm:$0xff] }
 0x6fc   :  { %2942 = vmatpush1.bf16.msra.mxu0 %v2603_v18  ;;  %3106 = vmatpush1.bf16.msra.mxu1 %v2605_v26  ;;  %v2699_v18 = vld [vmem:[#allocation3 + $0xcc0] sm:$0xff]  ;;  %v2701_v26 = vld [vmem:[#allocation3 + $0xcd0] sm:$0xff] }
 0x6fd   :  { %2943 = vmatprep.subr.bf16.mxu0 %v2612_v48  ;;  %3107 = vmatprep.subr.bf16.mxu1 %v2614_v42  ;;  %v2708_v48 = vld [vmem:[#allocation3 + $0xd08] sm:$0xff]  ;;  %v2710_v42 = vld [vmem:[#allocation3 + $0xd18] sm:$0xff] }
 0x700   :  { %2944 = vmatpush1.bf16.msra.mxu0 %v2611_v11  ;;  %3108 = vmatpush1.bf16.msra.mxu1 %v2613_v39  ;;  %v2707_v11 = vld [vmem:[#allocation3 + $0xd00] sm:$0xff]  ;;  %v2709_v39 = vld [vmem:[#allocation3 + $0xd10] sm:$0xff] }
 0x701   :  { %2945 = vmatprep.subr.bf16.mxu0 %v2620_v46  ;;  %3109 = vmatprep.subr.bf16.mxu1 %v2622_v49  ;;  %v2716_v46 = vld [vmem:[#allocation3 + $0xd48] sm:$0xff]  ;;  %v2718_v49 = vld [vmem:[#allocation3 + $0xd58] sm:$0xff] }
 0x704   :  { %2946 = vmatpush1.bf16.msra.mxu0 %v2619_v33  ;;  %3110 = vmatpush1.bf16.msra.mxu1 %v2621_v12  ;;  %v2715_v33 = vld [vmem:[#allocation3 + $0xd40] sm:$0xff]  ;;  %v2717_v12 = vld [vmem:[#allocation3 + $0xd50] sm:$0xff] }
 0x705   :  { %2947 = vmatprep.subr.bf16.mxu0 %v2628_v50  ;;  %3111 = vmatprep.subr.bf16.mxu1 %v2630_v54  ;;  %v2724_v50 = vld [vmem:[#allocation3 + $0xd88] sm:$0xff]  ;;  %v2726_v54 = vld [vmem:[#allocation3 + $0xd98] sm:$0xff] }
 0x708   :  { %2948 = vmatpush1.bf16.msra.mxu0 %v2627_v35  ;;  %3112 = vmatpush1.bf16.msra.mxu1 %v2629_v9  ;;  %v2723_v35 = vld [vmem:[#allocation3 + $0xd80] sm:$0xff]  ;;  %v2725_v9 = vld [vmem:[#allocation3 + $0xd90] sm:$0xff] }
 0x709   :  { %2949 = vmatprep.subr.bf16.mxu0 %v2636_v13  ;;  %3113 = vmatprep.subr.bf16.mxu1 %v2638_v58  ;;  %v2732_v13 = vld [vmem:[#allocation3 + $0xdc8] sm:$0xff]  ;;  %v2734_v58 = vld [vmem:[#allocation3 + $0xdd8] sm:$0xff] }
 0x70c   :  { %2950 = vmatpush1.bf16.msra.mxu0 %v2635_v59  ;;  %3114 = vmatpush1.bf16.msra.mxu1 %v2637_v17  ;;  %v2731_v59 = vld [vmem:[#allocation3 + $0xdc0] sm:$0xff]  ;;  %v2733_v17 = vld [vmem:[#allocation3 + $0xdd0] sm:$0xff] }
 0x70d   :  { %2951 = vmatprep.subr.bf16.mxu0 %v2644_v60  ;;  %3115 = vmatprep.subr.bf16.mxu1 %v2646_v61  ;;  %v2740_v60 = vld [vmem:[#allocation3 + $0xe08] sm:$0xff]  ;;  %v2742_v61 = vld [vmem:[#allocation3 + $0xe18] sm:$0xff] }
 0x710   :  { %2952 = vmatpush1.bf16.msra.mxu0 %v2643_v63  ;;  %3116 = vmatpush1.bf16.msra.mxu1 %v2645_v10  ;;  %v2739_v63 = vld [vmem:[#allocation3 + $0xe00] sm:$0xff]  ;;  %v2741_v10 = vld [vmem:[#allocation3 + $0xe10] sm:$0xff] }
 0x711   :  { %2953 = vmatprep.subr.bf16.mxu0 %v2652_v53  ;;  %3117 = vmatprep.subr.bf16.mxu1 %v2654_v22  ;;  %v2748_v53 = vld [vmem:[#allocation3 + $0xe48] sm:$0xff]  ;;  %v2750_v22 = vld [vmem:[#allocation3 + $0xe58] sm:$0xff] }
 0x714   :  { %2954 = vmatpush1.bf16.msra.mxu0 %v2651_v34  ;;  %3118 = vmatpush1.bf16.msra.mxu1 %v2653_v0  ;;  %v2747_v34 = vld [vmem:[#allocation3 + $0xe40] sm:$0xff]  ;;  %v2749_v0 = vld [vmem:[#allocation3 + $0xe50] sm:$0xff] }
 0x715   :  { %2955 = vmatprep.subr.bf16.mxu0 %v2660_v1  ;;  %3119 = vmatprep.subr.bf16.mxu1 %v2662_v2  ;;  %v2756_v1 = vld [vmem:[#allocation3 + $0xe88] sm:$0xff]  ;;  %v2758_v2 = vld [vmem:[#allocation3 + $0xe98] sm:$0xff] }
 0x718   :  { %2956 = vmatpush1.bf16.msra.mxu0 %v2659_v38  ;;  %3120 = vmatpush1.bf16.msra.mxu1 %v2661_v30  ;;  %v2755_v38 = vld [vmem:[#allocation3 + $0xe80] sm:$0xff]  ;;  %v2757_v30 = vld [vmem:[#allocation3 + $0xe90] sm:$0xff] }
 0x719   :  { %2957 = vmatprep.subr.bf16.mxu0 %v2668_v31  ;;  %3121 = vmatprep.subr.bf16.mxu1 %v2670_v32  ;;  %v2764_v31 = vld [vmem:[#allocation3 + $0xec8] sm:$0xff]  ;;  %v2766_v32 = vld [vmem:[#allocation3 + $0xed8] sm:$0xff] }
 0x71c   :  { %2958 = vmatpush1.bf16.msra.mxu0 %v2667_v55  ;;  %3122 = vmatpush1.bf16.msra.mxu1 %v2669_v15  ;;  %v2763_v55 = vld [vmem:[#allocation3 + $0xec0] sm:$0xff]  ;;  %v2765_v15 = vld [vmem:[#allocation3 + $0xed0] sm:$0xff] }
 0x71d   :  { %2968 = vmatprep.subr.bf16.mxu0 %v2676_v19  ;;  %3132 = vmatprep.subr.bf16.mxu1 %v2678_v6  ;;  %v2772_v19 = vld [vmem:[#allocation3 + $0xf08] sm:$0xff]  ;;  %v2774_v6 = vld [vmem:[#allocation3 + $0xf18] sm:$0xff] }
 0x71f   :  { %2960 = vmatmul.mubr.bf16.vlgmr.msra.gmra.mrb[16].mxu0 %v4835_v20  ;;  %3124 = vmatmul.mubr.bf16.vlgmr.msra.gmra.mrb[16].mxu1 %v4835_v20 }
 0x720   :  { %2969 = vmatpush1.bf16.msra.mxu0 %v2675_v4  ;;  %3133 = vmatpush1.bf16.msra.mxu1 %v2677_v47  ;;  %v2771_v4 = vld [vmem:[#allocation3 + $0xf00] sm:$0xff]  ;;  %v2773_v47 = vld [vmem:[#allocation3 + $0xf10] sm:$0xff] }
 0x721   :  { %2970 = vmatprep.subr.bf16.mxu0 %v2684_v7  ;;  %3134 = vmatprep.subr.bf16.mxu1 %v2686_v5  ;;  %v2780_v7 = vld [vmem:[#allocation3 + $0xf48] sm:$0xff]  ;;  %v2782_v5 = vld [vmem:[#allocation3 + $0xf58] sm:$0xff] }
 0x722   :  { %3000 = vmatprep.mubr.bf16.mxu0 %v4839_v8  ;;  %3164 = vmatprep.mubr.bf16.mxu1 %v4839_v8 }
 0x724   :  { %2971 = vmatpush1.bf16.msra.mxu0 %v2683_v36  ;;  %3135 = vmatpush1.bf16.msra.mxu1 %v2685_v52  ;;  %v2779_v36 = vld [vmem:[#allocation3 + $0xf40] sm:$0xff]  ;;  %v2781_v52 = vld [vmem:[#allocation3 + $0xf50] sm:$0xff] }
 0x725   :  { %2972 = vmatprep.subr.bf16.mxu0 %v2692_v45  ;;  %3136 = vmatprep.subr.bf16.mxu1 %v2694_v44  ;;  %v2788_v45 = vld [vmem:[#allocation3 + $0xf88] sm:$0xff]  ;;  %v2790_v44 = vld [vmem:[#allocation3 + $0xf98] sm:$0xff] }
 0x728   :  { %2973 = vmatpush1.bf16.msra.mxu0 %v2691_v41  ;;  %3137 = vmatpush1.bf16.msra.mxu1 %v2693_v37  ;;  %v2787_v41 = vld [vmem:[#allocation3 + $0xf80] sm:$0xff]  ;;  %v2789_v37 = vld [vmem:[#allocation3 + $0xf90] sm:$0xff] }
 0x729   :  { %2974 = vmatprep.subr.bf16.mxu0 %v2700_v51  ;;  %3138 = vmatprep.subr.bf16.mxu1 %v2702_v16  ;;  %v2796_v51 = vld [vmem:[#allocation3 + $0xfc8] sm:$0xff]  ;;  %v2798_v16 = vld [vmem:[#allocation3 + $0xfd8] sm:$0xff] }
 0x72c   :  { %2975 = vmatpush1.bf16.msra.mxu0 %v2699_v18  ;;  %3139 = vmatpush1.bf16.msra.mxu1 %v2701_v26  ;;  %v2795_v18 = vld [vmem:[#allocation3 + $0xfc0] sm:$0xff]  ;;  %v2797_v26 = vld [vmem:[#allocation3 + $0xfd0] sm:$0xff] }
 0x72d   :  { %2976 = vmatprep.subr.bf16.mxu0 %v2708_v48  ;;  %3140 = vmatprep.subr.bf16.mxu1 %v2710_v42  ;;  %v2296_v48 = vld [vmem:[#allocation3 + $0x28] sm:$0xff]  ;;  %v2298_v42 = vld [vmem:[#allocation3 + $0x38] sm:$0xff] }
 0x730   :  { %2977 = vmatpush1.bf16.msra.mxu0 %v2707_v11  ;;  %3141 = vmatpush1.bf16.msra.mxu1 %v2709_v39  ;;  %v4847_v11 = vpack.c.bf16 %v4800_v40, %v4800_v40  ;;  %v2295_v39 = vld [vmem:[#allocation3 + $0x20] sm:$0xff]  ;;  %v2312_v40 = vld [vmem:[#allocation3 + $0xa8] sm:$0xff] }
 0x731   :  { %2978 = vmatprep.subr.bf16.mxu0 %v2716_v46  ;;  %3142 = vmatprep.subr.bf16.mxu1 %v2718_v49  ;;  %v2297_v46 = vld [vmem:[#allocation3 + $0x30] sm:$0xff]  ;;  %v2304_v49 = vld [vmem:[#allocation3 + $0x68] sm:$0xff] }
 0x734   :  { %2979 = vmatpush1.bf16.msra.mxu0 %v2715_v33  ;;  %3143 = vmatpush1.bf16.msra.mxu1 %v2717_v12  ;;  %v2306_v33 = vld [vmem:[#allocation3 + $0x78] sm:$0xff]  ;;  %v2303_v12 = vld [vmem:[#allocation3 + $0x60] sm:$0xff] }
 0x735   :  { %2980 = vmatprep.subr.bf16.mxu0 %v2724_v50  ;;  %3144 = vmatprep.subr.bf16.mxu1 %v2726_v54  ;;  %v2305_v50 = vld [vmem:[#allocation3 + $0x70] sm:$0xff]  ;;  %v2314_v54 = vld [vmem:[#allocation3 + $0xb8] sm:$0xff] }
 0x738   :  { %2981 = vmatpush1.bf16.msra.mxu0 %v2723_v35  ;;  %3145 = vmatpush1.bf16.msra.mxu1 %v2725_v9  ;;  %v2311_v35 = vld [vmem:[#allocation3 + $0xa0] sm:$0xff]  ;;  %v2313_v9 = vld [vmem:[#allocation3 + $0xb0] sm:$0xff] }
 0x739   :  { %2982 = vmatprep.subr.bf16.mxu0 %v2732_v13  ;;  %3146 = vmatprep.subr.bf16.mxu1 %v2734_v58  ;;  %v2320_v13 = vld [vmem:[#allocation3 + $0xe8] sm:$0xff]  ;;  %v2322_v58 = vld [vmem:[#allocation3 + $0xf8] sm:$0xff] }
 0x73c   :  { %2983 = vmatpush1.bf16.msra.mxu0 %v2731_v59  ;;  %3147 = vmatpush1.bf16.msra.mxu1 %v2733_v17  ;;  %v2319_v59 = vld [vmem:[#allocation3 + $0xe0] sm:$0xff]  ;;  %v2321_v17 = vld [vmem:[#allocation3 + $0xf0] sm:$0xff] }
 0x73d   :  { %2984 = vmatprep.subr.bf16.mxu0 %v2740_v60  ;;  %3148 = vmatprep.subr.bf16.mxu1 %v2742_v61  ;;  %v2328_v60 = vld [vmem:[#allocation3 + $0x128] sm:$0xff]  ;;  %v2330_v61 = vld [vmem:[#allocation3 + $0x138] sm:$0xff] }
 0x740   :  { %2985 = vmatpush1.bf16.msra.mxu0 %v2739_v63  ;;  %3149 = vmatpush1.bf16.msra.mxu1 %v2741_v10  ;;  %v2329_v63 = vld [vmem:[#allocation3 + $0x130] sm:$0xff]  ;;  %v2336_v10 = vld [vmem:[#allocation3 + $0x168] sm:$0xff] }
 0x741   :  { %2986 = vmatprep.subr.bf16.mxu0 %v2748_v53  ;;  %3150 = vmatprep.subr.bf16.mxu1 %v2750_v22  ;;  %v2338_v53 = vld [vmem:[#allocation3 + $0x178] sm:$0xff]  ;;  %v2335_v22 = vld [vmem:[#allocation3 + $0x160] sm:$0xff] }
 0x744   :  { %2987 = vmatpush1.bf16.msra.mxu0 %v2747_v34  ;;  %3151 = vmatpush1.bf16.msra.mxu1 %v2749_v0  ;;  %v2337_v34 = vld [vmem:[#allocation3 + $0x170] sm:$0xff]  ;;  %v2344_v0 = vld [vmem:[#allocation3 + $0x1a8] sm:$0xff] }
 0x745   :  { %2988 = vmatprep.subr.bf16.mxu0 %v2756_v1  ;;  %3152 = vmatprep.subr.bf16.mxu1 %v2758_v2  ;;  %v2346_v1 = vld [vmem:[#allocation3 + $0x1b8] sm:$0xff]  ;;  %v2343_v2 = vld [vmem:[#allocation3 + $0x1a0] sm:$0xff] }
 0x748   :  { %2989 = vmatpush1.bf16.msra.mxu0 %v2755_v38  ;;  %3153 = vmatpush1.bf16.msra.mxu1 %v2757_v30  ;;  %v2345_v38 = vld [vmem:[#allocation3 + $0x1b0] sm:$0xff]  ;;  %v2352_v30 = vld [vmem:[#allocation3 + $0x1e8] sm:$0xff] }
 0x749   :  { %2990 = vmatprep.subr.bf16.mxu0 %v2764_v31  ;;  %3154 = vmatprep.subr.bf16.mxu1 %v2766_v32  ;;  %v2354_v31 = vld [vmem:[#allocation3 + $0x1f8] sm:$0xff]  ;;  %v2351_v32 = vld [vmem:[#allocation3 + $0x1e0] sm:$0xff] }
 0x74c   :  { %2991 = vmatpush1.bf16.msra.mxu0 %v2763_v55  ;;  %3155 = vmatpush1.bf16.msra.mxu1 %v2765_v15  ;;  %v2353_v55 = vld [vmem:[#allocation3 + $0x1f0] sm:$0xff]  ;;  %v2360_v15 = vld [vmem:[#allocation3 + $0x228] sm:$0xff] }
 0x74d   :  { %2992 = vmatprep.subr.bf16.mxu0 %v2772_v19  ;;  %3156 = vmatprep.subr.bf16.mxu1 %v2774_v6  ;;  %v2362_v19 = vld [vmem:[#allocation3 + $0x238] sm:$0xff]  ;;  %v2359_v6 = vld [vmem:[#allocation3 + $0x220] sm:$0xff] }
 0x750   :  { %2993 = vmatpush1.bf16.msra.mxu0 %v2771_v4  ;;  %3157 = vmatpush1.bf16.msra.mxu1 %v2773_v47  ;;  %v2361_v4 = vld [vmem:[#allocation3 + $0x230] sm:$0xff]  ;;  %v2368_v47 = vld [vmem:[#allocation3 + $0x268] sm:$0xff] }
 0x751   :  { %2994 = vmatprep.subr.bf16.mxu0 %v2780_v7  ;;  %3158 = vmatprep.subr.bf16.mxu1 %v2782_v5  ;;  %v2370_v7 = vld [vmem:[#allocation3 + $0x278] sm:$0xff]  ;;  %v2367_v5 = vld [vmem:[#allocation3 + $0x260] sm:$0xff] }
 0x754   :  { %2995 = vmatpush1.bf16.msra.mxu0 %v2779_v36  ;;  %3159 = vmatpush1.bf16.msra.mxu1 %v2781_v52  ;;  %v2369_v36 = vld [vmem:[#allocation3 + $0x270] sm:$0xff]  ;;  %v2376_v52 = vld [vmem:[#allocation3 + $0x2a8] sm:$0xff] }
 0x755   :  { %2996 = vmatprep.subr.bf16.mxu0 %v2788_v45  ;;  %3160 = vmatprep.subr.bf16.mxu1 %v2790_v44  ;;  %v2378_v45 = vld [vmem:[#allocation3 + $0x2b8] sm:$0xff]  ;;  %v2375_v44 = vld [vmem:[#allocation3 + $0x2a0] sm:$0xff] }
 0x758   :  { %2997 = vmatpush1.bf16.msra.mxu0 %v2787_v41  ;;  %3161 = vmatpush1.bf16.msra.mxu1 %v2789_v37  ;;  %v2377_v41 = vld [vmem:[#allocation3 + $0x2b0] sm:$0xff]  ;;  %v2384_v37 = vld [vmem:[#allocation3 + $0x2e8] sm:$0xff] }
 0x759   :  { %2998 = vmatprep.subr.bf16.mxu0 %v2796_v51  ;;  %3162 = vmatprep.subr.bf16.mxu1 %v2798_v16  ;;  %v2386_v51 = vld [vmem:[#allocation3 + $0x2f8] sm:$0xff]  ;;  %v2383_v16 = vld [vmem:[#allocation3 + $0x2e0] sm:$0xff] }
 0x75c   :  { %2999 = vmatpush1.bf16.msra.mxu0 %v2795_v18  ;;  %3163 = vmatpush1.bf16.msra.mxu1 %v2797_v26  ;;  %v2385_v18 = vld [vmem:[#allocation3 + $0x2f0] sm:$0xff]  ;;  %v2392_v26 = vld [vmem:[#allocation3 + $0x328] sm:$0xff] }
 0x75d   :  { %3173 = vmatprep.subr.bf16.mxu0 %v2296_v48  ;;  %3337 = vmatprep.subr.bf16.mxu1 %v2298_v42  ;;  %v2394_v48 = vld [vmem:[#allocation3 + $0x338] sm:$0xff]  ;;  %v2391_v42 = vld [vmem:[#allocation3 + $0x320] sm:$0xff] }
 0x75f   :  { %3001 = vmatmul.mubr.bf16.vlgmr.msra.gmra.mrb[16].mxu0 %v4847_v11  ;;  %3165 = vmatmul.mubr.bf16.vlgmr.msra.gmra.mrb[16].mxu1 %v4847_v11 }
 0x760   :  { %3174 = vmatpush1.bf16.msra.mxu0 %v2295_v39  ;;  %3338 = vmatpush1.bf16.msra.mxu1 %v2297_v46  ;;  %v2393_v39 = vld [vmem:[#allocation3 + $0x330] sm:$0xff]  ;;  %v2400_v46 = vld [vmem:[#allocation3 + $0x368] sm:$0xff] }
 0x761   :  { %3175 = vmatprep.subr.bf16.mxu0 %v2304_v49  ;;  %3339 = vmatprep.subr.bf16.mxu1 %v2306_v33  ;;  %v2402_v49 = vld [vmem:[#allocation3 + $0x378] sm:$0xff]  ;;  %v2399_v33 = vld [vmem:[#allocation3 + $0x360] sm:$0xff] }
 0x762   :  { %3205 = vmatprep.mubr.bf16.mxu0 %v4805_v57  ;;  %3369 = vmatprep.mubr.bf16.mxu1 %v4805_v57  ;;  %v2327_v57 = vld [vmem:[#allocation3 + $0x120] sm:$0xff] }
 0x764   :  { %3176 = vmatpush1.bf16.msra.mxu0 %v2303_v12  ;;  %3340 = vmatpush1.bf16.msra.mxu1 %v2305_v50  ;;  %v2401_v12 = vld [vmem:[#allocation3 + $0x370] sm:$0xff]  ;;  %v2408_v50 = vld [vmem:[#allocation3 + $0x3a8] sm:$0xff] }
 0x765   :  { %3177 = vmatprep.subr.bf16.mxu0 %v2312_v40  ;;  %3341 = vmatprep.subr.bf16.mxu1 %v2314_v54  ;;  %v2410_v40 = vld [vmem:[#allocation3 + $0x3b8] sm:$0xff]  ;;  %v2407_v54 = vld [vmem:[#allocation3 + $0x3a0] sm:$0xff] }
 0x768   :  { %3178 = vmatpush1.bf16.msra.mxu0 %v2311_v35  ;;  %3342 = vmatpush1.bf16.msra.mxu1 %v2313_v9  ;;  %v2409_v35 = vld [vmem:[#allocation3 + $0x3b0] sm:$0xff]  ;;  %v2416_v9 = vld [vmem:[#allocation3 + $0x3e8] sm:$0xff] }
 0x769   :  { %3179 = vmatprep.subr.bf16.mxu0 %v2320_v13  ;;  %3343 = vmatprep.subr.bf16.mxu1 %v2322_v58  ;;  %v2418_v13 = vld [vmem:[#allocation3 + $0x3f8] sm:$0xff]  ;;  %v2415_v58 = vld [vmem:[#allocation3 + $0x3e0] sm:$0xff] }
 0x76c   :  { %3180 = vmatpush1.bf16.msra.mxu0 %v2319_v59  ;;  %3344 = vmatpush1.bf16.msra.mxu1 %v2321_v17  ;;  %v2417_v59 = vld [vmem:[#allocation3 + $0x3f0] sm:$0xff]  ;;  %v2424_v17 = vld [vmem:[#allocation3 + $0x428] sm:$0xff] }
 0x76d   :  { %3181 = vmatprep.subr.bf16.mxu0 %v2328_v60  ;;  %3345 = vmatprep.subr.bf16.mxu1 %v2330_v61  ;;  %v2426_v60 = vld [vmem:[#allocation3 + $0x438] sm:$0xff]  ;;  %v2423_v61 = vld [vmem:[#allocation3 + $0x420] sm:$0xff] }
 0x770   :  { %3182 = vmatpush1.bf16.msra.mxu0 %v2327_v57  ;;  %3346 = vmatpush1.bf16.msra.mxu1 %v2329_v63  ;;  %v2425_v57 = vld [vmem:[#allocation3 + $0x430] sm:$0xff]  ;;  %v2432_v63 = vld [vmem:[#allocation3 + $0x468] sm:$0xff] }
 0x771   :  { %3183 = vmatprep.subr.bf16.mxu0 %v2336_v10  ;;  %3347 = vmatprep.subr.bf16.mxu1 %v2338_v53  ;;  %v2434_v10 = vld [vmem:[#allocation3 + $0x478] sm:$0xff]  ;;  %v2431_v53 = vld [vmem:[#allocation3 + $0x460] sm:$0xff] }
 0x774   :  { %3184 = vmatpush1.bf16.msra.mxu0 %v2335_v22  ;;  %3348 = vmatpush1.bf16.msra.mxu1 %v2337_v34  ;;  %v2433_v22 = vld [vmem:[#allocation3 + $0x470] sm:$0xff]  ;;  %v2440_v34 = vld [vmem:[#allocation3 + $0x4a8] sm:$0xff] }
 0x775   :  { %3185 = vmatprep.subr.bf16.mxu0 %v2344_v0  ;;  %3349 = vmatprep.subr.bf16.mxu1 %v2346_v1  ;;  %v2442_v0 = vld [vmem:[#allocation3 + $0x4b8] sm:$0xff]  ;;  %v2439_v1 = vld [vmem:[#allocation3 + $0x4a0] sm:$0xff] }
 0x778   :  { %3186 = vmatpush1.bf16.msra.mxu0 %v2343_v2  ;;  %3350 = vmatpush1.bf16.msra.mxu1 %v2345_v38  ;;  %v2441_v2 = vld [vmem:[#allocation3 + $0x4b0] sm:$0xff]  ;;  %v2448_v38 = vld [vmem:[#allocation3 + $0x4e8] sm:$0xff] }
 0x779   :  { %3187 = vmatprep.subr.bf16.mxu0 %v2352_v30  ;;  %3351 = vmatprep.subr.bf16.mxu1 %v2354_v31  ;;  %v2447_v30 = vld [vmem:[#allocation3 + $0x4e0] sm:$0xff]  ;;  %v2449_v31 = vld [vmem:[#allocation3 + $0x4f0] sm:$0xff] }
 0x77c   :  { %3188 = vmatpush1.bf16.msra.mxu0 %v2351_v32  ;;  %3352 = vmatpush1.bf16.msra.mxu1 %v2353_v55  ;;  %v2456_v32 = vld [vmem:[#allocation3 + $0x528] sm:$0xff]  ;;  %v2458_v55 = vld [vmem:[#allocation3 + $0x538] sm:$0xff] }
 0x77d   :  { %3189 = vmatprep.subr.bf16.mxu0 %v2360_v15  ;;  %3353 = vmatprep.subr.bf16.mxu1 %v2362_v19  ;;  %v2457_v15 = vld [vmem:[#allocation3 + $0x530] sm:$0xff]  ;;  %v2464_v19 = vld [vmem:[#allocation3 + $0x568] sm:$0xff] }
 0x780   :  { %3190 = vmatpush1.bf16.msra.mxu0 %v2359_v6  ;;  %3354 = vmatpush1.bf16.msra.mxu1 %v2361_v4  ;;  %v2466_v6 = vld [vmem:[#allocation3 + $0x578] sm:$0xff]  ;;  %v2463_v4 = vld [vmem:[#allocation3 + $0x560] sm:$0xff] }
 0x781   :  { %3191 = vmatprep.subr.bf16.mxu0 %v2368_v47  ;;  %3355 = vmatprep.subr.bf16.mxu1 %v2370_v7  ;;  %v2465_v47 = vld [vmem:[#allocation3 + $0x570] sm:$0xff]  ;;  %v2472_v7 = vld [vmem:[#allocation3 + $0x5a8] sm:$0xff] }
 0x784   :  { %3192 = vmatpush1.bf16.msra.mxu0 %v2367_v5  ;;  %3356 = vmatpush1.bf16.msra.mxu1 %v2369_v36  ;;  %v2474_v5 = vld [vmem:[#allocation3 + $0x5b8] sm:$0xff]  ;;  %v2471_v36 = vld [vmem:[#allocation3 + $0x5a0] sm:$0xff] }
 0x785   :  { %3193 = vmatprep.subr.bf16.mxu0 %v2376_v52  ;;  %3357 = vmatprep.subr.bf16.mxu1 %v2378_v45  ;;  %v2473_v52 = vld [vmem:[#allocation3 + $0x5b0] sm:$0xff]  ;;  %v2480_v45 = vld [vmem:[#allocation3 + $0x5e8] sm:$0xff] }
 0x788   :  { %3194 = vmatpush1.bf16.msra.mxu0 %v2375_v44  ;;  %3358 = vmatpush1.bf16.msra.mxu1 %v2377_v41  ;;  %v2482_v44 = vld [vmem:[#allocation3 + $0x5f8] sm:$0xff]  ;;  %v2479_v41 = vld [vmem:[#allocation3 + $0x5e0] sm:$0xff] }
 0x789   :  { %3195 = vmatprep.subr.bf16.mxu0 %v2384_v37  ;;  %3359 = vmatprep.subr.bf16.mxu1 %v2386_v51  ;;  %v2481_v37 = vld [vmem:[#allocation3 + $0x5f0] sm:$0xff]  ;;  %v2488_v51 = vld [vmem:[#allocation3 + $0x628] sm:$0xff] }
 0x78c   :  { %3196 = vmatpush1.bf16.msra.mxu0 %v2383_v16  ;;  %3360 = vmatpush1.bf16.msra.mxu1 %v2385_v18  ;;  %v2490_v16 = vld [vmem:[#allocation3 + $0x638] sm:$0xff]  ;;  %v2487_v18 = vld [vmem:[#allocation3 + $0x620] sm:$0xff] }
 0x78d   :  { %3197 = vmatprep.subr.bf16.mxu0 %v2392_v26  ;;  %3361 = vmatprep.subr.bf16.mxu1 %v2394_v48  ;;  %v2489_v26 = vld [vmem:[#allocation3 + $0x630] sm:$0xff]  ;;  %v2496_v48 = vld [vmem:[#allocation3 + $0x668] sm:$0xff] }
 0x790   :  { %3198 = vmatpush1.bf16.msra.mxu0 %v2391_v42  ;;  %3362 = vmatpush1.bf16.msra.mxu1 %v2393_v39  ;;  %v2498_v42 = vld [vmem:[#allocation3 + $0x678] sm:$0xff]  ;;  %v2495_v39 = vld [vmem:[#allocation3 + $0x660] sm:$0xff] }
 0x791   :  { %3199 = vmatprep.subr.bf16.mxu0 %v2400_v46  ;;  %3363 = vmatprep.subr.bf16.mxu1 %v2402_v49  ;;  %v2497_v46 = vld [vmem:[#allocation3 + $0x670] sm:$0xff]  ;;  %v2504_v49 = vld [vmem:[#allocation3 + $0x6a8] sm:$0xff] }
 0x794   :  { %3200 = vmatpush1.bf16.msra.mxu0 %v2399_v33  ;;  %3364 = vmatpush1.bf16.msra.mxu1 %v2401_v12  ;;  %v2506_v33 = vld [vmem:[#allocation3 + $0x6b8] sm:$0xff]  ;;  %v2503_v12 = vld [vmem:[#allocation3 + $0x6a0] sm:$0xff] }
 0x795   :  { %3201 = vmatprep.subr.bf16.mxu0 %v2408_v50  ;;  %3365 = vmatprep.subr.bf16.mxu1 %v2410_v40  ;;  %v2505_v50 = vld [vmem:[#allocation3 + $0x6b0] sm:$0xff]  ;;  %v2512_v40 = vld [vmem:[#allocation3 + $0x6e8] sm:$0xff] }
 0x798   :  { %3202 = vmatpush1.bf16.msra.mxu0 %v2407_v54  ;;  %3366 = vmatpush1.bf16.msra.mxu1 %v2409_v35  ;;  %v2514_v54 = vld [vmem:[#allocation3 + $0x6f8] sm:$0xff]  ;;  %v2511_v35 = vld [vmem:[#allocation3 + $0x6e0] sm:$0xff] }
 0x799   :  { %3203 = vmatprep.subr.bf16.mxu0 %v2416_v9  ;;  %3367 = vmatprep.subr.bf16.mxu1 %v2418_v13  ;;  %v2513_v9 = vld [vmem:[#allocation3 + $0x6f0] sm:$0xff]  ;;  %v2520_v13 = vld [vmem:[#allocation3 + $0x728] sm:$0xff] }
 0x79c   :  { %3204 = vmatpush1.bf16.msra.mxu0 %v2415_v58  ;;  %3368 = vmatpush1.bf16.msra.mxu1 %v2417_v59  ;;  %v2522_v58 = vld [vmem:[#allocation3 + $0x738] sm:$0xff]  ;;  %v2519_v59 = vld [vmem:[#allocation3 + $0x720] sm:$0xff] }
 0x79d   :  { %3214 = vmatprep.subr.bf16.mxu0 %v2424_v17  ;;  %3378 = vmatprep.subr.bf16.mxu1 %v2426_v60  ;;  %v2521_v17 = vld [vmem:[#allocation3 + $0x730] sm:$0xff]  ;;  %v2528_v60 = vld [vmem:[#allocation3 + $0x768] sm:$0xff] }
 0x79f   :  { %3206 = vmatmul.mubr.bf16.vlgmr.msra.gmra.mrb[20].mxu0 %v4811_v43  ;;  %3370 = vmatmul.mubr.bf16.vlgmr.msra.gmra.mrb[20].mxu1 %v4811_v43  ;;  %v2450_v43 = vld [vmem:[#allocation3 + $0x4f8] sm:$0xff] }
 0x7a0   :  { %3215 = vmatpush1.bf16.msra.mxu0 %v2423_v61  ;;  %3379 = vmatpush1.bf16.msra.mxu1 %v2425_v57  ;;  %v2530_v61 = vld [vmem:[#allocation3 + $0x778] sm:$0xff]  ;;  %v2527_v57 = vld [vmem:[#allocation3 + $0x760] sm:$0xff] }
 0x7a1   :  { %3216 = vmatprep.subr.bf16.mxu0 %v2432_v63  ;;  %3380 = vmatprep.subr.bf16.mxu1 %v2434_v10  ;;  %v2529_v63 = vld [vmem:[#allocation3 + $0x770] sm:$0xff]  ;;  %v2536_v10 = vld [vmem:[#allocation3 + $0x7a8] sm:$0xff] }
 0x7a2   :  { %3246 = vmatprep.mubr.bf16.mxu0 %v4815_v3  ;;  %3410 = vmatprep.mubr.bf16.mxu1 %v4815_v3  ;;  %v2455_v3 = vld [vmem:[#allocation3 + $0x520] sm:$0xff] }
 0x7a4   :  { %3217 = vmatpush1.bf16.msra.mxu0 %v2431_v53  ;;  %3381 = vmatpush1.bf16.msra.mxu1 %v2433_v22  ;;  %v2538_v53 = vld [vmem:[#allocation3 + $0x7b8] sm:$0xff]  ;;  %v2535_v22 = vld [vmem:[#allocation3 + $0x7a0] sm:$0xff] }
 0x7a5   :  { %3218 = vmatprep.subr.bf16.mxu0 %v2440_v34  ;;  %3382 = vmatprep.subr.bf16.mxu1 %v2442_v0  ;;  %v2537_v34 = vld [vmem:[#allocation3 + $0x7b0] sm:$0xff]  ;;  %v2544_v0 = vld [vmem:[#allocation3 + $0x7e8] sm:$0xff] }
 0x7a8   :  { %3219 = vmatpush1.bf16.msra.mxu0 %v2439_v1  ;;  %3383 = vmatpush1.bf16.msra.mxu1 %v2441_v2  ;;  %v2546_v1 = vld [vmem:[#allocation3 + $0x7f8] sm:$0xff]  ;;  %v2543_v2 = vld [vmem:[#allocation3 + $0x7e0] sm:$0xff] }
 0x7a9   :  { %3220 = vmatprep.subr.bf16.mxu0 %v2448_v38  ;;  %3384 = vmatprep.subr.bf16.mxu1 %v2450_v43  ;;  %v2545_v38 = vld [vmem:[#allocation3 + $0x7f0] sm:$0xff]  ;;  %v2552_v43 = vld [vmem:[#allocation3 + $0x828] sm:$0xff] }
 0x7ac   :  { %3221 = vmatpush1.bf16.msra.mxu0 %v2447_v30  ;;  %3385 = vmatpush1.bf16.msra.mxu1 %v2449_v31  ;;  %v2554_v30 = vld [vmem:[#allocation3 + $0x838] sm:$0xff]  ;;  %v2551_v31 = vld [vmem:[#allocation3 + $0x820] sm:$0xff] }
 0x7ad   :  { %3222 = vmatprep.subr.bf16.mxu0 %v2456_v32  ;;  %3386 = vmatprep.subr.bf16.mxu1 %v2458_v55  ;;  %v2553_v32 = vld [vmem:[#allocation3 + $0x830] sm:$0xff]  ;;  %v2560_v55 = vld [vmem:[#allocation3 + $0x868] sm:$0xff] }
 0x7b0   :  { %3223 = vmatpush1.bf16.msra.mxu0 %v2455_v3  ;;  %3387 = vmatpush1.bf16.msra.mxu1 %v2457_v15  ;;  %v2562_v3 = vld [vmem:[#allocation3 + $0x878] sm:$0xff]  ;;  %v2559_v15 = vld [vmem:[#allocation3 + $0x860] sm:$0xff] }
 0x7b1   :  { %3224 = vmatprep.subr.bf16.mxu0 %v2464_v19  ;;  %3388 = vmatprep.subr.bf16.mxu1 %v2466_v6  ;;  %v2561_v19 = vld [vmem:[#allocation3 + $0x870] sm:$0xff]  ;;  %v2568_v6 = vld [vmem:[#allocation3 + $0x8a8] sm:$0xff] }
 0x7b4   :  { %3225 = vmatpush1.bf16.msra.mxu0 %v2463_v4  ;;  %3389 = vmatpush1.bf16.msra.mxu1 %v2465_v47  ;;  %v2570_v4 = vld [vmem:[#allocation3 + $0x8b8] sm:$0xff]  ;;  %v2567_v47 = vld [vmem:[#allocation3 + $0x8a0] sm:$0xff] }
 0x7b5   :  { %3226 = vmatprep.subr.bf16.mxu0 %v2472_v7  ;;  %3390 = vmatprep.subr.bf16.mxu1 %v2474_v5  ;;  %v2569_v7 = vld [vmem:[#allocation3 + $0x8b0] sm:$0xff]  ;;  %v2576_v5 = vld [vmem:[#allocation3 + $0x8e8] sm:$0xff] }
 0x7b8   :  { %3227 = vmatpush1.bf16.msra.mxu0 %v2471_v36  ;;  %3391 = vmatpush1.bf16.msra.mxu1 %v2473_v52  ;;  %v2575_v36 = vld [vmem:[#allocation3 + $0x8e0] sm:$0xff]  ;;  %v2577_v52 = vld [vmem:[#allocation3 + $0x8f0] sm:$0xff] }
 0x7b9   :  { %3228 = vmatprep.subr.bf16.mxu0 %v2480_v45  ;;  %3392 = vmatprep.subr.bf16.mxu1 %v2482_v44  ;;  %v2584_v45 = vld [vmem:[#allocation3 + $0x928] sm:$0xff]  ;;  %v2586_v44 = vld [vmem:[#allocation3 + $0x938] sm:$0xff] }
 0x7bc   :  { %3229 = vmatpush1.bf16.msra.mxu0 %v2479_v41  ;;  %3393 = vmatpush1.bf16.msra.mxu1 %v2481_v37  ;;  %v2585_v41 = vld [vmem:[#allocation3 + $0x930] sm:$0xff]  ;;  %v2592_v37 = vld [vmem:[#allocation3 + $0x968] sm:$0xff] }
 0x7bd   :  { %3230 = vmatprep.subr.bf16.mxu0 %v2488_v51  ;;  %3394 = vmatprep.subr.bf16.mxu1 %v2490_v16  ;;  %v2594_v51 = vld [vmem:[#allocation3 + $0x978] sm:$0xff]  ;;  %v2591_v16 = vld [vmem:[#allocation3 + $0x960] sm:$0xff] }
 0x7c0   :  { %3231 = vmatpush1.bf16.msra.mxu0 %v2487_v18  ;;  %3395 = vmatpush1.bf16.msra.mxu1 %v2489_v26  ;;  %v2593_v18 = vld [vmem:[#allocation3 + $0x970] sm:$0xff]  ;;  %v2600_v26 = vld [vmem:[#allocation3 + $0x9a8] sm:$0xff] }
 0x7c1   :  { %3232 = vmatprep.subr.bf16.mxu0 %v2496_v48  ;;  %3396 = vmatprep.subr.bf16.mxu1 %v2498_v42  ;;  %v2602_v48 = vld [vmem:[#allocation3 + $0x9b8] sm:$0xff]  ;;  %v2599_v42 = vld [vmem:[#allocation3 + $0x9a0] sm:$0xff] }
 0x7c4   :  { %3233 = vmatpush1.bf16.msra.mxu0 %v2495_v39  ;;  %3397 = vmatpush1.bf16.msra.mxu1 %v2497_v46  ;;  %v2601_v39 = vld [vmem:[#allocation3 + $0x9b0] sm:$0xff]  ;;  %v2608_v46 = vld [vmem:[#allocation3 + $0x9e8] sm:$0xff] }
 0x7c5   :  { %3234 = vmatprep.subr.bf16.mxu0 %v2504_v49  ;;  %3398 = vmatprep.subr.bf16.mxu1 %v2506_v33  ;;  %v2610_v49 = vld [vmem:[#allocation3 + $0x9f8] sm:$0xff]  ;;  %v2607_v33 = vld [vmem:[#allocation3 + $0x9e0] sm:$0xff] }
 0x7c8   :  { %3235 = vmatpush1.bf16.msra.mxu0 %v2503_v12  ;;  %3399 = vmatpush1.bf16.msra.mxu1 %v2505_v50  ;;  %v2609_v12 = vld [vmem:[#allocation3 + $0x9f0] sm:$0xff]  ;;  %v2616_v50 = vld [vmem:[#allocation3 + $0xa28] sm:$0xff] }
 0x7c9   :  { %3236 = vmatprep.subr.bf16.mxu0 %v2512_v40  ;;  %3400 = vmatprep.subr.bf16.mxu1 %v2514_v54  ;;  %v2618_v40 = vld [vmem:[#allocation3 + $0xa38] sm:$0xff]  ;;  %v2615_v54 = vld [vmem:[#allocation3 + $0xa20] sm:$0xff] }
 0x7cc   :  { %3237 = vmatpush1.bf16.msra.mxu0 %v2511_v35  ;;  %3401 = vmatpush1.bf16.msra.mxu1 %v2513_v9  ;;  %v2617_v35 = vld [vmem:[#allocation3 + $0xa30] sm:$0xff]  ;;  %v2624_v9 = vld [vmem:[#allocation3 + $0xa68] sm:$0xff] }
 0x7cd   :  { %3238 = vmatprep.subr.bf16.mxu0 %v2520_v13  ;;  %3402 = vmatprep.subr.bf16.mxu1 %v2522_v58  ;;  %v2626_v13 = vld [vmem:[#allocation3 + $0xa78] sm:$0xff]  ;;  %v2623_v58 = vld [vmem:[#allocation3 + $0xa60] sm:$0xff] }
 0x7d0   :  { %3239 = vmatpush1.bf16.msra.mxu0 %v2519_v59  ;;  %3403 = vmatpush1.bf16.msra.mxu1 %v2521_v17  ;;  %v2625_v59 = vld [vmem:[#allocation3 + $0xa70] sm:$0xff]  ;;  %v2632_v17 = vld [vmem:[#allocation3 + $0xaa8] sm:$0xff] }
 0x7d1   :  { %3240 = vmatprep.subr.bf16.mxu0 %v2528_v60  ;;  %3404 = vmatprep.subr.bf16.mxu1 %v2530_v61  ;;  %v2634_v60 = vld [vmem:[#allocation3 + $0xab8] sm:$0xff]  ;;  %v2631_v61 = vld [vmem:[#allocation3 + $0xaa0] sm:$0xff] }
 0x7d4   :  { %3241 = vmatpush1.bf16.msra.mxu0 %v2527_v57  ;;  %3405 = vmatpush1.bf16.msra.mxu1 %v2529_v63  ;;  %v2633_v57 = vld [vmem:[#allocation3 + $0xab0] sm:$0xff]  ;;  %v2640_v63 = vld [vmem:[#allocation3 + $0xae8] sm:$0xff] }
 0x7d5   :  { %3242 = vmatprep.subr.bf16.mxu0 %v2536_v10  ;;  %3406 = vmatprep.subr.bf16.mxu1 %v2538_v53  ;;  %v2642_v10 = vld [vmem:[#allocation3 + $0xaf8] sm:$0xff]  ;;  %v2639_v53 = vld [vmem:[#allocation3 + $0xae0] sm:$0xff] }
 0x7d8   :  { %3243 = vmatpush1.bf16.msra.mxu0 %v2535_v22  ;;  %3407 = vmatpush1.bf16.msra.mxu1 %v2537_v34  ;;  %v2641_v22 = vld [vmem:[#allocation3 + $0xaf0] sm:$0xff]  ;;  %v2648_v34 = vld [vmem:[#allocation3 + $0xb28] sm:$0xff] }
 0x7d9   :  { %3244 = vmatprep.subr.bf16.mxu0 %v2544_v0  ;;  %3408 = vmatprep.subr.bf16.mxu1 %v2546_v1  ;;  %v2650_v0 = vld [vmem:[#allocation3 + $0xb38] sm:$0xff]  ;;  %v2647_v1 = vld [vmem:[#allocation3 + $0xb20] sm:$0xff] }
 0x7dc   :  { %3245 = vmatpush1.bf16.msra.mxu0 %v2543_v2  ;;  %3409 = vmatpush1.bf16.msra.mxu1 %v2545_v38  ;;  %v2649_v2 = vld [vmem:[#allocation3 + $0xb30] sm:$0xff]  ;;  %v2656_v38 = vld [vmem:[#allocation3 + $0xb68] sm:$0xff] }
 0x7dd   :  { %3255 = vmatprep.subr.bf16.mxu0 %v2552_v43  ;;  %3419 = vmatprep.subr.bf16.mxu1 %v2554_v30  ;;  %v2658_v43 = vld [vmem:[#allocation3 + $0xb78] sm:$0xff]  ;;  %v2655_v30 = vld [vmem:[#allocation3 + $0xb60] sm:$0xff] }
 0x7df   :  { %3247 = vmatmul.mubr.bf16.vlgmr.msra.gmra.mrb[20].mxu0 %v4823_v62  ;;  %3411 = vmatmul.mubr.bf16.vlgmr.msra.gmra.mrb[20].mxu1 %v4823_v62  ;;  %v2578_v62 = vld [vmem:[#allocation3 + $0x8f8] sm:$0xff] }
 0x7e0   :  { %3256 = vmatpush1.bf16.msra.mxu0 %v2551_v31  ;;  %3420 = vmatpush1.bf16.msra.mxu1 %v2553_v32  ;;  %v2657_v31 = vld [vmem:[#allocation3 + $0xb70] sm:$0xff]  ;;  %v2664_v32 = vld [vmem:[#allocation3 + $0xba8] sm:$0xff] }
 0x7e1   :  { %3257 = vmatprep.subr.bf16.mxu0 %v2560_v55  ;;  %3421 = vmatprep.subr.bf16.mxu1 %v2562_v3  ;;  %v2666_v55 = vld [vmem:[#allocation3 + $0xbb8] sm:$0xff]  ;;  %v2663_v3 = vld [vmem:[#allocation3 + $0xba0] sm:$0xff] }
 0x7e2   :  { %3287 = vmatprep.mubr.bf16.mxu0 %v4827_v29  ;;  %3451 = vmatprep.mubr.bf16.mxu1 %v4827_v29  ;;  %v2583_v29 = vld [vmem:[#allocation3 + $0x920] sm:$0xff] }
 0x7e4   :  { %3258 = vmatpush1.bf16.msra.mxu0 %v2559_v15  ;;  %3422 = vmatpush1.bf16.msra.mxu1 %v2561_v19  ;;  %v2665_v15 = vld [vmem:[#allocation3 + $0xbb0] sm:$0xff]  ;;  %v2672_v19 = vld [vmem:[#allocation3 + $0xbe8] sm:$0xff] }
 0x7e5   :  { %3259 = vmatprep.subr.bf16.mxu0 %v2568_v6  ;;  %3423 = vmatprep.subr.bf16.mxu1 %v2570_v4  ;;  %v2674_v6 = vld [vmem:[#allocation3 + $0xbf8] sm:$0xff]  ;;  %v2671_v4 = vld [vmem:[#allocation3 + $0xbe0] sm:$0xff] }
 0x7e8   :  { %3260 = vmatpush1.bf16.msra.mxu0 %v2567_v47  ;;  %3424 = vmatpush1.bf16.msra.mxu1 %v2569_v7  ;;  %v2673_v47 = vld [vmem:[#allocation3 + $0xbf0] sm:$0xff]  ;;  %v2680_v7 = vld [vmem:[#allocation3 + $0xc28] sm:$0xff] }
 0x7e9   :  { %3261 = vmatprep.subr.bf16.mxu0 %v2576_v5  ;;  %3425 = vmatprep.subr.bf16.mxu1 %v2578_v62  ;;  %v2682_v5 = vld [vmem:[#allocation3 + $0xc38] sm:$0xff]  ;;  %v2679_v62 = vld [vmem:[#allocation3 + $0xc20] sm:$0xff] }
 0x7ec   :  { %3262 = vmatpush1.bf16.msra.mxu0 %v2575_v36  ;;  %3426 = vmatpush1.bf16.msra.mxu1 %v2577_v52  ;;  %v2681_v36 = vld [vmem:[#allocation3 + $0xc30] sm:$0xff]  ;;  %v2688_v52 = vld [vmem:[#allocation3 + $0xc68] sm:$0xff] }
 0x7ed   :  { %3263 = vmatprep.subr.bf16.mxu0 %v2584_v45  ;;  %3427 = vmatprep.subr.bf16.mxu1 %v2586_v44  ;;  %v2690_v45 = vld [vmem:[#allocation3 + $0xc78] sm:$0xff]  ;;  %v2687_v44 = vld [vmem:[#allocation3 + $0xc60] sm:$0xff] }
 0x7f0   :  { %3264 = vmatpush1.bf16.msra.mxu0 %v2583_v29  ;;  %3428 = vmatpush1.bf16.msra.mxu1 %v2585_v41  ;;  %v2689_v29 = vld [vmem:[#allocation3 + $0xc70] sm:$0xff]  ;;  %v2696_v41 = vld [vmem:[#allocation3 + $0xca8] sm:$0xff] }
 0x7f1   :  { %3265 = vmatprep.subr.bf16.mxu0 %v2592_v37  ;;  %3429 = vmatprep.subr.bf16.mxu1 %v2594_v51  ;;  %v2698_v37 = vld [vmem:[#allocation3 + $0xcb8] sm:$0xff]  ;;  %v2695_v51 = vld [vmem:[#allocation3 + $0xca0] sm:$0xff] }
 0x7f4   :  { %3266 = vmatpush1.bf16.msra.mxu0 %v2591_v16  ;;  %3430 = vmatpush1.bf16.msra.mxu1 %v2593_v18  ;;  %v2697_v16 = vld [vmem:[#allocation3 + $0xcb0] sm:$0xff]  ;;  %v2704_v18 = vld [vmem:[#allocation3 + $0xce8] sm:$0xff] }
 0x7f5   :  { %3267 = vmatprep.subr.bf16.mxu0 %v2600_v26  ;;  %3431 = vmatprep.subr.bf16.mxu1 %v2602_v48  ;;  %v2703_v26 = vld [vmem:[#allocation3 + $0xce0] sm:$0xff]  ;;  %v2705_v48 = vld [vmem:[#allocation3 + $0xcf0] sm:$0xff] }
 0x7f8   :  { %3268 = vmatpush1.bf16.msra.mxu0 %v2599_v42  ;;  %3432 = vmatpush1.bf16.msra.mxu1 %v2601_v39  ;;  %v2712_v42 = vld [vmem:[#allocation3 + $0xd28] sm:$0xff]  ;;  %v2714_v39 = vld [vmem:[#allocation3 + $0xd38] sm:$0xff] }
 0x7f9   :  { %3269 = vmatprep.subr.bf16.mxu0 %v2608_v46  ;;  %3433 = vmatprep.subr.bf16.mxu1 %v2610_v49  ;;  %v4865_v46 = vld [vmem:[#allocation23] sm:$0xff]  ;;  %v2713_v49 = vld [vmem:[#allocation3 + $0xd30] sm:$0xff] }
 0x7fc   :  { %3270 = vmatpush1.bf16.msra.mxu0 %v2607_v33  ;;  %3434 = vmatpush1.bf16.msra.mxu1 %v2609_v12  ;;  %v2720_v33 = vld [vmem:[#allocation3 + $0xd68] sm:$0xff]  ;;  %v2722_v12 = vld [vmem:[#allocation3 + $0xd78] sm:$0xff] }
 0x7fd   :  { %3271 = vmatprep.subr.bf16.mxu0 %v2616_v50  ;;  %3435 = vmatprep.subr.bf16.mxu1 %v2618_v40  ;;  %v2808_v50 = vrot.slane %v4865_v46, %v4547_v23  ;;  %v2816_v40 = vrot.slane %v4865_v46, %v4594_v14 }
 0x800   :  { %3272 = vmatpush1.bf16.msra.mxu0 %v2615_v54  ;;  %3436 = vmatpush1.bf16.msra.mxu1 %v2617_v35  ;;  %v2812_v54 = vrot.slane %v4865_v46, %v4550_v24  ;;  %v2820_v35 = vrot.slane %v4865_v46, %v4597_v21 }
 0x801   :  { %3273 = vmatprep.subr.bf16.mxu0 %v2624_v9  ;;  %3437 = vmatprep.subr.bf16.mxu1 %v2626_v13  ;;  %v2719_v9 = vld [vmem:[#allocation3 + $0xd60] sm:$0xff]  ;;  %v2721_v13 = vld [vmem:[#allocation3 + $0xd70] sm:$0xff] }
 0x804   :  { %3274 = vmatpush1.bf16.msra.mxu0 %v2623_v58  ;;  %3438 = vmatpush1.bf16.msra.mxu1 %v2625_v59 }
 0x805   :  { %3275 = vmatprep.subr.bf16.mxu0 %v2632_v17  ;;  %3439 = vmatprep.subr.bf16.mxu1 %v2634_v60  ;;  %v2728_v17 = vld [vmem:[#allocation3 + $0xda8] sm:$0xff]  ;;  %v2730_v60 = vld [vmem:[#allocation3 + $0xdb8] sm:$0xff] }
 0x808   :  { %3276 = vmatpush1.bf16.msra.mxu0 %v2631_v61  ;;  %3440 = vmatpush1.bf16.msra.mxu1 %v2633_v57 }
 0x809   :  { %3277 = vmatprep.subr.bf16.mxu0 %v2640_v63  ;;  %3441 = vmatprep.subr.bf16.mxu1 %v2642_v10 }
 0x80c   :  { %3278 = vmatpush1.bf16.msra.mxu0 %v2639_v53  ;;  %3442 = vmatpush1.bf16.msra.mxu1 %v2641_v22 }
 0x80d   :  { %3279 = vmatprep.subr.bf16.mxu0 %v2648_v34  ;;  %3443 = vmatprep.subr.bf16.mxu1 %v2650_v0  ;;  %v2727_v34 = vld [vmem:[#allocation3 + $0xda0] sm:$0xff]  ;;  %v2729_v0 = vld [vmem:[#allocation3 + $0xdb0] sm:$0xff] }
 0x810   :  { %3280 = vmatpush1.bf16.msra.mxu0 %v2647_v1  ;;  %3444 = vmatpush1.bf16.msra.mxu1 %v2649_v2  ;;  %v2736_v1 = vld [vmem:[#allocation3 + $0xde8] sm:$0xff]  ;;  %v2738_v2 = vld [vmem:[#allocation3 + $0xdf8] sm:$0xff] }
 0x811   :  { %3281 = vmatprep.subr.bf16.mxu0 %v2656_v38  ;;  %3445 = vmatprep.subr.bf16.mxu1 %v2658_v43  ;;  %v2735_v38 = vld [vmem:[#allocation3 + $0xde0] sm:$0xff]  ;;  %v2737_v43 = vld [vmem:[#allocation3 + $0xdf0] sm:$0xff] }
 0x814   :  { %3282 = vmatpush1.bf16.msra.mxu0 %v2655_v30  ;;  %3446 = vmatpush1.bf16.msra.mxu1 %v2657_v31  ;;  %v2744_v30 = vld [vmem:[#allocation3 + $0xe28] sm:$0xff]  ;;  %v2746_v31 = vld [vmem:[#allocation3 + $0xe38] sm:$0xff] }
 0x815   :  { %3283 = vmatprep.subr.bf16.mxu0 %v2664_v32  ;;  %3447 = vmatprep.subr.bf16.mxu1 %v2666_v55  ;;  %v2743_v32 = vld [vmem:[#allocation3 + $0xe20] sm:$0xff]  ;;  %v2745_v55 = vld [vmem:[#allocation3 + $0xe30] sm:$0xff] }
 0x818   :  { %3284 = vmatpush1.bf16.msra.mxu0 %v2663_v3  ;;  %3448 = vmatpush1.bf16.msra.mxu1 %v2665_v15  ;;  %v2752_v3 = vld [vmem:[#allocation3 + $0xe68] sm:$0xff]  ;;  %v2754_v15 = vld [vmem:[#allocation3 + $0xe78] sm:$0xff] }
 0x819   :  { %3285 = vmatprep.subr.bf16.mxu0 %v2672_v19  ;;  %3449 = vmatprep.subr.bf16.mxu1 %v2674_v6 }
 0x81c   :  { %3286 = vmatpush1.bf16.msra.mxu0 %v2671_v4  ;;  %3450 = vmatpush1.bf16.msra.mxu1 %v2673_v47  ;;  %v2751_v47 = vld [vmem:[#allocation3 + $0xe60] sm:$0xff] }
 0x81d   :  { %3296 = vmatprep.subr.bf16.mxu0 %v2680_v7  ;;  %3460 = vmatprep.subr.bf16.mxu1 %v2682_v5  ;;  %v2753_v7 = vld [vmem:[#allocation3 + $0xe70] sm:$0xff] }
 0x81f   :  { %3288 = vmatmul.mubr.bf16.vlgmr.msra.gmra.mrb[20].mxu0 %v4835_v20  ;;  %3452 = vmatmul.mubr.bf16.vlgmr.msra.gmra.mrb[20].mxu1 %v4835_v20  ;;  %v2706_v20 = vld [vmem:[#allocation3 + $0xcf8] sm:$0xff] }
 0x820   :  { %3297 = vmatpush1.bf16.msra.mxu0 %v2679_v62  ;;  %3461 = vmatpush1.bf16.msra.mxu1 %v2681_v36  ;;  %v2760_v62 = vld [vmem:[#allocation3 + $0xea8] sm:$0xff]  ;;  %v2762_v36 = vld [vmem:[#allocation3 + $0xeb8] sm:$0xff] }
 0x821   :  { %3298 = vmatprep.subr.bf16.mxu0 %v2688_v52  ;;  %3462 = vmatprep.subr.bf16.mxu1 %v2690_v45  ;;  %v2759_v52 = vld [vmem:[#allocation3 + $0xea0] sm:$0xff]  ;;  %v2761_v45 = vld [vmem:[#allocation3 + $0xeb0] sm:$0xff] }
 0x822   :  { %3328 = vmatprep.mubr.bf16.mxu0 %v4839_v8  ;;  %3492 = vmatprep.mubr.bf16.mxu1 %v4839_v8  ;;  %v2711_v8 = vld [vmem:[#allocation3 + $0xd20] sm:$0xff] }
 0x824   :  { %3299 = vmatpush1.bf16.msra.mxu0 %v2687_v44  ;;  %3463 = vmatpush1.bf16.msra.mxu1 %v2689_v29  ;;  %v2768_v44 = vld [vmem:[#allocation3 + $0xee8] sm:$0xff]  ;;  %v2770_v29 = vld [vmem:[#allocation3 + $0xef8] sm:$0xff] }
 0x825   :  { %3300 = vmatprep.subr.bf16.mxu0 %v2696_v41  ;;  %3464 = vmatprep.subr.bf16.mxu1 %v2698_v37  ;;  %v2767_v41 = vld [vmem:[#allocation3 + $0xee0] sm:$0xff]  ;;  %v2769_v37 = vld [vmem:[#allocation3 + $0xef0] sm:$0xff] }
 0x828   :  { %3301 = vmatpush1.bf16.msra.mxu0 %v2695_v51  ;;  %3465 = vmatpush1.bf16.msra.mxu1 %v2697_v16  ;;  %v2776_v51 = vld [vmem:[#allocation3 + $0xf28] sm:$0xff]  ;;  %v2778_v16 = vld [vmem:[#allocation3 + $0xf38] sm:$0xff] }
 0x829   :  { %3302 = vmatprep.subr.bf16.mxu0 %v2704_v18  ;;  %3466 = vmatprep.subr.bf16.mxu1 %v2706_v20  ;;  %v2775_v18 = vld [vmem:[#allocation3 + $0xf20] sm:$0xff]  ;;  %v2777_v20 = vld [vmem:[#allocation3 + $0xf30] sm:$0xff] }
 0x82c   :  { %3303 = vmatpush1.bf16.msra.mxu0 %v2703_v26  ;;  %3467 = vmatpush1.bf16.msra.mxu1 %v2705_v48  ;;  %v2784_v26 = vld [vmem:[#allocation3 + $0xf68] sm:$0xff]  ;;  %v2786_v48 = vld [vmem:[#allocation3 + $0xf78] sm:$0xff] }
 0x82d   :  { %3304 = vmatprep.subr.bf16.mxu0 %v2712_v42  ;;  %3468 = vmatprep.subr.bf16.mxu1 %v2714_v39  ;;  %v2783_v42 = vld [vmem:[#allocation3 + $0xf60] sm:$0xff]  ;;  %v2785_v39 = vld [vmem:[#allocation3 + $0xf70] sm:$0xff] }
 0x830   :  { %3305 = vmatpush1.bf16.msra.mxu0 %v2711_v8  ;;  %3469 = vmatpush1.bf16.msra.mxu1 %v2713_v49  ;;  %v2792_v8 = vld [vmem:[#allocation3 + $0xfa8] sm:$0xff]  ;;  %v2794_v49 = vld [vmem:[#allocation3 + $0xfb8] sm:$0xff] }
 0x831   :  { %3306 = vmatprep.subr.bf16.mxu0 %v2720_v33  ;;  %3470 = vmatprep.subr.bf16.mxu1 %v2722_v12  ;;  %v2791_v33 = vld [vmem:[#allocation3 + $0xfa0] sm:$0xff]  ;;  %v2793_v12 = vld [vmem:[#allocation3 + $0xfb0] sm:$0xff] }
 0x832   :  { %v3002_v58 = vpop.f32.mrb[16].mxu0  ;;  %v3166_v59 = vpop.f32.mrb[16].mxu1 }
 0x833   :  { %v3675_v23 = vadd.f32 %v3002_v58, %v2808_v50  ;;  %v3677_v61 = vadd.f32 %v3166_v59, %v2816_v40  ;;  %v3004_v57 = vpop.f32.mrb[17].mxu0  ;;  %v3168_v14 = vpop.f32.mrb[17].mxu1  ;;  %v2800_v50 = vld [vmem:[#allocation3 + $0xfe8] sm:$0xff]  ;;  %v2802_v40 = vld [vmem:[#allocation3 + $0xff8] sm:$0xff]  ;;  %v2828_v58 = vrot.slane %v4865_v46, %v4737_v25  ;;  %v2836_v59 = vrot.slane %v4865_v46, %v4743_v28 }
 0x834   :  { %v3676_v63 = vadd.f32 %v3004_v57, %v2812_v54  ;;  %v3678_v10 = vadd.f32 %v3168_v14, %v2820_v35  ;;  %v3006_v53 = vpop.f32.mrb[18].mxu0  ;;  %v3170_v22 = vpop.f32.mrb[18].mxu1  ;;  %3307 = vmatpush1.bf16.msra.mxu0 %v2719_v9  ;;  %3471 = vmatpush1.bf16.msra.mxu1 %v2721_v13  ;;  %v2799_v54 = vld [vmem:[#allocation3 + $0xfe0] sm:$0xff]  ;;  %v2801_v35 = vld [vmem:[#allocation3 + $0xff0] sm:$0xff]  ;;  %v2824_v9 = vrot.slane %v4865_v46, %v4734_v56 }
 0x835   :  { %3935 = vtanh.f32 %v3675_v23  ;;  %v3007_v24 = vpop.f32.mrb[19].mxu0  ;;  %v3171_v21 = vpop.f32.mrb[19].mxu1  ;;  %3308 = vmatprep.subr.bf16.mxu0 %v2728_v17  ;;  %3472 = vmatprep.subr.bf16.mxu1 %v2730_v60  ;;  %v2832_v13 = vrot.slane %v4865_v46, %v4740_v27 }
 0x836   :  { %3937 = vtanh.f32 %v3677_v61 }
 0x837   :  { %3939 = vtanh.f32 %v3676_v63 }
 0x838   :  { %3941 = vtanh.f32 %v3678_v10  ;;  %3309 = vmatpush1.bf16.msra.mxu0 %v2727_v34  ;;  %3473 = vmatpush1.bf16.msra.mxu1 %v2729_v0 }
 0x839   :  { %3310 = vmatprep.subr.bf16.mxu0 %v2736_v1  ;;  %3474 = vmatprep.subr.bf16.mxu1 %v2738_v2 }
 0x83c   :  { %3311 = vmatpush1.bf16.msra.mxu0 %v2735_v38  ;;  %3475 = vmatpush1.bf16.msra.mxu1 %v2737_v43 }
 0x83d   :  { %3312 = vmatprep.subr.bf16.mxu0 %v2744_v30  ;;  %3476 = vmatprep.subr.bf16.mxu1 %v2746_v31 }
 0x83f   :  { %v3936_v19 = vpop.eup %3935 }
 0x840   :  { %v3938_v6 = vpop.eup %3937  ;;  %3509 = vst [vmem:[#allocation25] sm:$0xff] %v3936_v19  ;;  %3313 = vmatpush1.bf16.msra.mxu0 %v2743_v32  ;;  %3477 = vmatpush1.bf16.msra.mxu1 %v2745_v55 }
 0x841   :  { %v3940_v4 = vpop.eup %3939  ;;  %3511 = vst [vmem:[#allocation25 + $0x10] sm:$0xff] %v3938_v6  ;;  %3314 = vmatprep.subr.bf16.mxu0 %v2752_v3  ;;  %3478 = vmatprep.subr.bf16.mxu1 %v2754_v15 }
 0x842   :  { %v3942_v5 = vpop.eup %3941  ;;  %3510 = vst [vmem:[#allocation25 + $0x8] sm:$0xff] %v3940_v4 }
 0x843   :  { %3512 = vst [vmem:[#allocation25 + $0x18] sm:$0xff] %v3942_v5 }
 0x844   :  { %3315 = vmatpush1.bf16.msra.mxu0 %v2751_v47  ;;  %3479 = vmatpush1.bf16.msra.mxu1 %v2753_v7 }
 0x845   :  { %3316 = vmatprep.subr.bf16.mxu0 %v2760_v62  ;;  %3480 = vmatprep.subr.bf16.mxu1 %v2762_v36 }
 0x848   :  { %3317 = vmatpush1.bf16.msra.mxu0 %v2759_v52  ;;  %3481 = vmatpush1.bf16.msra.mxu1 %v2761_v45 }
 0x849   :  { %3318 = vmatprep.subr.bf16.mxu0 %v2768_v44  ;;  %3482 = vmatprep.subr.bf16.mxu1 %v2770_v29 }
 0x84c   :  { %3319 = vmatpush1.bf16.msra.mxu0 %v2767_v41  ;;  %3483 = vmatpush1.bf16.msra.mxu1 %v2769_v37 }
 0x84d   :  { %3320 = vmatprep.subr.bf16.mxu0 %v2776_v51  ;;  %3484 = vmatprep.subr.bf16.mxu1 %v2778_v16 }
 0x850   :  { %3321 = vmatpush1.bf16.msra.mxu0 %v2775_v18  ;;  %3485 = vmatpush1.bf16.msra.mxu1 %v2777_v20 }
 0x851   :  { %3322 = vmatprep.subr.bf16.mxu0 %v2784_v26  ;;  %3486 = vmatprep.subr.bf16.mxu1 %v2786_v48 }
 0x854   :  { %3323 = vmatpush1.bf16.msra.mxu0 %v2783_v42  ;;  %3487 = vmatpush1.bf16.msra.mxu1 %v2785_v39 }
 0x855   :  { %3324 = vmatprep.subr.bf16.mxu0 %v2792_v8  ;;  %3488 = vmatprep.subr.bf16.mxu1 %v2794_v49 }
 0x858   :  { %3325 = vmatpush1.bf16.msra.mxu0 %v2791_v33  ;;  %3489 = vmatpush1.bf16.msra.mxu1 %v2793_v12 }
 0x859   :  { %3326 = vmatprep.subr.bf16.mxu0 %v2800_v50  ;;  %3490 = vmatprep.subr.bf16.mxu1 %v2802_v40 }
 0x85c   :  { %3327 = vmatpush1.bf16.msra.mxu0 %v2799_v54  ;;  %3491 = vmatpush1.bf16.msra.mxu1 %v2801_v35 }
 0x85f   :  { %3329 = vmatmul.mubr.bf16.vlgmr.msra.gmra.mrb[20].mxu0 %v4847_v11  ;;  %3493 = vmatmul.mubr.bf16.vlgmr.msra.gmra.mrb[20].mxu1 %v4847_v11 }
 0x932   :  { %v3330_v17 = vpop.f32.mrb[20].mxu0  ;;  %v3494_v60 = vpop.f32.mrb[20].mxu1 }
 0x933   :  { %v3679_v23 = vadd.f32 %v3330_v17, %v2824_v9  ;;  %v3681_v61 = vadd.f32 %v3494_v60, %v2832_v13  ;;  %v3332_v57 = vpop.f32.mrb[21].mxu0  ;;  %v3496_v14 = vpop.f32.mrb[21].mxu1 }
 0x934   :  { %v3680_v63 = vadd.f32 %v3332_v57, %v2828_v58  ;;  %v3682_v11 = vadd.f32 %v3496_v14, %v2836_v59  ;;  %v3334_v10 = vpop.f32.mrb[22].mxu0  ;;  %v3498_v53 = vpop.f32.mrb[22].mxu1 }
 0x935   :  { %3943 = vtanh.f32 %v3679_v23  ;;  %v3335_v56 = vpop.f32.mrb[23].mxu0  ;;  %v3499_v22 = vpop.f32.mrb[23].mxu1 }
 0x936   :  { %3945 = vtanh.f32 %v3681_v61 }
 0x937   :  { %3947 = vtanh.f32 %v3680_v63 }
 0x938   :  { %3949 = vtanh.f32 %v3682_v11 }
 0x93f   :  { %v3944_v25 = vpop.eup %3943 }
 0x940   :  { %v3946_v27 = vpop.eup %3945  ;;  %3513 = vst [vmem:[#allocation25 + $0x20] sm:$0xff] %v3944_v25 }
 0x941   :  { %v3948_v28 = vpop.eup %3947  ;;  %3515 = vst [vmem:[#allocation25 + $0x30] sm:$0xff] %v3946_v27 }
 0x942   :  { %v3950_v46 = vpop.eup %3949  ;;  %3514 = vst [vmem:[#allocation25 + $0x28] sm:$0xff] %v3948_v28 }
 0x943   :  { %3516 = vst [vmem:[#allocation25 + $0x38] sm:$0xff] %v3950_v46 }
 0x944   :  { %4226 = shalt.err (!%p4223_p2)
}
 0x945   :  { %s4227_s5 = scalar_lea.hbm %s4911_s14, 1024 }
 0x946   :  { %p4228_p3 = scmp.ne.s32.totalorder %s4911_s14, %s4227_s5  ;;  %p4231_p4 = scmp.lt.u32.totalorder %s4227_s5, %s4911_s14 }
 0x948   :  { %p4233_p5 = pnand %p4231_p4, %p4228_p3 }
 0x94a   :  { %4236 = shalt.err (!%p4233_p5)
}
 0x94b   :  { %3526 = dma.vmem_to_hbm [thread:$0]  %s3524_s23, 1024, %s4911_s14, [#allocation7]  }
 0x94c   :  { %4255 = dma.done.wait [#allocation7], 1024  }
 0x94d   :  { %4256 = vsyncadd [#allocation7], 4294966272 }
 0x94e   :  { %3530 = vsyncpa [#allocation6], 1 }
 0x94f   :  { %3531 = vsyncpa [#allocation9], 1 }
 0x950   :  { %3532 = vsyncpa [#allocation12], 1 }
 0x951   :  { %3533 = vsyncpa [#allocation15], 1 }
 0x952   :  { %3534 = vsyncpa [#allocation18], 1 }
 0x953   :  { %3535 = vsyncpa [#allocation21], 1 }
 0x954   :  { %3536 = vsyncpa [#allocation24], 1 }
 0x955   :  { %3537 = vsyncpa [#allocation7], 1 }
 0x956   :  { %3538 = vsyncmov [#allocation4] }
 0x959   :  { %s3539_s11 = vpop.sfrf %3538 }
 0x95a   :  { %p3644_p6 = scmp.ne.s32.totalorder %s3539_s11, 0 }
 0x95c   :  { %3543 = shalt.err (%p3644_p6)  }
 0x95d   :  { %3545 = vsyncmov [#allocation4 + $0x1] }
 0x960   :  { %s3546_s0 = vpop.sfrf %3545 }
 0x961   :  { %p3645_p7 = scmp.ne.s32.totalorder %s3546_s0, 0 }
 0x963   :  { %3550 = shalt.err (%p3645_p7)  }

</bundles_post_ra>
